<compile_context>
chip_gen: v7x
topology: tpu7x:2x2x1
jax: 0.10.0
libtpu: 0.0.40
codegen_flags: <defaults>
</compile_context>

<pallas_src>
import jax
import jax.numpy as jnp
from jax.experimental import pallas as pl
from jax.experimental.pallas import tpu as pltpu

ELMO_DIM = 1024       # nn.LSTM(1024, ...)
LSTM_HIDDEN = 100     # self.lstm_layer
HP = 128              # lane-padded per-gate / hidden width
NUM_SENTENCES = 2
NUM_CLASSES = 3
SEQ_LEN = 8
BATCH = 2


def _sigmoid(x):
    # EUP tanh form; avoids a VALU divide and exp(-x) overflow for large -x.
    return 0.5 * (jnp.tanh(0.5 * x) + 1.0)


# ----------------------------------------------------------------------------
# Single fused kernel: hoisted input projection -> serial LSTM recurrence
# (both sentences batched along rows) -> FF head -> softmax over dim 0.
# ----------------------------------------------------------------------------
def _clf_kernel(x_ref, wih_ref, whh_ref, hw_ref, b_ref, o_ref, hs_sc):
    T, B, C = o_ref.shape
    BB = 2 * B                       # rows per step: [:B]=s1, [B:]=s2
    Hp = whh_ref.shape[0]            # padded hidden width (128)
    Lp = hw_ref.shape[-1]            # padded linear width (256 == 2*Hp)

    # ---- hoisted input projection: one bf16 MXU matmul, f32 accumulation ----
    gx = (jnp.dot(x_ref[...], wih_ref[...], preferred_element_type=jnp.float32)
          + b_ref[0:1, :])           # (T*BB, 4*Hp) f32 — lives in vregs

    whh = whh_ref[...]               # (Hp, 4*Hp) bf16, hoisted

    # ---- serial recurrence: only the small bf16 h @ W_hh matmul per step ----
    h = jnp.zeros((BB, Hp), jnp.float32)
    c = jnp.zeros((BB, Hp), jnp.float32)
    for t in range(T):               # static unroll; carry + gx stay in vregs
        g = gx[t * BB:(t + 1) * BB, :] + jnp.dot(
            h.astype(jnp.bfloat16), whh, preferred_element_type=jnp.float32)
        sig = _sigmoid(g[:, 0:3 * Hp])          # gate slots packed i, f, o, g
        i_g = sig[:, 0:Hp]
        f_g = sig[:, Hp:2 * Hp]
        o_g = sig[:, 2 * Hp:3 * Hp]
        g_g = jnp.tanh(g[:, 3 * Hp:4 * Hp])
        c = f_g * c + i_g * g_g
        h = o_g * jnp.tanh(c)
        # Flat (T*B, 2*Hp) scratch: lane halves are lstm_s1 / lstm_s2, so
        # torch.cat((lstm_s1, lstm_s2), 2) is already laid out lane-dense.
        hs_sc[t * B:(t + 1) * B, 0:Hp] = h[0:B, :]
        hs_sc[t * B:(t + 1) * B, Hp:2 * Hp] = h[B:BB, :]

    # ---- feed-forward head: bf16 weights/activations, f32 accumulation ----
    hh = hs_sc[...].astype(jnp.bfloat16)        # (T*B, 2*Hp), contiguous read
    a = jnp.tanh(jnp.dot(hh, hw_ref[0], preferred_element_type=jnp.float32)
                 + b_ref[1:2, 0:Lp])
    a = jnp.tanh(jnp.dot(a.astype(jnp.bfloat16), hw_ref[1],
                         preferred_element_type=jnp.float32) + b_ref[2:3, 0:Lp])
    a = jnp.tanh(jnp.dot(a.astype(jnp.bfloat16), hw_ref[2],
                         preferred_element_type=jnp.float32) + b_ref[3:4, 0:Lp])
    logits = (jnp.dot(a.astype(jnp.bfloat16), hw_ref[3],
                      preferred_element_type=jnp.float32) + b_ref[4:5, 0:Lp])

    # torch.nn.Softmax() with no dim on a 3-D input -> softmax over dim 0
    # (legacy _get_softmax_dim default), i.e. over time.  Exact divide so the
    # outputs sum to 1.  Done with static (B, C) row groups -> no reshape.
    lg = logits[:, 0:C]                          # (T*B, C)
    rows = [lg[t * B:(t + 1) * B, :] for t in range(T)]
    m = rows[0]
    for r in rows[1:]:
        m = jnp.maximum(m, r)
    es = [jnp.exp(r - m) for r in rows]
    denom = es[0]
    for e in es[1:]:
        denom = denom + e
    inv = 1.0 / denom
    for t in range(T):
        o_ref[t] = es[t] * inv


def _pack_params(params):
    """Pack weights for the kernel.

    * LSTM gates stacked into 128-wide lane-aligned slots in i,f,o,g order
      (three sigmoid gates contiguous -> one fused EUP tanh in-kernel).
    * W1 pre-split (rows :H / H:) into the top/bottom 128-row halves of a
      (256, 256) slab so cat((lstm_s1, lstm_s2), 2) @ W1 needs no in-kernel
      feature concat; W2/W3/W4 zero-padded into the same (4, 256, 256) slab.
    * All zero-padding happens BEFORE the bf16 cast, preserving the padded-lane
      invariant (padded lanes of gx / whh / biases are exactly 0, so c/h stay 0
      there and nothing leaks into the FF head).
    * Biases packed into one (8, 512) f32 buffer: row 0 = LSTM bias, rows 1-4 =
      FF biases.  DMA count: 13 -> 5.

    NOTE: when loading real torch weights, pass b = b_ih + b_hh and transpose
    the Linear / LSTM weight matrices to (in, out) layout first.
    """
    w_ih, w_hh, b = params["w_ih"], params["w_hh"], params["b"]
    D, H = w_ih.shape[1], w_ih.shape[2]
    order = (0, 1, 3, 2)                       # torch order i,f,g,o -> i,f,o,g
    wih_p = jnp.zeros((D, 4 * HP), jnp.float32)
    whh_p = jnp.zeros((HP, 4 * HP), jnp.float32)
    biases = jnp.zeros((8, 4 * HP), jnp.float32)
    for slot, k in enumerate(order):
        wih_p = wih_p.at[:, slot * HP:slot * HP + H].set(w_ih[k])
        whh_p = whh_p.at[:H, slot * HP:slot * HP + H].set(w_hh[k])
        biases = biases.at[0, slot * HP:slot * HP + H].set(b[k, 0])

    w1 = params["w1"]
    L = w1.shape[0]                            # 2*H
    C = params["w4"].shape[-1]
    LP = 2 * HP
    head_w = jnp.zeros((4, LP, LP), jnp.float32)
    head_w = head_w.at[0, :H, :L].set(w1[:H])          # lstm_s1 rows of W1
    head_w = head_w.at[0, HP:HP + H, :L].set(w1[H:])   # lstm_s2 rows of W1
    head_w = head_w.at[1, :L, :L].set(params["w2"])
    head_w = head_w.at[2, :L, :L].set(params["w3"])
    head_w = head_w.at[3, :L, :C].set(params["w4"])

    biases = biases.at[1, :L].set(params["b1"][0])
    biases = biases.at[2, :L].set(params["b2"][0])
    biases = biases.at[3, :L].set(params["b3"][0])
    biases = biases.at[4, :C].set(params["b4"][0])

    # bf16 weights halve weight DMA and make every matmul single-pass bf16;
    # accumulation stays f32.  Biases stay f32 (added to f32 accumulators).
    return (wih_p.astype(jnp.bfloat16), whh_p.astype(jnp.bfloat16),
            head_w.astype(jnp.bfloat16), biases)


def clf_forward(s1_emb, s2_emb, params):
    T, B, D = s1_emb.shape
    BB = 2 * B
    C = params["w4"].shape[-1]
    # Both sentences batched along rows ([:B]=s1, [B:]=s2 per timestep);
    # reshape to (T*BB, D) here so the kernel does no input reshape.
    xc = (jnp.concatenate([s1_emb, s2_emb], axis=1)
          .reshape(T * BB, D).astype(jnp.bfloat16))
    wih_p, whh_p, head_w, biases = _pack_params(params)

    vmem = pl.BlockSpec(memory_space=pltpu.MemorySpace.VMEM)
    return pl.pallas_call(
        _clf_kernel,
        out_shape=jax.ShapeDtypeStruct((T, B, C), jnp.float32),
        in_specs=[vmem] * 5,
        out_specs=vmem,
        scratch_shapes=[
            pltpu.VMEM((T * B, 2 * HP), jnp.float32),   # [lstm_s1 | lstm_s2]
        ],
    )(xc, wih_p, whh_p, head_w, biases)


# ----------------------------------------------------------------------------
# Pure-JAX reference (for correctness check only).
# ----------------------------------------------------------------------------
def _lstm_ref(x, w_ih, w_hh, b):
    T, B, _ = x.shape
    H = w_hh.shape[-1]

    def step(carry, xt):
        h, c = carry
        gs = [xt @ w_ih[k] + h @ w_hh[k] + b[k] for k in range(4)]
        i = jax.nn.sigmoid(gs[0]); f = jax.nn.sigmoid(gs[1])
        g = jnp.tanh(gs[2]); o = jax.nn.sigmoid(gs[3])
        c = f * c + i * g
        h = o * jnp.tanh(c)
        return (h, c), h

    init = (jnp.zeros((B, H), jnp.float32), jnp.zeros((B, H), jnp.float32))
    _, ys = jax.lax.scan(step, init, x)
    return ys


def clf_forward_ref(s1_emb, s2_emb, p):
    l1 = _lstm_ref(s1_emb, p["w_ih"], p["w_hh"], p["b"])
    l2 = _lstm_ref(s2_emb, p["w_ih"], p["w_hh"], p["b"])
    h = jnp.concatenate([l1, l2], axis=2)
    h = jnp.tanh(h @ p["w1"] + p["b1"])
    h = jnp.tanh(h @ p["w2"] + p["b2"])
    h = jnp.tanh(h @ p["w3"] + p["b3"])
    logits = h @ p["w4"] + p["b4"]
    return jax.nn.softmax(logits, axis=0)   # legacy Softmax() default on 3-D


if __name__ == "__main__":
    T, B = SEQ_LEN, BATCH
    D, H = ELMO_DIM, LSTM_HIDDEN
    L = LSTM_HIDDEN * NUM_SENTENCES
    C = NUM_CLASSES

    key = jax.random.PRNGKey(0)
    keys = jax.random.split(key, 16)

    # Precomputed "ELMo representations" (see TODO(synk) at top of file).
    s1_emb = jax.random.normal(keys[0], (T, B, D), jnp.float32) * 0.1
    s2_emb = jax.random.normal(keys[1], (T, B, D), jnp.float32) * 0.1

    ls = 1.0 / jnp.sqrt(jnp.float32(H))
    lf = 1.0 / jnp.sqrt(jnp.float32(L))
    params = {
        "w_ih": jax.random.uniform(keys[2], (4, D, H), jnp.float32, -ls, ls),
        "w_hh": jax.random.uniform(keys[3], (4, H, H), jnp.float32, -ls, ls),
        "b":    jax.random.uniform(keys[4], (4, 1, H), jnp.float32, -ls, ls),
        "w1": jax.random.uniform(keys[5], (L, L), jnp.float32, -lf, lf),
        "b1": jax.random.uniform(keys[6], (1, L), jnp.float32, -lf, lf),
        "w2": jax.random.uniform(keys[7], (L, L), jnp.float32, -lf, lf),
        "b2": jax.random.uniform(keys[8], (1, L), jnp.float32, -lf, lf),
        "w3": jax.random.uniform(keys[9], (L, L), jnp.float32, -lf, lf),
        "b3": jax.random.uniform(keys[10], (1, L), jnp.float32, -lf, lf),
        "w4": jax.random.uniform(keys[11], (L, C), jnp.float32, -lf, lf),
        "b4": jax.random.uniform(keys[12], (1, C), jnp.float32, -lf, lf),
    }

    out = jax.jit(clf_forward)(s1_emb, s2_emb, params)
    out = jax.block_until_ready(out)

    ref = clf_forward_ref(s1_emb, s2_emb, params)
    assert out.shape == (T, B, C), out.shape
    # Tolerance covers the bf16 weight/activation casts (f32 reference).
    assert jnp.allclose(out, ref, atol=2e-2), float(jnp.max(jnp.abs(out - ref)))
    # Exact-divide softmax over dim 0 (time): proper distribution over T.
    assert jnp.allclose(out.sum(axis=0), 1.0, atol=1e-4)
    print("KERNEL_OK")
</pallas_src>

<mosaic_0001>
module attributes {stable_mosaic.version = 11 : i64} {
  func.func @_clf_kernel(%arg0: memref<32x1024xbf16, #tpu.memory_space<vmem>>, %arg1: memref<1024x512xbf16, #tpu.memory_space<vmem>>, %arg2: memref<128x512xbf16, #tpu.memory_space<vmem>>, %arg3: memref<4x256x256xbf16, #tpu.memory_space<vmem>>, %arg4: memref<8x512xf32, #tpu.memory_space<vmem>>, %arg5: memref<8x2x3xf32, #tpu.memory_space<vmem>>, %arg6: memref<16x256xf32, #tpu.memory_space<vmem>>) attributes {dimension_semantics = [], scalar_prefetch = 0 : i64, scratch_operands = 1 : i64, tpu.core_type = #tpu.core_type<tc>} {
    %c0 = arith.constant 0 : index
    %c0_0 = arith.constant 0 : index
    %0 = vector.load %arg0[%c0, %c0_0] : memref<32x1024xbf16, #tpu.memory_space<vmem>>, vector<32x1024xbf16>
    %c0_1 = arith.constant 0 : index
    %c0_2 = arith.constant 0 : index
    %1 = vector.load %arg1[%c0_1, %c0_2] : memref<1024x512xbf16, #tpu.memory_space<vmem>>, vector<1024x512xbf16>
    %cst = arith.constant dense<0.000000e+00> : vector<32x512xf32>
    %2 = tpu.matmul %0, %1, %cst {dimension_numbers = #tpu.dot_dimension_numbers<[1], [0], [0], [1], [0, 0, 1, 1], [], []>} : vector<32x1024xbf16>, vector<1024x512xbf16>, vector<32x512xf32> -> vector<32x512xf32>
    %c0_3 = arith.constant 0 : index
    %c0_4 = arith.constant 0 : index
    %3 = vector.load %arg4[%c0_3, %c0_4] : memref<8x512xf32, #tpu.memory_space<vmem>>, vector<1x512xf32>
    %4 = vector.broadcast %3 : vector<1x512xf32> to vector<32x512xf32>
    %5 = arith.addf %2, %4 : vector<32x512xf32>
    %c0_5 = arith.constant 0 : index
    %c0_6 = arith.constant 0 : index
    %6 = vector.load %arg2[%c0_5, %c0_6] : memref<128x512xbf16, #tpu.memory_space<vmem>>, vector<128x512xbf16>
    %cst_7 = arith.constant 0.000000e+00 : f32
    %7 = vector.broadcast %cst_7 : f32 to vector<4x128xf32>
    %cst_8 = arith.constant 0.000000e+00 : f32
    %8 = vector.broadcast %cst_8 : f32 to vector<4x128xf32>
    %9 = vector.extract_strided_slice %5 {offsets = [0, 0], sizes = [4, 512], strides = [1, 1]} : vector<32x512xf32> to vector<4x512xf32>
    %10 = arith.truncf %7 : vector<4x128xf32> to vector<4x128xbf16>
    %cst_9 = arith.constant dense<0.000000e+00> : vector<4x512xf32>
    %11 = tpu.matmul %10, %6, %cst_9 {dimension_numbers = #tpu.dot_dimension_numbers<[1], [0], [0], [1], [0, 0, 1, 1], [], []>} : vector<4x128xbf16>, vector<128x512xbf16>, vector<4x512xf32> -> vector<4x512xf32>
    %12 = arith.addf %9, %11 : vector<4x512xf32>
    %13 = vector.extract_strided_slice %12 {offsets = [0, 0], sizes = [4, 384], strides = [1, 1]} : vector<4x512xf32> to vector<4x384xf32>
    %cst_10 = arith.constant 5.000000e-01 : f32
    %14 = vector.broadcast %cst_10 : f32 to vector<4x384xf32>
    %15 = arith.mulf %14, %13 : vector<4x384xf32>
    %16 = math.tanh %15 : vector<4x384xf32>
    %cst_11 = arith.constant 1.000000e+00 : f32
    %17 = vector.broadcast %cst_11 : f32 to vector<4x384xf32>
    %18 = arith.addf %16, %17 : vector<4x384xf32>
    %cst_12 = arith.constant 5.000000e-01 : f32
    %19 = vector.broadcast %cst_12 : f32 to vector<4x384xf32>
    %20 = arith.mulf %19, %18 : vector<4x384xf32>
    %21 = vector.extract_strided_slice %20 {offsets = [0, 0], sizes = [4, 128], strides = [1, 1]} : vector<4x384xf32> to vector<4x128xf32>
    %22 = vector.extract_strided_slice %20 {offsets = [0, 128], sizes = [4, 128], strides = [1, 1]} : vector<4x384xf32> to vector<4x128xf32>
    %23 = vector.extract_strided_slice %20 {offsets = [0, 256], sizes = [4, 128], strides = [1, 1]} : vector<4x384xf32> to vector<4x128xf32>
    %24 = vector.extract_strided_slice %12 {offsets = [0, 384], sizes = [4, 128], strides = [1, 1]} : vector<4x512xf32> to vector<4x128xf32>
    %25 = math.tanh %24 : vector<4x128xf32>
    %26 = arith.mulf %22, %8 : vector<4x128xf32>
    %27 = arith.mulf %21, %25 : vector<4x128xf32>
    %28 = arith.addf %26, %27 : vector<4x128xf32>
    %29 = math.tanh %28 : vector<4x128xf32>
    %30 = arith.mulf %23, %29 : vector<4x128xf32>
    %31 = vector.extract_strided_slice %30 {offsets = [0, 0], sizes = [2, 128], strides = [1, 1]} : vector<4x128xf32> to vector<2x128xf32>
    %c0_13 = arith.constant 0 : index
    %c0_14 = arith.constant 0 : index
    %32 = vector.load %arg6[%c0_13, %c0_14] : memref<16x256xf32, #tpu.memory_space<vmem>>, vector<2x128xf32>
    tpu.vector_store %arg6[%c0_13, %c0_14], %31 {strides = array<i32>} : memref<16x256xf32, #tpu.memory_space<vmem>>, vector<2x128xf32>,
    %33 = vector.extract_strided_slice %30 {offsets = [2, 0], sizes = [2, 128], strides = [1, 1]} : vector<4x128xf32> to vector<2x128xf32>
    %c0_15 = arith.constant 0 : index
    %c128 = arith.constant 128 : index
    %34 = vector.load %arg6[%c0_15, %c128] : memref<16x256xf32, #tpu.memory_space<vmem>>, vector<2x128xf32>
    tpu.vector_store %arg6[%c0_15, %c128], %33 {strides = array<i32>} : memref<16x256xf32, #tpu.memory_space<vmem>>, vector<2x128xf32>,
    %35 = vector.extract_strided_slice %5 {offsets = [4, 0], sizes = [4, 512], strides = [1, 1]} : vector<32x512xf32> to vector<4x512xf32>
    %36 = arith.truncf %30 : vector<4x128xf32> to vector<4x128xbf16>
    %cst_16 = arith.constant dense<0.000000e+00> : vector<4x512xf32>
    %37 = tpu.matmul %36, %6, %cst_16 {dimension_numbers = #tpu.dot_dimension_numbers<[1], [0], [0], [1], [0, 0, 1, 1], [], []>} : vector<4x128xbf16>, vector<128x512xbf16>, vector<4x512xf32> -> vector<4x512xf32>
    %38 = arith.addf %35, %37 : vector<4x512xf32>
    %39 = vector.extract_strided_slice %38 {offsets = [0, 0], sizes = [4, 384], strides = [1, 1]} : vector<4x512xf32> to vector<4x384xf32>
    %cst_17 = arith.constant 5.000000e-01 : f32
    %40 = vector.broadcast %cst_17 : f32 to vector<4x384xf32>
    %41 = arith.mulf %40, %39 : vector<4x384xf32>
    %42 = math.tanh %41 : vector<4x384xf32>
    %cst_18 = arith.constant 1.000000e+00 : f32
    %43 = vector.broadcast %cst_18 : f32 to vector<4x384xf32>
    %44 = arith.addf %42, %43 : vector<4x384xf32>
    %cst_19 = arith.constant 5.000000e-01 : f32
    %45 = vector.broadcast %cst_19 : f32 to vector<4x384xf32>
    %46 = arith.mulf %45, %44 : vector<4x384xf32>
    %47 = vector.extract_strided_slice %46 {offsets = [0, 0], sizes = [4, 128], strides = [1, 1]} : vector<4x384xf32> to vector<4x128xf32>
    %48 = vector.extract_strided_slice %46 {offsets = [0, 128], sizes = [4, 128], strides = [1, 1]} : vector<4x384xf32> to vector<4x128xf32>
    %49 = vector.extract_strided_slice %46 {offsets = [0, 256], sizes = [4, 128], strides = [1, 1]} : vector<4x384xf32> to vector<4x128xf32>
    %50 = vector.extract_strided_slice %38 {offsets = [0, 384], sizes = [4, 128], strides = [1, 1]} : vector<4x512xf32> to vector<4x128xf32>
    %51 = math.tanh %50 : vector<4x128xf32>
    %52 = arith.mulf %48, %28 : vector<4x128xf32>
    %53 = arith.mulf %47, %51 : vector<4x128xf32>
    %54 = arith.addf %52, %53 : vector<4x128xf32>
    %55 = math.tanh %54 : vector<4x128xf32>
    %56 = arith.mulf %49, %55 : vector<4x128xf32>
    %57 = vector.extract_strided_slice %56 {offsets = [0, 0], sizes = [2, 128], strides = [1, 1]} : vector<4x128xf32> to vector<2x128xf32>
    %c2 = arith.constant 2 : index
    %c0_20 = arith.constant 0 : index
    %58 = vector.load %arg6[%c2, %c0_20] : memref<16x256xf32, #tpu.memory_space<vmem>>, vector<2x128xf32>
    tpu.vector_store %arg6[%c2, %c0_20], %57 {strides = array<i32>} : memref<16x256xf32, #tpu.memory_space<vmem>>, vector<2x128xf32>,
    %59 = vector.extract_strided_slice %56 {offsets = [2, 0], sizes = [2, 128], strides = [1, 1]} : vector<4x128xf32> to vector<2x128xf32>
    %c2_21 = arith.constant 2 : index
    %c128_22 = arith.constant 128 : index
    %60 = vector.load %arg6[%c2_21, %c128_22] : memref<16x256xf32, #tpu.memory_space<vmem>>, vector<2x128xf32>
    tpu.vector_store %arg6[%c2_21, %c128_22], %59 {strides = array<i32>} : memref<16x256xf32, #tpu.memory_space<vmem>>, vector<2x128xf32>,
    %61 = vector.extract_strided_slice %5 {offsets = [8, 0], sizes = [4, 512], strides = [1, 1]} : vector<32x512xf32> to vector<4x512xf32>
    %62 = arith.truncf %56 : vector<4x128xf32> to vector<4x128xbf16>
    %cst_23 = arith.constant dense<0.000000e+00> : vector<4x512xf32>
    %63 = tpu.matmul %62, %6, %cst_23 {dimension_numbers = #tpu.dot_dimension_numbers<[1], [0], [0], [1], [0, 0, 1, 1], [], []>} : vector<4x128xbf16>, vector<128x512xbf16>, vector<4x512xf32> -> vector<4x512xf32>
    %64 = arith.addf %61, %63 : vector<4x512xf32>
    %65 = vector.extract_strided_slice %64 {offsets = [0, 0], sizes = [4, 384], strides = [1, 1]} : vector<4x512xf32> to vector<4x384xf32>
    %cst_24 = arith.constant 5.000000e-01 : f32
    %66 = vector.broadcast %cst_24 : f32 to vector<4x384xf32>
    %67 = arith.mulf %66, %65 : vector<4x384xf32>
    %68 = math.tanh %67 : vector<4x384xf32>
    %cst_25 = arith.constant 1.000000e+00 : f32
    %69 = vector.broadcast %cst_25 : f32 to vector<4x384xf32>
    %70 = arith.addf %68, %69 : vector<4x384xf32>
    %cst_26 = arith.constant 5.000000e-01 : f32
    %71 = vector.broadcast %cst_26 : f32 to vector<4x384xf32>
    %72 = arith.mulf %71, %70 : vector<4x384xf32>
    %73 = vector.extract_strided_slice %72 {offsets = [0, 0], sizes = [4, 128], strides = [1, 1]} : vector<4x384xf32> to vector<4x128xf32>
    %74 = vector.extract_strided_slice %72 {offsets = [0, 128], sizes = [4, 128], strides = [1, 1]} : vector<4x384xf32> to vector<4x128xf32>
    %75 = vector.extract_strided_slice %72 {offsets = [0, 256], sizes = [4, 128], strides = [1, 1]} : vector<4x384xf32> to vector<4x128xf32>
    %76 = vector.extract_strided_slice %64 {offsets = [0, 384], sizes = [4, 128], strides = [1, 1]} : vector<4x512xf32> to vector<4x128xf32>
    %77 = math.tanh %76 : vector<4x128xf32>
    %78 = arith.mulf %74, %54 : vector<4x128xf32>
    %79 = arith.mulf %73, %77 : vector<4x128xf32>
    %80 = arith.addf %78, %79 : vector<4x128xf32>
    %81 = math.tanh %80 : vector<4x128xf32>
    %82 = arith.mulf %75, %81 : vector<4x128xf32>
    %83 = vector.extract_strided_slice %82 {offsets = [0, 0], sizes = [2, 128], strides = [1, 1]} : vector<4x128xf32> to vector<2x128xf32>
    %c4 = arith.constant 4 : index
    %c0_27 = arith.constant 0 : index
    %84 = vector.load %arg6[%c4, %c0_27] : memref<16x256xf32, #tpu.memory_space<vmem>>, vector<2x128xf32>
    tpu.vector_store %arg6[%c4, %c0_27], %83 {strides = array<i32>} : memref<16x256xf32, #tpu.memory_space<vmem>>, vector<2x128xf32>,
    %85 = vector.extract_strided_slice %82 {offsets = [2, 0], sizes = [2, 128], strides = [1, 1]} : vector<4x128xf32> to vector<2x128xf32>
    %c4_28 = arith.constant 4 : index
    %c128_29 = arith.constant 128 : index
    %86 = vector.load %arg6[%c4_28, %c128_29] : memref<16x256xf32, #tpu.memory_space<vmem>>, vector<2x128xf32>
    tpu.vector_store %arg6[%c4_28, %c128_29], %85 {strides = array<i32>} : memref<16x256xf32, #tpu.memory_space<vmem>>, vector<2x128xf32>,
    %87 = vector.extract_strided_slice %5 {offsets = [12, 0], sizes = [4, 512], strides = [1, 1]} : vector<32x512xf32> to vector<4x512xf32>
    %88 = arith.truncf %82 : vector<4x128xf32> to vector<4x128xbf16>
    %cst_30 = arith.constant dense<0.000000e+00> : vector<4x512xf32>
    %89 = tpu.matmul %88, %6, %cst_30 {dimension_numbers = #tpu.dot_dimension_numbers<[1], [0], [0], [1], [0, 0, 1, 1], [], []>} : vector<4x128xbf16>, vector<128x512xbf16>, vector<4x512xf32> -> vector<4x512xf32>
    %90 = arith.addf %87, %89 : vector<4x512xf32>
    %91 = vector.extract_strided_slice %90 {offsets = [0, 0], sizes = [4, 384], strides = [1, 1]} : vector<4x512xf32> to vector<4x384xf32>
    %cst_31 = arith.constant 5.000000e-01 : f32
    %92 = vector.broadcast %cst_31 : f32 to vector<4x384xf32>
    %93 = arith.mulf %92, %91 : vector<4x384xf32>
    %94 = math.tanh %93 : vector<4x384xf32>
    %cst_32 = arith.constant 1.000000e+00 : f32
    %95 = vector.broadcast %cst_32 : f32 to vector<4x384xf32>
    %96 = arith.addf %94, %95 : vector<4x384xf32>
    %cst_33 = arith.constant 5.000000e-01 : f32
    %97 = vector.broadcast %cst_33 : f32 to vector<4x384xf32>
    %98 = arith.mulf %97, %96 : vector<4x384xf32>
    %99 = vector.extract_strided_slice %98 {offsets = [0, 0], sizes = [4, 128], strides = [1, 1]} : vector<4x384xf32> to vector<4x128xf32>
    %100 = vector.extract_strided_slice %98 {offsets = [0, 128], sizes = [4, 128], strides = [1, 1]} : vector<4x384xf32> to vector<4x128xf32>
    %101 = vector.extract_strided_slice %98 {offsets = [0, 256], sizes = [4, 128], strides = [1, 1]} : vector<4x384xf32> to vector<4x128xf32>
    %102 = vector.extract_strided_slice %90 {offsets = [0, 384], sizes = [4, 128], strides = [1, 1]} : vector<4x512xf32> to vector<4x128xf32>
    %103 = math.tanh %102 : vector<4x128xf32>
    %104 = arith.mulf %100, %80 : vector<4x128xf32>
    %105 = arith.mulf %99, %103 : vector<4x128xf32>
    %106 = arith.addf %104, %105 : vector<4x128xf32>
    %107 = math.tanh %106 : vector<4x128xf32>
    %108 = arith.mulf %101, %107 : vector<4x128xf32>
    %109 = vector.extract_strided_slice %108 {offsets = [0, 0], sizes = [2, 128], strides = [1, 1]} : vector<4x128xf32> to vector<2x128xf32>
    %c6 = arith.constant 6 : index
    %c0_34 = arith.constant 0 : index
    %110 = vector.load %arg6[%c6, %c0_34] : memref<16x256xf32, #tpu.memory_space<vmem>>, vector<2x128xf32>
    tpu.vector_store %arg6[%c6, %c0_34], %109 {strides = array<i32>} : memref<16x256xf32, #tpu.memory_space<vmem>>, vector<2x128xf32>,
    %111 = vector.extract_strided_slice %108 {offsets = [2, 0], sizes = [2, 128], strides = [1, 1]} : vector<4x128xf32> to vector<2x128xf32>
    %c6_35 = arith.constant 6 : index
    %c128_36 = arith.constant 128 : index
    %112 = vector.load %arg6[%c6_35, %c128_36] : memref<16x256xf32, #tpu.memory_space<vmem>>, vector<2x128xf32>
    tpu.vector_store %arg6[%c6_35, %c128_36], %111 {strides = array<i32>} : memref<16x256xf32, #tpu.memory_space<vmem>>, vector<2x128xf32>,
    %113 = vector.extract_strided_slice %5 {offsets = [16, 0], sizes = [4, 512], strides = [1, 1]} : vector<32x512xf32> to vector<4x512xf32>
    %114 = arith.truncf %108 : vector<4x128xf32> to vector<4x128xbf16>
    %cst_37 = arith.constant dense<0.000000e+00> : vector<4x512xf32>
    %115 = tpu.matmul %114, %6, %cst_37 {dimension_numbers = #tpu.dot_dimension_numbers<[1], [0], [0], [1], [0, 0, 1, 1], [], []>} : vector<4x128xbf16>, vector<128x512xbf16>, vector<4x512xf32> -> vector<4x512xf32>
    %116 = arith.addf %113, %115 : vector<4x512xf32>
    %117 = vector.extract_strided_slice %116 {offsets = [0, 0], sizes = [4, 384], strides = [1, 1]} : vector<4x512xf32> to vector<4x384xf32>
    %cst_38 = arith.constant 5.000000e-01 : f32
    %118 = vector.broadcast %cst_38 : f32 to vector<4x384xf32>
    %119 = arith.mulf %118, %117 : vector<4x384xf32>
    %120 = math.tanh %119 : vector<4x384xf32>
    %cst_39 = arith.constant 1.000000e+00 : f32
    %121 = vector.broadcast %cst_39 : f32 to vector<4x384xf32>
    %122 = arith.addf %120, %121 : vector<4x384xf32>
    %cst_40 = arith.constant 5.000000e-01 : f32
    %123 = vector.broadcast %cst_40 : f32 to vector<4x384xf32>
    %124 = arith.mulf %123, %122 : vector<4x384xf32>
    %125 = vector.extract_strided_slice %124 {offsets = [0, 0], sizes = [4, 128], strides = [1, 1]} : vector<4x384xf32> to vector<4x128xf32>
    %126 = vector.extract_strided_slice %124 {offsets = [0, 128], sizes = [4, 128], strides = [1, 1]} : vector<4x384xf32> to vector<4x128xf32>
    %127 = vector.extract_strided_slice %124 {offsets = [0, 256], sizes = [4, 128], strides = [1, 1]} : vector<4x384xf32> to vector<4x128xf32>
    %128 = vector.extract_strided_slice %116 {offsets = [0, 384], sizes = [4, 128], strides = [1, 1]} : vector<4x512xf32> to vector<4x128xf32>
    %129 = math.tanh %128 : vector<4x128xf32>
    %130 = arith.mulf %126, %106 : vector<4x128xf32>
    %131 = arith.mulf %125, %129 : vector<4x128xf32>
    %132 = arith.addf %130, %131 : vector<4x128xf32>
    %133 = math.tanh %132 : vector<4x128xf32>
    %134 = arith.mulf %127, %133 : vector<4x128xf32>
    %135 = vector.extract_strided_slice %134 {offsets = [0, 0], sizes = [2, 128], strides = [1, 1]} : vector<4x128xf32> to vector<2x128xf32>
    %c8 = arith.constant 8 : index
    %c0_41 = arith.constant 0 : index
    %136 = vector.load %arg6[%c8, %c0_41] : memref<16x256xf32, #tpu.memory_space<vmem>>, vector<2x128xf32>
    tpu.vector_store %arg6[%c8, %c0_41], %135 {strides = array<i32>} : memref<16x256xf32, #tpu.memory_space<vmem>>, vector<2x128xf32>,
    %137 = vector.extract_strided_slice %134 {offsets = [2, 0], sizes = [2, 128], strides = [1, 1]} : vector<4x128xf32> to vector<2x128xf32>
    %c8_42 = arith.constant 8 : index
    %c128_43 = arith.constant 128 : index
    %138 = vector.load %arg6[%c8_42, %c128_43] : memref<16x256xf32, #tpu.memory_space<vmem>>, vector<2x128xf32>
    tpu.vector_store %arg6[%c8_42, %c128_43], %137 {strides = array<i32>} : memref<16x256xf32, #tpu.memory_space<vmem>>, vector<2x128xf32>,
    %139 = vector.extract_strided_slice %5 {offsets = [20, 0], sizes = [4, 512], strides = [1, 1]} : vector<32x512xf32> to vector<4x512xf32>
    %140 = arith.truncf %134 : vector<4x128xf32> to vector<4x128xbf16>
    %cst_44 = arith.constant dense<0.000000e+00> : vector<4x512xf32>
    %141 = tpu.matmul %140, %6, %cst_44 {dimension_numbers = #tpu.dot_dimension_numbers<[1], [0], [0], [1], [0, 0, 1, 1], [], []>} : vector<4x128xbf16>, vector<128x512xbf16>, vector<4x512xf32> -> vector<4x512xf32>
    %142 = arith.addf %139, %141 : vector<4x512xf32>
    %143 = vector.extract_strided_slice %142 {offsets = [0, 0], sizes = [4, 384], strides = [1, 1]} : vector<4x512xf32> to vector<4x384xf32>
    %cst_45 = arith.constant 5.000000e-01 : f32
    %144 = vector.broadcast %cst_45 : f32 to vector<4x384xf32>
    %145 = arith.mulf %144, %143 : vector<4x384xf32>
    %146 = math.tanh %145 : vector<4x384xf32>
    %cst_46 = arith.constant 1.000000e+00 : f32
    %147 = vector.broadcast %cst_46 : f32 to vector<4x384xf32>
    %148 = arith.addf %146, %147 : vector<4x384xf32>
    %cst_47 = arith.constant 5.000000e-01 : f32
    %149 = vector.broadcast %cst_47 : f32 to vector<4x384xf32>
    %150 = arith.mulf %149, %148 : vector<4x384xf32>
    %151 = vector.extract_strided_slice %150 {offsets = [0, 0], sizes = [4, 128], strides = [1, 1]} : vector<4x384xf32> to vector<4x128xf32>
    %152 = vector.extract_strided_slice %150 {offsets = [0, 128], sizes = [4, 128], strides = [1, 1]} : vector<4x384xf32> to vector<4x128xf32>
    %153 = vector.extract_strided_slice %150 {offsets = [0, 256], sizes = [4, 128], strides = [1, 1]} : vector<4x384xf32> to vector<4x128xf32>
    %154 = vector.extract_strided_slice %142 {offsets = [0, 384], sizes = [4, 128], strides = [1, 1]} : vector<4x512xf32> to vector<4x128xf32>
    %155 = math.tanh %154 : vector<4x128xf32>
    %156 = arith.mulf %152, %132 : vector<4x128xf32>
    %157 = arith.mulf %151, %155 : vector<4x128xf32>
    %158 = arith.addf %156, %157 : vector<4x128xf32>
    %159 = math.tanh %158 : vector<4x128xf32>
    %160 = arith.mulf %153, %159 : vector<4x128xf32>
    %161 = vector.extract_strided_slice %160 {offsets = [0, 0], sizes = [2, 128], strides = [1, 1]} : vector<4x128xf32> to vector<2x128xf32>
    %c10 = arith.constant 10 : index
    %c0_48 = arith.constant 0 : index
    %162 = vector.load %arg6[%c10, %c0_48] : memref<16x256xf32, #tpu.memory_space<vmem>>, vector<2x128xf32>
    tpu.vector_store %arg6[%c10, %c0_48], %161 {strides = array<i32>} : memref<16x256xf32, #tpu.memory_space<vmem>>, vector<2x128xf32>,
    %163 = vector.extract_strided_slice %160 {offsets = [2, 0], sizes = [2, 128], strides = [1, 1]} : vector<4x128xf32> to vector<2x128xf32>
    %c10_49 = arith.constant 10 : index
    %c128_50 = arith.constant 128 : index
    %164 = vector.load %arg6[%c10_49, %c128_50] : memref<16x256xf32, #tpu.memory_space<vmem>>, vector<2x128xf32>
    tpu.vector_store %arg6[%c10_49, %c128_50], %163 {strides = array<i32>} : memref<16x256xf32, #tpu.memory_space<vmem>>, vector<2x128xf32>,
    %165 = vector.extract_strided_slice %5 {offsets = [24, 0], sizes = [4, 512], strides = [1, 1]} : vector<32x512xf32> to vector<4x512xf32>
    %166 = arith.truncf %160 : vector<4x128xf32> to vector<4x128xbf16>
    %cst_51 = arith.constant dense<0.000000e+00> : vector<4x512xf32>
    %167 = tpu.matmul %166, %6, %cst_51 {dimension_numbers = #tpu.dot_dimension_numbers<[1], [0], [0], [1], [0, 0, 1, 1], [], []>} : vector<4x128xbf16>, vector<128x512xbf16>, vector<4x512xf32> -> vector<4x512xf32>
    %168 = arith.addf %165, %167 : vector<4x512xf32>
    %169 = vector.extract_strided_slice %168 {offsets = [0, 0], sizes = [4, 384], strides = [1, 1]} : vector<4x512xf32> to vector<4x384xf32>
    %cst_52 = arith.constant 5.000000e-01 : f32
    %170 = vector.broadcast %cst_52 : f32 to vector<4x384xf32>
    %171 = arith.mulf %170, %169 : vector<4x384xf32>
    %172 = math.tanh %171 : vector<4x384xf32>
    %cst_53 = arith.constant 1.000000e+00 : f32
    %173 = vector.broadcast %cst_53 : f32 to vector<4x384xf32>
    %174 = arith.addf %172, %173 : vector<4x384xf32>
    %cst_54 = arith.constant 5.000000e-01 : f32
    %175 = vector.broadcast %cst_54 : f32 to vector<4x384xf32>
    %176 = arith.mulf %175, %174 : vector<4x384xf32>
    %177 = vector.extract_strided_slice %176 {offsets = [0, 0], sizes = [4, 128], strides = [1, 1]} : vector<4x384xf32> to vector<4x128xf32>
    %178 = vector.extract_strided_slice %176 {offsets = [0, 128], sizes = [4, 128], strides = [1, 1]} : vector<4x384xf32> to vector<4x128xf32>
    %179 = vector.extract_strided_slice %176 {offsets = [0, 256], sizes = [4, 128], strides = [1, 1]} : vector<4x384xf32> to vector<4x128xf32>
    %180 = vector.extract_strided_slice %168 {offsets = [0, 384], sizes = [4, 128], strides = [1, 1]} : vector<4x512xf32> to vector<4x128xf32>
    %181 = math.tanh %180 : vector<4x128xf32>
    %182 = arith.mulf %178, %158 : vector<4x128xf32>
    %183 = arith.mulf %177, %181 : vector<4x128xf32>
    %184 = arith.addf %182, %183 : vector<4x128xf32>
    %185 = math.tanh %184 : vector<4x128xf32>
    %186 = arith.mulf %179, %185 : vector<4x128xf32>
    %187 = vector.extract_strided_slice %186 {offsets = [0, 0], sizes = [2, 128], strides = [1, 1]} : vector<4x128xf32> to vector<2x128xf32>
    %c12 = arith.constant 12 : index
    %c0_55 = arith.constant 0 : index
    %188 = vector.load %arg6[%c12, %c0_55] : memref<16x256xf32, #tpu.memory_space<vmem>>, vector<2x128xf32>
    tpu.vector_store %arg6[%c12, %c0_55], %187 {strides = array<i32>} : memref<16x256xf32, #tpu.memory_space<vmem>>, vector<2x128xf32>,
    %189 = vector.extract_strided_slice %186 {offsets = [2, 0], sizes = [2, 128], strides = [1, 1]} : vector<4x128xf32> to vector<2x128xf32>
    %c12_56 = arith.constant 12 : index
    %c128_57 = arith.constant 128 : index
    %190 = vector.load %arg6[%c12_56, %c128_57] : memref<16x256xf32, #tpu.memory_space<vmem>>, vector<2x128xf32>
    tpu.vector_store %arg6[%c12_56, %c128_57], %189 {strides = array<i32>} : memref<16x256xf32, #tpu.memory_space<vmem>>, vector<2x128xf32>,
    %191 = vector.extract_strided_slice %5 {offsets = [28, 0], sizes = [4, 512], strides = [1, 1]} : vector<32x512xf32> to vector<4x512xf32>
    %192 = arith.truncf %186 : vector<4x128xf32> to vector<4x128xbf16>
    %cst_58 = arith.constant dense<0.000000e+00> : vector<4x512xf32>
    %193 = tpu.matmul %192, %6, %cst_58 {dimension_numbers = #tpu.dot_dimension_numbers<[1], [0], [0], [1], [0, 0, 1, 1], [], []>} : vector<4x128xbf16>, vector<128x512xbf16>, vector<4x512xf32> -> vector<4x512xf32>
    %194 = arith.addf %191, %193 : vector<4x512xf32>
    %195 = vector.extract_strided_slice %194 {offsets = [0, 0], sizes = [4, 384], strides = [1, 1]} : vector<4x512xf32> to vector<4x384xf32>
    %cst_59 = arith.constant 5.000000e-01 : f32
    %196 = vector.broadcast %cst_59 : f32 to vector<4x384xf32>
    %197 = arith.mulf %196, %195 : vector<4x384xf32>
    %198 = math.tanh %197 : vector<4x384xf32>
    %cst_60 = arith.constant 1.000000e+00 : f32
    %199 = vector.broadcast %cst_60 : f32 to vector<4x384xf32>
    %200 = arith.addf %198, %199 : vector<4x384xf32>
    %cst_61 = arith.constant 5.000000e-01 : f32
    %201 = vector.broadcast %cst_61 : f32 to vector<4x384xf32>
    %202 = arith.mulf %201, %200 : vector<4x384xf32>
    %203 = vector.extract_strided_slice %202 {offsets = [0, 0], sizes = [4, 128], strides = [1, 1]} : vector<4x384xf32> to vector<4x128xf32>
    %204 = vector.extract_strided_slice %202 {offsets = [0, 128], sizes = [4, 128], strides = [1, 1]} : vector<4x384xf32> to vector<4x128xf32>
    %205 = vector.extract_strided_slice %202 {offsets = [0, 256], sizes = [4, 128], strides = [1, 1]} : vector<4x384xf32> to vector<4x128xf32>
    %206 = vector.extract_strided_slice %194 {offsets = [0, 384], sizes = [4, 128], strides = [1, 1]} : vector<4x512xf32> to vector<4x128xf32>
    %207 = math.tanh %206 : vector<4x128xf32>
    %208 = arith.mulf %204, %184 : vector<4x128xf32>
    %209 = arith.mulf %203, %207 : vector<4x128xf32>
    %210 = arith.addf %208, %209 : vector<4x128xf32>
    %211 = math.tanh %210 : vector<4x128xf32>
    %212 = arith.mulf %205, %211 : vector<4x128xf32>
    %213 = vector.extract_strided_slice %212 {offsets = [0, 0], sizes = [2, 128], strides = [1, 1]} : vector<4x128xf32> to vector<2x128xf32>
    %c14 = arith.constant 14 : index
    %c0_62 = arith.constant 0 : index
    %214 = vector.load %arg6[%c14, %c0_62] : memref<16x256xf32, #tpu.memory_space<vmem>>, vector<2x128xf32>
    tpu.vector_store %arg6[%c14, %c0_62], %213 {strides = array<i32>} : memref<16x256xf32, #tpu.memory_space<vmem>>, vector<2x128xf32>,
    %215 = vector.extract_strided_slice %212 {offsets = [2, 0], sizes = [2, 128], strides = [1, 1]} : vector<4x128xf32> to vector<2x128xf32>
    %c14_63 = arith.constant 14 : index
    %c128_64 = arith.constant 128 : index
    %216 = vector.load %arg6[%c14_63, %c128_64] : memref<16x256xf32, #tpu.memory_space<vmem>>, vector<2x128xf32>
    tpu.vector_store %arg6[%c14_63, %c128_64], %215 {strides = array<i32>} : memref<16x256xf32, #tpu.memory_space<vmem>>, vector<2x128xf32>,
    %c0_65 = arith.constant 0 : index
    %c0_66 = arith.constant 0 : index
    %217 = vector.load %arg6[%c0_65, %c0_66] : memref<16x256xf32, #tpu.memory_space<vmem>>, vector<16x256xf32>
    %218 = arith.truncf %217 : vector<16x256xf32> to vector<16x256xbf16>
    %c0_67 = arith.constant 0 : index
    %c0_68 = arith.constant 0 : index
    %c0_69 = arith.constant 0 : index
    %219 = vector.load %arg3[%c0_67, %c0_68, %c0_69] : memref<4x256x256xbf16, #tpu.memory_space<vmem>>, vector<1x256x256xbf16>
    %220 = vector.shape_cast %219 : vector<1x256x256xbf16> to vector<256x256xbf16>
    %cst_70 = arith.constant dense<0.000000e+00> : vector<16x256xf32>
    %221 = tpu.matmul %218, %220, %cst_70 {dimension_numbers = #tpu.dot_dimension_numbers<[1], [0], [0], [1], [0, 0, 1, 1], [], []>} : vector<16x256xbf16>, vector<256x256xbf16>, vector<16x256xf32> -> vector<16x256xf32>
    %c1 = arith.constant 1 : index
    %c0_71 = arith.constant 0 : index
    %222 = vector.load %arg4[%c1, %c0_71] : memref<8x512xf32, #tpu.memory_space<vmem>>, vector<1x256xf32>
    %223 = vector.broadcast %222 : vector<1x256xf32> to vector<16x256xf32>
    %224 = arith.addf %221, %223 : vector<16x256xf32>
    %225 = math.tanh %224 : vector<16x256xf32>
    %226 = arith.truncf %225 : vector<16x256xf32> to vector<16x256xbf16>
    %c1_72 = arith.constant 1 : index
    %c0_73 = arith.constant 0 : index
    %c0_74 = arith.constant 0 : index
    %227 = vector.load %arg3[%c1_72, %c0_73, %c0_74] : memref<4x256x256xbf16, #tpu.memory_space<vmem>>, vector<1x256x256xbf16>
    %228 = vector.shape_cast %227 : vector<1x256x256xbf16> to vector<256x256xbf16>
    %cst_75 = arith.constant dense<0.000000e+00> : vector<16x256xf32>
    %229 = tpu.matmul %226, %228, %cst_75 {dimension_numbers = #tpu.dot_dimension_numbers<[1], [0], [0], [1], [0, 0, 1, 1], [], []>} : vector<16x256xbf16>, vector<256x256xbf16>, vector<16x256xf32> -> vector<16x256xf32>
    %c2_76 = arith.constant 2 : index
    %c0_77 = arith.constant 0 : index
    %230 = vector.load %arg4[%c2_76, %c0_77] : memref<8x512xf32, #tpu.memory_space<vmem>>, vector<1x256xf32>
    %231 = vector.broadcast %230 : vector<1x256xf32> to vector<16x256xf32>
    %232 = arith.addf %229, %231 : vector<16x256xf32>
    %233 = math.tanh %232 : vector<16x256xf32>
    %234 = arith.truncf %233 : vector<16x256xf32> to vector<16x256xbf16>
    %c2_78 = arith.constant 2 : index
    %c0_79 = arith.constant 0 : index
    %c0_80 = arith.constant 0 : index
    %235 = vector.load %arg3[%c2_78, %c0_79, %c0_80] : memref<4x256x256xbf16, #tpu.memory_space<vmem>>, vector<1x256x256xbf16>
    %236 = vector.shape_cast %235 : vector<1x256x256xbf16> to vector<256x256xbf16>
    %cst_81 = arith.constant dense<0.000000e+00> : vector<16x256xf32>
    %237 = tpu.matmul %234, %236, %cst_81 {dimension_numbers = #tpu.dot_dimension_numbers<[1], [0], [0], [1], [0, 0, 1, 1], [], []>} : vector<16x256xbf16>, vector<256x256xbf16>, vector<16x256xf32> -> vector<16x256xf32>
    %c3 = arith.constant 3 : index
    %c0_82 = arith.constant 0 : index
    %238 = vector.load %arg4[%c3, %c0_82] : memref<8x512xf32, #tpu.memory_space<vmem>>, vector<1x256xf32>
    %239 = vector.broadcast %238 : vector<1x256xf32> to vector<16x256xf32>
    %240 = arith.addf %237, %239 : vector<16x256xf32>
    %241 = math.tanh %240 : vector<16x256xf32>
    %242 = arith.truncf %241 : vector<16x256xf32> to vector<16x256xbf16>
    %c3_83 = arith.constant 3 : index
    %c0_84 = arith.constant 0 : index
    %c0_85 = arith.constant 0 : index
    %243 = vector.load %arg3[%c3_83, %c0_84, %c0_85] : memref<4x256x256xbf16, #tpu.memory_space<vmem>>, vector<1x256x256xbf16>
    %244 = vector.shape_cast %243 : vector<1x256x256xbf16> to vector<256x256xbf16>
    %cst_86 = arith.constant dense<0.000000e+00> : vector<16x256xf32>
    %245 = tpu.matmul %242, %244, %cst_86 {dimension_numbers = #tpu.dot_dimension_numbers<[1], [0], [0], [1], [0, 0, 1, 1], [], []>} : vector<16x256xbf16>, vector<256x256xbf16>, vector<16x256xf32> -> vector<16x256xf32>
    %c4_87 = arith.constant 4 : index
    %c0_88 = arith.constant 0 : index
    %246 = vector.load %arg4[%c4_87, %c0_88] : memref<8x512xf32, #tpu.memory_space<vmem>>, vector<1x256xf32>
    %247 = vector.broadcast %246 : vector<1x256xf32> to vector<16x256xf32>
    %248 = arith.addf %245, %247 : vector<16x256xf32>
    %249 = vector.extract_strided_slice %248 {offsets = [0, 0], sizes = [16, 3], strides = [1, 1]} : vector<16x256xf32> to vector<16x3xf32>
    %250 = vector.extract_strided_slice %249 {offsets = [0, 0], sizes = [2, 3], strides = [1, 1]} : vector<16x3xf32> to vector<2x3xf32>
    %251 = vector.extract_strided_slice %249 {offsets = [2, 0], sizes = [2, 3], strides = [1, 1]} : vector<16x3xf32> to vector<2x3xf32>
    %252 = vector.extract_strided_slice %249 {offsets = [4, 0], sizes = [2, 3], strides = [1, 1]} : vector<16x3xf32> to vector<2x3xf32>
    %253 = vector.extract_strided_slice %249 {offsets = [6, 0], sizes = [2, 3], strides = [1, 1]} : vector<16x3xf32> to vector<2x3xf32>
    %254 = vector.extract_strided_slice %249 {offsets = [8, 0], sizes = [2, 3], strides = [1, 1]} : vector<16x3xf32> to vector<2x3xf32>
    %255 = vector.extract_strided_slice %249 {offsets = [10, 0], sizes = [2, 3], strides = [1, 1]} : vector<16x3xf32> to vector<2x3xf32>
    %256 = vector.extract_strided_slice %249 {offsets = [12, 0], sizes = [2, 3], strides = [1, 1]} : vector<16x3xf32> to vector<2x3xf32>
    %257 = vector.extract_strided_slice %249 {offsets = [14, 0], sizes = [2, 3], strides = [1, 1]} : vector<16x3xf32> to vector<2x3xf32>
    %258 = arith.maximumf %250, %251 : vector<2x3xf32>
    %259 = arith.maximumf %258, %252 : vector<2x3xf32>
    %260 = arith.maximumf %259, %253 : vector<2x3xf32>
    %261 = arith.maximumf %260, %254 : vector<2x3xf32>
    %262 = arith.maximumf %261, %255 : vector<2x3xf32>
    %263 = arith.maximumf %262, %256 : vector<2x3xf32>
    %264 = arith.maximumf %263, %257 : vector<2x3xf32>
    %265 = arith.subf %250, %264 : vector<2x3xf32>
    %266 = math.exp %265 : vector<2x3xf32>
    %267 = arith.subf %251, %264 : vector<2x3xf32>
    %268 = math.exp %267 : vector<2x3xf32>
    %269 = arith.subf %252, %264 : vector<2x3xf32>
    %270 = math.exp %269 : vector<2x3xf32>
    %271 = arith.subf %253, %264 : vector<2x3xf32>
    %272 = math.exp %271 : vector<2x3xf32>
    %273 = arith.subf %254, %264 : vector<2x3xf32>
    %274 = math.exp %273 : vector<2x3xf32>
    %275 = arith.subf %255, %264 : vector<2x3xf32>
    %276 = math.exp %275 : vector<2x3xf32>
    %277 = arith.subf %256, %264 : vector<2x3xf32>
    %278 = math.exp %277 : vector<2x3xf32>
    %279 = arith.subf %257, %264 : vector<2x3xf32>
    %280 = math.exp %279 : vector<2x3xf32>
    %281 = arith.addf %266, %268 : vector<2x3xf32>
    %282 = arith.addf %281, %270 : vector<2x3xf32>
    %283 = arith.addf %282, %272 : vector<2x3xf32>
    %284 = arith.addf %283, %274 : vector<2x3xf32>
    %285 = arith.addf %284, %276 : vector<2x3xf32>
    %286 = arith.addf %285, %278 : vector<2x3xf32>
    %287 = arith.addf %286, %280 : vector<2x3xf32>
    %cst_89 = arith.constant 1.000000e+00 : f32
    %288 = vector.broadcast %cst_89 : f32 to vector<2x3xf32>
    %289 = arith.divf %288, %287 : vector<2x3xf32>
    %290 = arith.mulf %266, %289 : vector<2x3xf32>
    %c0_90 = arith.constant 0 : index
    %c0_91 = arith.constant 0 : index
    %c0_92 = arith.constant 0 : index
    %291 = vector.load %arg5[%c0_90, %c0_91, %c0_92] : memref<8x2x3xf32, #tpu.memory_space<vmem>>, vector<1x2x3xf32>
    %292 = vector.shape_cast %291 : vector<1x2x3xf32> to vector<2x3xf32>
    %293 = vector.shape_cast %290 : vector<2x3xf32> to vector<1x2x3xf32>
    tpu.vector_store %arg5[%c0_90, %c0_91, %c0_92], %293 {strides = array<i32>} : memref<8x2x3xf32, #tpu.memory_space<vmem>>, vector<1x2x3xf32>,
    %294 = arith.mulf %268, %289 : vector<2x3xf32>
    %c1_93 = arith.constant 1 : index
    %c0_94 = arith.constant 0 : index
    %c0_95 = arith.constant 0 : index
    %295 = vector.load %arg5[%c1_93, %c0_94, %c0_95] : memref<8x2x3xf32, #tpu.memory_space<vmem>>, vector<1x2x3xf32>
    %296 = vector.shape_cast %295 : vector<1x2x3xf32> to vector<2x3xf32>
    %297 = vector.shape_cast %294 : vector<2x3xf32> to vector<1x2x3xf32>
    tpu.vector_store %arg5[%c1_93, %c0_94, %c0_95], %297 {strides = array<i32>} : memref<8x2x3xf32, #tpu.memory_space<vmem>>, vector<1x2x3xf32>,
    %298 = arith.mulf %270, %289 : vector<2x3xf32>
    %c2_96 = arith.constant 2 : index
    %c0_97 = arith.constant 0 : index
    %c0_98 = arith.constant 0 : index
    %299 = vector.load %arg5[%c2_96, %c0_97, %c0_98] : memref<8x2x3xf32, #tpu.memory_space<vmem>>, vector<1x2x3xf32>
    %300 = vector.shape_cast %299 : vector<1x2x3xf32> to vector<2x3xf32>
    %301 = vector.shape_cast %298 : vector<2x3xf32> to vector<1x2x3xf32>
    tpu.vector_store %arg5[%c2_96, %c0_97, %c0_98], %301 {strides = array<i32>} : memref<8x2x3xf32, #tpu.memory_space<vmem>>, vector<1x2x3xf32>,
    %302 = arith.mulf %272, %289 : vector<2x3xf32>
    %c3_99 = arith.constant 3 : index
    %c0_100 = arith.constant 0 : index
    %c0_101 = arith.constant 0 : index
    %303 = vector.load %arg5[%c3_99, %c0_100, %c0_101] : memref<8x2x3xf32, #tpu.memory_space<vmem>>, vector<1x2x3xf32>
    %304 = vector.shape_cast %303 : vector<1x2x3xf32> to vector<2x3xf32>
    %305 = vector.shape_cast %302 : vector<2x3xf32> to vector<1x2x3xf32>
    tpu.vector_store %arg5[%c3_99, %c0_100, %c0_101], %305 {strides = array<i32>} : memref<8x2x3xf32, #tpu.memory_space<vmem>>, vector<1x2x3xf32>,
    %306 = arith.mulf %274, %289 : vector<2x3xf32>
    %c4_102 = arith.constant 4 : index
    %c0_103 = arith.constant 0 : index
    %c0_104 = arith.constant 0 : index
    %307 = vector.load %arg5[%c4_102, %c0_103, %c0_104] : memref<8x2x3xf32, #tpu.memory_space<vmem>>, vector<1x2x3xf32>
    %308 = vector.shape_cast %307 : vector<1x2x3xf32> to vector<2x3xf32>
    %309 = vector.shape_cast %306 : vector<2x3xf32> to vector<1x2x3xf32>
    tpu.vector_store %arg5[%c4_102, %c0_103, %c0_104], %309 {strides = array<i32>} : memref<8x2x3xf32, #tpu.memory_space<vmem>>, vector<1x2x3xf32>,
    %310 = arith.mulf %276, %289 : vector<2x3xf32>
    %c5 = arith.constant 5 : index
    %c0_105 = arith.constant 0 : index
    %c0_106 = arith.constant 0 : index
    %311 = vector.load %arg5[%c5, %c0_105, %c0_106] : memref<8x2x3xf32, #tpu.memory_space<vmem>>, vector<1x2x3xf32>
    %312 = vector.shape_cast %311 : vector<1x2x3xf32> to vector<2x3xf32>
    %313 = vector.shape_cast %310 : vector<2x3xf32> to vector<1x2x3xf32>
    tpu.vector_store %arg5[%c5, %c0_105, %c0_106], %313 {strides = array<i32>} : memref<8x2x3xf32, #tpu.memory_space<vmem>>, vector<1x2x3xf32>,
    %314 = arith.mulf %278, %289 : vector<2x3xf32>
    %c6_107 = arith.constant 6 : index
    %c0_108 = arith.constant 0 : index
    %c0_109 = arith.constant 0 : index
    %315 = vector.load %arg5[%c6_107, %c0_108, %c0_109] : memref<8x2x3xf32, #tpu.memory_space<vmem>>, vector<1x2x3xf32>
    %316 = vector.shape_cast %315 : vector<1x2x3xf32> to vector<2x3xf32>
    %317 = vector.shape_cast %314 : vector<2x3xf32> to vector<1x2x3xf32>
    tpu.vector_store %arg5[%c6_107, %c0_108, %c0_109], %317 {strides = array<i32>} : memref<8x2x3xf32, #tpu.memory_space<vmem>>, vector<1x2x3xf32>,
    %318 = arith.mulf %280, %289 : vector<2x3xf32>
    %c7 = arith.constant 7 : index
    %c0_110 = arith.constant 0 : index
    %c0_111 = arith.constant 0 : index
    %319 = vector.load %arg5[%c7, %c0_110, %c0_111] : memref<8x2x3xf32, #tpu.memory_space<vmem>>, vector<1x2x3xf32>
    %320 = vector.shape_cast %319 : vector<1x2x3xf32> to vector<2x3xf32>
    %321 = vector.shape_cast %318 : vector<2x3xf32> to vector<1x2x3xf32>
    tpu.vector_store %arg5[%c7, %c0_110, %c0_111], %321 {strides = array<i32>} : memref<8x2x3xf32, #tpu.memory_space<vmem>>, vector<1x2x3xf32>,
    return
  }
}

</mosaic_0001>

<bundles_post_ra>
// kernel: clf_forward.1
= control target key start
LH: loop header
LB: loop body
LE: loop exit
PB: predicated region body
PF: predicated region fallthrough
CT: control target
= control target key end

     0   :  { %vm4348_vm0 = vcmask 17408   ;;  %vm4355_vm1 = vcmask 19458   ;;  %vm4361_vm2 = vcmask 21508   ;;  %vm4367_vm3 = vcmask 23558   ;;  %s7670_s1 = inlined_call_operand.vmem [shape: bf16[1024,512], index: 1, kind: input, shape index: {}]   ;;  %s7671_s0 = inlined_call_operand.vmem [shape: bf16[32,1024], index: 0, kind: input, shape index: {}]   ;;  %s7672_s2 = inlined_call_operand.vmem [shape: bf16[128,512], index: 2, kind: input, shape index: {}]   ;;  %s7673_s4 = inlined_call_operand.vmem [shape: f32[8,512], index: 4, kind: input, shape index: {}]   ;;  %s7674_s3 = inlined_call_operand.vmem [shape: bf16[4,256,256], index: 3, kind: input, shape index: {}]   ;;  %s7675_s5 = inlined_call_operand.vmem [shape: f32[8,2,3], index: 5, kind: output, shape index: {}]  }
   0x1   :  { %v4989_v0 = vld [vmem:[%s7670_s1 + $0x4] ss:$16 sps:$4 sm:$0xff]   ;;  %v4991_v1 = vld [vmem:[%s7670_s1 + $0xc] ss:$16 sps:$4 sm:$0xff]   ;;  %v4993_v2 = vld [vmem:[%s7670_s1] ss:$16 sps:$4 sm:$0xff]  }
   0x2   :  { %1675 = vmatprep.subr.bf16.mxu0 %v4989_v0  ;;  %v4994_v3 = vld [vmem:[%s7670_s1 + $0x8] ss:$16 sps:$4 sm:$0xff]   ;;  %1887 = vmatprep.subr.bf16.mxu1 %v4991_v1  ;;  %v4995_v4 = vld [vmem:[%s7670_s1 + $0x24] ss:$16 sps:$4 sm:$0xff]   ;;  %v4997_v5 = vld [vmem:[%s7670_s1 + $0x2c] ss:$16 sps:$4 sm:$0xff]  }
   0x3   :  { %1676 = vmatpush1.bf16.msra.mxu0 %v4993_v2  ;;  %1888 = vmatpush1.bf16.msra.mxu1 %v4994_v3  ;;  %v4999_v6 = vld [vmem:[%s7670_s1 + $0x20] ss:$16 sps:$4 sm:$0xff]   ;;  %v5000_v7 = vld [vmem:[%s7670_s1 + $0x28] ss:$16 sps:$4 sm:$0xff]   ;;  %v5001_v8 = vld [vmem:[%s7670_s1 + $0x44] ss:$16 sps:$4 sm:$0xff]  }
   0x4   :  { %1677 = vmatprep.subr.bf16.mxu0 %v4995_v4  ;;  %1889 = vmatprep.subr.bf16.mxu1 %v4997_v5  ;;  %v5003_v9 = vld [vmem:[%s7670_s1 + $0x4c] ss:$16 sps:$4 sm:$0xff]   ;;  %v5005_v10 = vld [vmem:[%s7670_s1 + $0x40] ss:$16 sps:$4 sm:$0xff]   ;;  %v5006_v11 = vld [vmem:[%s7670_s1 + $0x48] ss:$16 sps:$4 sm:$0xff]  }
   0x5   :  { %v5007_v12 = vld [vmem:[%s7670_s1 + $0x64] ss:$16 sps:$4 sm:$0xff]   ;;  %v5009_v13 = vld [vmem:[%s7670_s1 + $0x6c] ss:$16 sps:$4 sm:$0xff]   ;;  %v5011_v14 = vld [vmem:[%s7670_s1 + $0x60] ss:$16 sps:$4 sm:$0xff]  }
   0x6   :  { %v5012_v15 = vld [vmem:[%s7670_s1 + $0x68] ss:$16 sps:$4 sm:$0xff]   ;;  %v5013_v16 = vld [vmem:[%s7670_s1 + $0x84] ss:$16 sps:$4 sm:$0xff]   ;;  %v5015_v17 = vld [vmem:[%s7670_s1 + $0x8c] ss:$16 sps:$4 sm:$0xff]  }
   0x7   :  { %1678 = vmatpush1.bf16.msra.mxu0 %v4999_v6  ;;  %1890 = vmatpush1.bf16.msra.mxu1 %v5000_v7  ;;  %v5017_v18 = vld [vmem:[%s7670_s1 + $0x80] ss:$16 sps:$4 sm:$0xff]   ;;  %v5018_v19 = vld [vmem:[%s7670_s1 + $0x88] ss:$16 sps:$4 sm:$0xff]   ;;  %v5019_v20 = vld [vmem:[%s7670_s1 + $0xa4] ss:$16 sps:$4 sm:$0xff]  }
   0x8   :  { %1679 = vmatprep.subr.bf16.mxu0 %v5001_v8  ;;  %1891 = vmatprep.subr.bf16.mxu1 %v5003_v9  ;;  %v5021_v21 = vld [vmem:[%s7670_s1 + $0xac] ss:$16 sps:$4 sm:$0xff]   ;;  %v5023_v22 = vld [vmem:[%s7670_s1 + $0xa0] ss:$16 sps:$4 sm:$0xff]   ;;  %v5024_v23 = vld [vmem:[%s7670_s1 + $0xa8] ss:$16 sps:$4 sm:$0xff]  }
   0x9   :  { %v5025_v24 = vld [vmem:[%s7670_s1 + $0xc4] ss:$16 sps:$4 sm:$0xff]   ;;  %v5027_v25 = vld [vmem:[%s7670_s1 + $0xcc] ss:$16 sps:$4 sm:$0xff]   ;;  %v5029_v26 = vld [vmem:[%s7670_s1 + $0xc0] ss:$16 sps:$4 sm:$0xff]  }
   0xa   :  { %v5030_v27 = vld [vmem:[%s7670_s1 + $0xc8] ss:$16 sps:$4 sm:$0xff]   ;;  %v5031_v28 = vld [vmem:[%s7670_s1 + $0xe4] ss:$16 sps:$4 sm:$0xff]   ;;  %v5033_v29 = vld [vmem:[%s7670_s1 + $0xec] ss:$16 sps:$4 sm:$0xff]  }
   0xb   :  { %1680 = vmatpush1.bf16.msra.mxu0 %v5005_v10  ;;  %1892 = vmatpush1.bf16.msra.mxu1 %v5006_v11  ;;  %v5035_v30 = vld [vmem:[%s7670_s1 + $0xe0] ss:$16 sps:$4 sm:$0xff]   ;;  %v5036_v31 = vld [vmem:[%s7670_s1 + $0xe8] ss:$16 sps:$4 sm:$0xff]   ;;  %v5037_v32 = vld [vmem:[%s7670_s1 + $0x104] ss:$16 sps:$4 sm:$0xff]  }
   0xc   :  { %1681 = vmatprep.subr.bf16.mxu0 %v5007_v12  ;;  %1893 = vmatprep.subr.bf16.mxu1 %v5009_v13  ;;  %v5039_v33 = vld [vmem:[%s7670_s1 + $0x10c] ss:$16 sps:$4 sm:$0xff]   ;;  %v5041_v34 = vld [vmem:[%s7670_s1 + $0x100] ss:$16 sps:$4 sm:$0xff]   ;;  %v5042_v35 = vld [vmem:[%s7670_s1 + $0x108] ss:$16 sps:$4 sm:$0xff]  }
   0xd   :  { %v5043_v36 = vld [vmem:[%s7670_s1 + $0x124] ss:$16 sps:$4 sm:$0xff]   ;;  %v5045_v37 = vld [vmem:[%s7670_s1 + $0x12c] ss:$16 sps:$4 sm:$0xff]   ;;  %v5047_v38 = vld [vmem:[%s7670_s1 + $0x120] ss:$16 sps:$4 sm:$0xff]  }
   0xe   :  { %v5048_v39 = vld [vmem:[%s7670_s1 + $0x128] ss:$16 sps:$4 sm:$0xff]   ;;  %v5049_v40 = vld [vmem:[%s7670_s1 + $0x144] ss:$16 sps:$4 sm:$0xff]   ;;  %v5051_v41 = vld [vmem:[%s7670_s1 + $0x14c] ss:$16 sps:$4 sm:$0xff]  }
   0xf   :  { %1682 = vmatpush1.bf16.msra.mxu0 %v5011_v14  ;;  %1894 = vmatpush1.bf16.msra.mxu1 %v5012_v15  ;;  %v5053_v42 = vld [vmem:[%s7670_s1 + $0x140] ss:$16 sps:$4 sm:$0xff]   ;;  %v5054_v43 = vld [vmem:[%s7670_s1 + $0x148] ss:$16 sps:$4 sm:$0xff]   ;;  %v5055_v44 = vld [vmem:[%s7670_s1 + $0x164] ss:$16 sps:$4 sm:$0xff]  }
  0x10   :  { %1683 = vmatprep.subr.bf16.mxu0 %v5013_v16  ;;  %1895 = vmatprep.subr.bf16.mxu1 %v5015_v17  ;;  %v5057_v45 = vld [vmem:[%s7670_s1 + $0x16c] ss:$16 sps:$4 sm:$0xff]   ;;  %v21_v46 = vld [vmem:[%s7671_s0] sm:$0xff]  ;;  %v5060_v49 = vld [vmem:[%s7670_s1 + $0x168] ss:$16 sps:$4 sm:$0xff]  }
  0x11   :  { %v25_v47 = vld [vmem:[%s7671_s0 + $0x20] sm:$0xff]  ;;  %v5063_v52 = vld [vmem:[%s7670_s1 + $0x18c] ss:$16 sps:$4 sm:$0xff]   ;;  %v5066_v54 = vld [vmem:[%s7670_s1 + $0x188] ss:$16 sps:$4 sm:$0xff]  }
  0x12   :  { %v5059_v48 = vld [vmem:[%s7670_s1 + $0x160] ss:$16 sps:$4 sm:$0xff]   ;;  %v4386_v50 = vcombine.high %v21_v46, %v25_v47  ;;  %v5061_v51 = vld [vmem:[%s7670_s1 + $0x184] ss:$16 sps:$4 sm:$0xff]   ;;  %v5069_v56 = vld [vmem:[%s7670_s1 + $0x1ac] ss:$16 sps:$4 sm:$0xff]   ;;  %v4385_v5 = vcombine.low %v21_v46, %v25_v47 }
  0x13   :  { %1684 = vmatpush1.bf16.msra.mxu0 %v5017_v18  ;;  %1896 = vmatpush1.bf16.msra.mxu1 %v5018_v19  ;;  %v5065_v53 = vld [vmem:[%s7670_s1 + $0x180] ss:$16 sps:$4 sm:$0xff]   ;;  %v5067_v55 = vld [vmem:[%s7670_s1 + $0x1a4] ss:$16 sps:$4 sm:$0xff]   ;;  %v5072_v58 = vld [vmem:[%s7670_s1 + $0x1a8] ss:$16 sps:$4 sm:$0xff]  }
  0x14   :  { %1685 = vmatprep.subr.bf16.mxu0 %v5019_v20  ;;  %1897 = vmatprep.subr.bf16.mxu1 %v5021_v21  ;;  %v5071_v57 = vld [vmem:[%s7670_s1 + $0x1a0] ss:$16 sps:$4 sm:$0xff]   ;;  %v5073_v59 = vld [vmem:[%s7670_s1 + $0x1c4] ss:$16 sps:$4 sm:$0xff]   ;;  %v5075_v60 = vld [vmem:[%s7670_s1 + $0x1cc] ss:$16 sps:$4 sm:$0xff]  }
  0x15   :  { %1707 = vmatprep.mubr.bf16.mxu0 %v4386_v50  ;;  %1919 = vmatprep.mubr.bf16.mxu1 %v4386_v50  ;;  %v5077_v61 = vld [vmem:[%s7670_s1 + $0x1c0] ss:$16 sps:$4 sm:$0xff]   ;;  %v5078_v62 = vld [vmem:[%s7670_s1 + $0x1c8] ss:$16 sps:$4 sm:$0xff]   ;;  %v5079_v63 = vld [vmem:[%s7670_s1 + $0x1e4] ss:$16 sps:$4 sm:$0xff]  }
  0x16   :  { %v5081_v0 = vld [vmem:[%s7670_s1 + $0x1ec] ss:$16 sps:$4 sm:$0xff]   ;;  %v5083_v1 = vld [vmem:[%s7670_s1 + $0x1e0] ss:$16 sps:$4 sm:$0xff]   ;;  %v5084_v2 = vld [vmem:[%s7670_s1 + $0x1e8] ss:$16 sps:$4 sm:$0xff]  }
  0x17   :  { %1686 = vmatpush1.bf16.msra.mxu0 %v5023_v22  ;;  %1898 = vmatpush1.bf16.msra.mxu1 %v5024_v23  ;;  %v5087_v3 = vld [vmem:[%s7670_s1 + $0x204] ss:$16 sps:$4 sm:$0xff]   ;;  %v5090_v4 = vld [vmem:[%s7670_s1 + $0x20c] ss:$16 sps:$4 sm:$0xff]   ;;  %v5085_v6 = vld [vmem:[%s7670_s1 + $0x200] ss:$16 sps:$4 sm:$0xff]  }
  0x18   :  { %1687 = vmatprep.subr.bf16.mxu0 %v5025_v24  ;;  %1899 = vmatprep.subr.bf16.mxu1 %v5027_v25  ;;  %v5088_v7 = vld [vmem:[%s7670_s1 + $0x208] ss:$16 sps:$4 sm:$0xff]   ;;  %v5093_v8 = vld [vmem:[%s7670_s1 + $0x224] ss:$16 sps:$4 sm:$0xff]   ;;  %v5096_v9 = vld [vmem:[%s7670_s1 + $0x22c] ss:$16 sps:$4 sm:$0xff]  }
  0x19   :  { %v5091_v10 = vld [vmem:[%s7670_s1 + $0x220] ss:$16 sps:$4 sm:$0xff]   ;;  %v5094_v11 = vld [vmem:[%s7670_s1 + $0x228] ss:$16 sps:$4 sm:$0xff]   ;;  %v5099_v12 = vld [vmem:[%s7670_s1 + $0x244] ss:$16 sps:$4 sm:$0xff]  }
  0x1a   :  { %v5102_v13 = vld [vmem:[%s7670_s1 + $0x24c] ss:$16 sps:$4 sm:$0xff]   ;;  %v5097_v14 = vld [vmem:[%s7670_s1 + $0x240] ss:$16 sps:$4 sm:$0xff]   ;;  %v5100_v15 = vld [vmem:[%s7670_s1 + $0x248] ss:$16 sps:$4 sm:$0xff]  }
  0x1b   :  { %1688 = vmatpush1.bf16.msra.mxu0 %v5029_v26  ;;  %1900 = vmatpush1.bf16.msra.mxu1 %v5030_v27  ;;  %v5105_v16 = vld [vmem:[%s7670_s1 + $0x264] ss:$16 sps:$4 sm:$0xff]   ;;  %v5108_v17 = vld [vmem:[%s7670_s1 + $0x26c] ss:$16 sps:$4 sm:$0xff]   ;;  %v5103_v18 = vld [vmem:[%s7670_s1 + $0x260] ss:$16 sps:$4 sm:$0xff]  }
  0x1c   :  { %1689 = vmatprep.subr.bf16.mxu0 %v5031_v28  ;;  %1901 = vmatprep.subr.bf16.mxu1 %v5033_v29  ;;  %v5106_v19 = vld [vmem:[%s7670_s1 + $0x268] ss:$16 sps:$4 sm:$0xff]   ;;  %v5111_v20 = vld [vmem:[%s7670_s1 + $0x284] ss:$16 sps:$4 sm:$0xff]   ;;  %v5114_v21 = vld [vmem:[%s7670_s1 + $0x28c] ss:$16 sps:$4 sm:$0xff]  }
  0x1d   :  { %v5109_v22 = vld [vmem:[%s7670_s1 + $0x280] ss:$16 sps:$4 sm:$0xff]   ;;  %v5112_v23 = vld [vmem:[%s7670_s1 + $0x288] ss:$16 sps:$4 sm:$0xff]   ;;  %v5117_v24 = vld [vmem:[%s7670_s1 + $0x2a4] ss:$16 sps:$4 sm:$0xff]  }
  0x1e   :  { %v5120_v25 = vld [vmem:[%s7670_s1 + $0x2ac] ss:$16 sps:$4 sm:$0xff]   ;;  %v29_v26 = vld [vmem:[%s7671_s0 + $0x40] sm:$0xff]  ;;  %v5136_v46 = vld [vmem:[%s7670_s1 + $0x308] ss:$16 sps:$4 sm:$0xff]  }
  0x1f   :  { %1690 = vmatpush1.bf16.msra.mxu0 %v5035_v30  ;;  %1902 = vmatpush1.bf16.msra.mxu1 %v5036_v31  ;;  %v33_v27 = vld [vmem:[%s7671_s0 + $0x60] sm:$0xff]  ;;  %v5118_v30 = vld [vmem:[%s7670_s1 + $0x2a8] ss:$16 sps:$4 sm:$0xff]  }
  0x20   :  { %1691 = vmatprep.subr.bf16.mxu0 %v5037_v32  ;;  %1903 = vmatprep.subr.bf16.mxu1 %v5039_v33  ;;  %v4394_v28 = vcombine.high %v29_v26, %v33_v27  ;;  %v5115_v29 = vld [vmem:[%s7670_s1 + $0x2a0] ss:$16 sps:$4 sm:$0xff]   ;;  %v4393_v31 = vcombine.low %v29_v26, %v33_v27  ;;  %v5123_v32 = vld [vmem:[%s7670_s1 + $0x2c4] ss:$16 sps:$4 sm:$0xff]   ;;  %v5126_v33 = vld [vmem:[%s7670_s1 + $0x2cc] ss:$16 sps:$4 sm:$0xff]  }
  0x21   :  { %v5141_v47 = vld [vmem:[%s7670_s1 + $0x324] ss:$16 sps:$4 sm:$0xff]   ;;  %v5142_v50 = vld [vmem:[%s7670_s1 + $0x328] ss:$16 sps:$4 sm:$0xff]  }
  0x22   :  { %v6252_v27 = vld [vmem:[%s7671_s0 + $0x30] sm:$0xff] }
  0x23   :  { %1692 = vmatpush1.bf16.msra.mxu0 %v5041_v34  ;;  %1904 = vmatpush1.bf16.msra.mxu1 %v5042_v35  ;;  %v6083_v34 = vld [vmem:[%s7671_s0 + $0x8] sm:$0xff] }
  0x24   :  { %1693 = vmatprep.subr.bf16.mxu0 %v5043_v36  ;;  %1905 = vmatprep.subr.bf16.mxu1 %v5045_v37  ;;  %v6088_v35 = vld [vmem:[%s7671_s0 + $0x28] sm:$0xff]  ;;  %v5121_v36 = vld [vmem:[%s7670_s1 + $0x2c0] ss:$16 sps:$4 sm:$0xff]  }
  0x25   :  { %v5124_v37 = vld [vmem:[%s7670_s1 + $0x2c8] ss:$16 sps:$4 sm:$0xff]  }
  0x27   :  { %1694 = vmatpush1.bf16.msra.mxu0 %v5047_v38  ;;  %1906 = vmatpush1.bf16.msra.mxu1 %v5048_v39  ;;  %v4388_v38 = vcombine.high %v6083_v34, %v6088_v35  ;;  %v5129_v39 = vld [vmem:[%s7670_s1 + $0x2e4] ss:$16 sps:$4 sm:$0xff]  }
  0x28   :  { %1695 = vmatprep.subr.bf16.mxu0 %v5049_v40  ;;  %1907 = vmatprep.subr.bf16.mxu1 %v5051_v41  ;;  %v5132_v40 = vld [vmem:[%s7670_s1 + $0x2ec] ss:$16 sps:$4 sm:$0xff]   ;;  %v5127_v41 = vld [vmem:[%s7670_s1 + $0x2e0] ss:$16 sps:$4 sm:$0xff]  }
  0x2b   :  { %1696 = vmatpush1.bf16.msra.mxu0 %v5053_v42  ;;  %1908 = vmatpush1.bf16.msra.mxu1 %v5054_v43  ;;  %v5130_v42 = vld [vmem:[%s7670_s1 + $0x2e8] ss:$16 sps:$4 sm:$0xff]   ;;  %v5135_v43 = vld [vmem:[%s7670_s1 + $0x304] ss:$16 sps:$4 sm:$0xff]  }
  0x2c   :  { %1697 = vmatprep.subr.bf16.mxu0 %v5055_v44  ;;  %1909 = vmatprep.subr.bf16.mxu1 %v5057_v45  ;;  %v5138_v44 = vld [vmem:[%s7670_s1 + $0x30c] ss:$16 sps:$4 sm:$0xff]   ;;  %v5133_v45 = vld [vmem:[%s7670_s1 + $0x300] ss:$16 sps:$4 sm:$0xff]  }
  0x2f   :  { %1698 = vmatpush1.bf16.msra.mxu0 %v5059_v48  ;;  %1910 = vmatpush1.bf16.msra.mxu1 %v5060_v49  ;;  %v5144_v48 = vld [vmem:[%s7670_s1 + $0x32c] ss:$16 sps:$4 sm:$0xff]   ;;  %v5139_v49 = vld [vmem:[%s7670_s1 + $0x320] ss:$16 sps:$4 sm:$0xff]  }
  0x30   :  { %1699 = vmatprep.subr.bf16.mxu0 %v5061_v51  ;;  %1911 = vmatprep.subr.bf16.mxu1 %v5063_v52  ;;  %v5147_v51 = vld [vmem:[%s7670_s1 + $0x344] ss:$16 sps:$4 sm:$0xff]   ;;  %v5150_v52 = vld [vmem:[%s7670_s1 + $0x34c] ss:$16 sps:$4 sm:$0xff]  }
  0x33   :  { %1700 = vmatpush1.bf16.msra.mxu0 %v5065_v53  ;;  %1912 = vmatpush1.bf16.msra.mxu1 %v5066_v54  ;;  %v5145_v53 = vld [vmem:[%s7670_s1 + $0x340] ss:$16 sps:$4 sm:$0xff]   ;;  %v5148_v54 = vld [vmem:[%s7670_s1 + $0x348] ss:$16 sps:$4 sm:$0xff]  }
  0x34   :  { %1701 = vmatprep.subr.bf16.mxu0 %v5067_v55  ;;  %1913 = vmatprep.subr.bf16.mxu1 %v5069_v56  ;;  %v5153_v55 = vld [vmem:[%s7670_s1 + $0x364] ss:$16 sps:$4 sm:$0xff]   ;;  %v5156_v56 = vld [vmem:[%s7670_s1 + $0x36c] ss:$16 sps:$4 sm:$0xff]  }
  0x37   :  { %1702 = vmatpush1.bf16.msra.mxu0 %v5071_v57  ;;  %1914 = vmatpush1.bf16.msra.mxu1 %v5072_v58  ;;  %v5151_v57 = vld [vmem:[%s7670_s1 + $0x360] ss:$16 sps:$4 sm:$0xff]   ;;  %v5154_v58 = vld [vmem:[%s7670_s1 + $0x368] ss:$16 sps:$4 sm:$0xff]  }
  0x38   :  { %1703 = vmatprep.subr.bf16.mxu0 %v5073_v59  ;;  %1915 = vmatprep.subr.bf16.mxu1 %v5075_v60  ;;  %v5159_v59 = vld [vmem:[%s7670_s1 + $0x384] ss:$16 sps:$4 sm:$0xff]   ;;  %v5162_v60 = vld [vmem:[%s7670_s1 + $0x38c] ss:$16 sps:$4 sm:$0xff]  }
  0x3b   :  { %1704 = vmatpush1.bf16.msra.mxu0 %v5077_v61  ;;  %1916 = vmatpush1.bf16.msra.mxu1 %v5078_v62  ;;  %v5157_v61 = vld [vmem:[%s7670_s1 + $0x380] ss:$16 sps:$4 sm:$0xff]   ;;  %v5160_v62 = vld [vmem:[%s7670_s1 + $0x388] ss:$16 sps:$4 sm:$0xff]  }
  0x3c   :  { %1705 = vmatprep.subr.bf16.mxu0 %v5079_v63  ;;  %1917 = vmatprep.subr.bf16.mxu1 %v5081_v0  ;;  %v5165_v63 = vld [vmem:[%s7670_s1 + $0x3a4] ss:$16 sps:$4 sm:$0xff]   ;;  %v5168_v0 = vld [vmem:[%s7670_s1 + $0x3ac] ss:$16 sps:$4 sm:$0xff]  }
  0x3f   :  { %1706 = vmatpush1.bf16.msra.mxu0 %v5083_v1  ;;  %1918 = vmatpush1.bf16.msra.mxu1 %v5084_v2  ;;  %v5163_v1 = vld [vmem:[%s7670_s1 + $0x3a0] ss:$16 sps:$4 sm:$0xff]   ;;  %v5166_v2 = vld [vmem:[%s7670_s1 + $0x3a8] ss:$16 sps:$4 sm:$0xff]  }
  0x40   :  { %1728 = vmatprep.subr.bf16.mxu0 %v5087_v3  ;;  %1940 = vmatprep.subr.bf16.mxu1 %v5090_v4  ;;  %v5171_v3 = vld [vmem:[%s7670_s1 + $0x3c4] ss:$16 sps:$4 sm:$0xff]   ;;  %v5174_v4 = vld [vmem:[%s7670_s1 + $0x3cc] ss:$16 sps:$4 sm:$0xff]  }
  0x42   :  { %1708 = vmatmul.mubr.bf16.vlgmr.msra.gmra.mrb[0].mxu0 %v4385_v5  ;;  %1920 = vmatmul.mubr.bf16.vlgmr.msra.gmra.mrb[0].mxu1 %v4385_v5  ;;  %v5169_v5 = vld [vmem:[%s7670_s1 + $0x3c0] ss:$16 sps:$4 sm:$0xff]  }
  0x43   :  { %1729 = vmatpush1.bf16.msra.mxu0 %v5085_v6  ;;  %1941 = vmatpush1.bf16.msra.mxu1 %v5088_v7  ;;  %v5172_v6 = vld [vmem:[%s7670_s1 + $0x3c8] ss:$16 sps:$4 sm:$0xff]   ;;  %v5177_v7 = vld [vmem:[%s7670_s1 + $0x3e4] ss:$16 sps:$4 sm:$0xff]  }
  0x44   :  { %1730 = vmatprep.subr.bf16.mxu0 %v5093_v8  ;;  %1942 = vmatprep.subr.bf16.mxu1 %v5096_v9  ;;  %v5180_v8 = vld [vmem:[%s7670_s1 + $0x3ec] ss:$16 sps:$4 sm:$0xff]   ;;  %v5175_v9 = vld [vmem:[%s7670_s1 + $0x3e0] ss:$16 sps:$4 sm:$0xff]  }
  0x45   :  { %1717 = vmatprep.mubr.bf16.mxu0 %v4394_v28  ;;  %1929 = vmatprep.mubr.bf16.mxu1 %v4394_v28  ;;  %v5193_v28 = vld [vmem:[%s7670_s1 + $0x440] ss:$16 sps:$4 sm:$0xff]  }
  0x47   :  { %1731 = vmatpush1.bf16.msra.mxu0 %v5091_v10  ;;  %1943 = vmatpush1.bf16.msra.mxu1 %v5094_v11  ;;  %v5178_v10 = vld [vmem:[%s7670_s1 + $0x3e8] ss:$16 sps:$4 sm:$0xff]   ;;  %v5183_v11 = vld [vmem:[%s7670_s1 + $0x404] ss:$16 sps:$4 sm:$0xff]  }
  0x48   :  { %1732 = vmatprep.subr.bf16.mxu0 %v5099_v12  ;;  %1944 = vmatprep.subr.bf16.mxu1 %v5102_v13  ;;  %v5186_v12 = vld [vmem:[%s7670_s1 + $0x40c] ss:$16 sps:$4 sm:$0xff]   ;;  %v5181_v13 = vld [vmem:[%s7670_s1 + $0x400] ss:$16 sps:$4 sm:$0xff]  }
  0x4a   :  { %1718 = vmatmul.mubr.bf16.gmra.mrb[4].mxu0 %v4393_v31  ;;  %1930 = vmatmul.mubr.bf16.gmra.mrb[4].mxu1 %v4393_v31  ;;  %v5204_v31 = vld [vmem:[%s7670_s1 + $0x46c] ss:$16 sps:$4 sm:$0xff]  }
  0x4b   :  { %1733 = vmatpush1.bf16.msra.mxu0 %v5097_v14  ;;  %1945 = vmatpush1.bf16.msra.mxu1 %v5100_v15  ;;  %v5184_v14 = vld [vmem:[%s7670_s1 + $0x408] ss:$16 sps:$4 sm:$0xff]   ;;  %v4387_v15 = vcombine.low %v6083_v34, %v6088_v35  ;;  %v5207_v35 = vld [vmem:[%s7670_s1 + $0x484] ss:$16 sps:$4 sm:$0xff]  }
  0x4c   :  { %1734 = vmatprep.subr.bf16.mxu0 %v5105_v16  ;;  %1946 = vmatprep.subr.bf16.mxu1 %v5108_v17  ;;  %v30_v16 = vld [vmem:[%s7671_s0 + $0x48] sm:$0xff] }
  0x4d   :  { %1760 = vmatprep.mubr.bf16.mxu0 %v4388_v38  ;;  %1972 = vmatprep.mubr.bf16.mxu1 %v4388_v38  ;;  %v34_v17 = vld [vmem:[%s7671_s0 + $0x68] sm:$0xff] }
  0x4e   :  { %v4395_v26 = vcombine.low %v30_v16, %v34_v17  ;;  %v5202_v34 = vld [vmem:[%s7670_s1 + $0x468] ss:$16 sps:$4 sm:$0xff]  }
  0x4f   :  { %1735 = vmatpush1.bf16.msra.mxu0 %v5103_v18  ;;  %1947 = vmatpush1.bf16.msra.mxu1 %v5106_v19  ;;  %v5189_v18 = vld [vmem:[%s7670_s1 + $0x424] ss:$16 sps:$4 sm:$0xff]   ;;  %v5192_v19 = vld [vmem:[%s7670_s1 + $0x42c] ss:$16 sps:$4 sm:$0xff]   ;;  %v5208_v38 = vld [vmem:[%s7670_s1 + $0x488] ss:$16 sps:$4 sm:$0xff]  }
  0x50   :  { %1736 = vmatprep.subr.bf16.mxu0 %v5111_v20  ;;  %1948 = vmatprep.subr.bf16.mxu1 %v5114_v21  ;;  %v4396_v20 = vcombine.high %v30_v16, %v34_v17  ;;  %v5187_v21 = vld [vmem:[%s7670_s1 + $0x420] ss:$16 sps:$4 sm:$0xff]   ;;  %v5276_v16 = vld [vmem:[%s7670_s1 + $0x5ec] ss:$16 sps:$4 sm:$0xff]  }
  0x51   :  { %v5271_v17 = vld [vmem:[%s7670_s1 + $0x5e0] ss:$16 sps:$4 sm:$0xff]  }
  0x53   :  { %1737 = vmatpush1.bf16.msra.mxu0 %v5109_v22  ;;  %1949 = vmatpush1.bf16.msra.mxu1 %v5112_v23  ;;  %v5190_v22 = vld [vmem:[%s7670_s1 + $0x428] ss:$16 sps:$4 sm:$0xff]   ;;  %v5195_v23 = vld [vmem:[%s7670_s1 + $0x444] ss:$16 sps:$4 sm:$0xff]  }
  0x54   :  { %1738 = vmatprep.subr.bf16.mxu0 %v5117_v24  ;;  %1950 = vmatprep.subr.bf16.mxu1 %v5120_v25  ;;  %v5198_v24 = vld [vmem:[%s7670_s1 + $0x44c] ss:$16 sps:$4 sm:$0xff]   ;;  %v6247_v25 = vld [vmem:[%s7671_s0 + $0x10] sm:$0xff] }
  0x57   :  { %1739 = vmatpush1.bf16.msra.mxu0 %v5115_v29  ;;  %1951 = vmatpush1.bf16.msra.mxu1 %v5118_v30  ;;  %v5196_v29 = vld [vmem:[%s7670_s1 + $0x448] ss:$16 sps:$4 sm:$0xff]   ;;  %v5201_v30 = vld [vmem:[%s7670_s1 + $0x464] ss:$16 sps:$4 sm:$0xff]  }
  0x58   :  { %1740 = vmatprep.subr.bf16.mxu0 %v5123_v32  ;;  %1952 = vmatprep.subr.bf16.mxu1 %v5126_v33  ;;  %v4390_v32 = vcombine.high %v6247_v25, %v6252_v27  ;;  %v5199_v33 = vld [vmem:[%s7670_s1 + $0x460] ss:$16 sps:$4 sm:$0xff]  }
  0x5b   :  { %1741 = vmatpush1.bf16.msra.mxu0 %v5121_v36  ;;  %1953 = vmatpush1.bf16.msra.mxu1 %v5124_v37  ;;  %v5210_v36 = vld [vmem:[%s7670_s1 + $0x48c] ss:$16 sps:$4 sm:$0xff]   ;;  %v5205_v37 = vld [vmem:[%s7670_s1 + $0x480] ss:$16 sps:$4 sm:$0xff]  }
  0x5c   :  { %1742 = vmatprep.subr.bf16.mxu0 %v5129_v39  ;;  %1954 = vmatprep.subr.bf16.mxu1 %v5132_v40  ;;  %v5213_v39 = vld [vmem:[%s7670_s1 + $0x4a4] ss:$16 sps:$4 sm:$0xff]   ;;  %v5216_v40 = vld [vmem:[%s7670_s1 + $0x4ac] ss:$16 sps:$4 sm:$0xff]  }
  0x5f   :  { %1743 = vmatpush1.bf16.msra.mxu0 %v5127_v41  ;;  %1955 = vmatpush1.bf16.msra.mxu1 %v5130_v42  ;;  %v5211_v41 = vld [vmem:[%s7670_s1 + $0x4a0] ss:$16 sps:$4 sm:$0xff]   ;;  %v5214_v42 = vld [vmem:[%s7670_s1 + $0x4a8] ss:$16 sps:$4 sm:$0xff]  }
  0x60   :  { %1744 = vmatprep.subr.bf16.mxu0 %v5135_v43  ;;  %1956 = vmatprep.subr.bf16.mxu1 %v5138_v44  ;;  %v5219_v43 = vld [vmem:[%s7670_s1 + $0x4c4] ss:$16 sps:$4 sm:$0xff]   ;;  %v5222_v44 = vld [vmem:[%s7670_s1 + $0x4cc] ss:$16 sps:$4 sm:$0xff]  }
  0x63   :  { %1745 = vmatpush1.bf16.msra.mxu0 %v5133_v45  ;;  %1957 = vmatpush1.bf16.msra.mxu1 %v5136_v46  ;;  %v5217_v45 = vld [vmem:[%s7670_s1 + $0x4c0] ss:$16 sps:$4 sm:$0xff]   ;;  %v5220_v46 = vld [vmem:[%s7670_s1 + $0x4c8] ss:$16 sps:$4 sm:$0xff]  }
  0x64   :  { %1746 = vmatprep.subr.bf16.mxu0 %v5141_v47  ;;  %1958 = vmatprep.subr.bf16.mxu1 %v5144_v48  ;;  %v5225_v47 = vld [vmem:[%s7670_s1 + $0x4e4] ss:$16 sps:$4 sm:$0xff]   ;;  %v5228_v48 = vld [vmem:[%s7670_s1 + $0x4ec] ss:$16 sps:$4 sm:$0xff]  }
  0x67   :  { %1747 = vmatpush1.bf16.msra.mxu0 %v5139_v49  ;;  %1959 = vmatpush1.bf16.msra.mxu1 %v5142_v50  ;;  %v5223_v49 = vld [vmem:[%s7670_s1 + $0x4e0] ss:$16 sps:$4 sm:$0xff]   ;;  %v5226_v50 = vld [vmem:[%s7670_s1 + $0x4e8] ss:$16 sps:$4 sm:$0xff]  }
  0x68   :  { %1748 = vmatprep.subr.bf16.mxu0 %v5147_v51  ;;  %1960 = vmatprep.subr.bf16.mxu1 %v5150_v52  ;;  %v5231_v51 = vld [vmem:[%s7670_s1 + $0x504] ss:$16 sps:$4 sm:$0xff]   ;;  %v5234_v52 = vld [vmem:[%s7670_s1 + $0x50c] ss:$16 sps:$4 sm:$0xff]  }
  0x6b   :  { %1749 = vmatpush1.bf16.msra.mxu0 %v5145_v53  ;;  %1961 = vmatpush1.bf16.msra.mxu1 %v5148_v54  ;;  %v5229_v53 = vld [vmem:[%s7670_s1 + $0x500] ss:$16 sps:$4 sm:$0xff]   ;;  %v5232_v54 = vld [vmem:[%s7670_s1 + $0x508] ss:$16 sps:$4 sm:$0xff]  }
  0x6c   :  { %1750 = vmatprep.subr.bf16.mxu0 %v5153_v55  ;;  %1962 = vmatprep.subr.bf16.mxu1 %v5156_v56  ;;  %v5237_v55 = vld [vmem:[%s7670_s1 + $0x524] ss:$16 sps:$4 sm:$0xff]   ;;  %v5240_v56 = vld [vmem:[%s7670_s1 + $0x52c] ss:$16 sps:$4 sm:$0xff]  }
  0x6f   :  { %1751 = vmatpush1.bf16.msra.mxu0 %v5151_v57  ;;  %1963 = vmatpush1.bf16.msra.mxu1 %v5154_v58  ;;  %v5235_v57 = vld [vmem:[%s7670_s1 + $0x520] ss:$16 sps:$4 sm:$0xff]   ;;  %v5238_v58 = vld [vmem:[%s7670_s1 + $0x528] ss:$16 sps:$4 sm:$0xff]  }
  0x70   :  { %1752 = vmatprep.subr.bf16.mxu0 %v5159_v59  ;;  %1964 = vmatprep.subr.bf16.mxu1 %v5162_v60  ;;  %v5243_v59 = vld [vmem:[%s7670_s1 + $0x544] ss:$16 sps:$4 sm:$0xff]   ;;  %v5246_v60 = vld [vmem:[%s7670_s1 + $0x54c] ss:$16 sps:$4 sm:$0xff]  }
  0x73   :  { %1753 = vmatpush1.bf16.msra.mxu0 %v5157_v61  ;;  %1965 = vmatpush1.bf16.msra.mxu1 %v5160_v62  ;;  %v5241_v61 = vld [vmem:[%s7670_s1 + $0x540] ss:$16 sps:$4 sm:$0xff]   ;;  %v5244_v62 = vld [vmem:[%s7670_s1 + $0x548] ss:$16 sps:$4 sm:$0xff]  }
  0x74   :  { %1754 = vmatprep.subr.bf16.mxu0 %v5165_v63  ;;  %1966 = vmatprep.subr.bf16.mxu1 %v5168_v0  ;;  %v5249_v63 = vld [vmem:[%s7670_s1 + $0x564] ss:$16 sps:$4 sm:$0xff]   ;;  %v5252_v0 = vld [vmem:[%s7670_s1 + $0x56c] ss:$16 sps:$4 sm:$0xff]  }
  0x77   :  { %1755 = vmatpush1.bf16.msra.mxu0 %v5163_v1  ;;  %1967 = vmatpush1.bf16.msra.mxu1 %v5166_v2  ;;  %v5247_v1 = vld [vmem:[%s7670_s1 + $0x560] ss:$16 sps:$4 sm:$0xff]   ;;  %v5250_v2 = vld [vmem:[%s7670_s1 + $0x568] ss:$16 sps:$4 sm:$0xff]  }
  0x78   :  { %1756 = vmatprep.subr.bf16.mxu0 %v5171_v3  ;;  %1968 = vmatprep.subr.bf16.mxu1 %v5174_v4  ;;  %v5255_v3 = vld [vmem:[%s7670_s1 + $0x584] ss:$16 sps:$4 sm:$0xff]   ;;  %v5258_v4 = vld [vmem:[%s7670_s1 + $0x58c] ss:$16 sps:$4 sm:$0xff]  }
  0x7b   :  { %1757 = vmatpush1.bf16.msra.mxu0 %v5169_v5  ;;  %1969 = vmatpush1.bf16.msra.mxu1 %v5172_v6  ;;  %v5253_v5 = vld [vmem:[%s7670_s1 + $0x580] ss:$16 sps:$4 sm:$0xff]   ;;  %v5256_v6 = vld [vmem:[%s7670_s1 + $0x588] ss:$16 sps:$4 sm:$0xff]  }
  0x7c   :  { %1758 = vmatprep.subr.bf16.mxu0 %v5177_v7  ;;  %1970 = vmatprep.subr.bf16.mxu1 %v5180_v8  ;;  %v5261_v7 = vld [vmem:[%s7670_s1 + $0x5a4] ss:$16 sps:$4 sm:$0xff]   ;;  %v5264_v8 = vld [vmem:[%s7670_s1 + $0x5ac] ss:$16 sps:$4 sm:$0xff]  }
  0x7f   :  { %1759 = vmatpush1.bf16.msra.mxu0 %v5175_v9  ;;  %1971 = vmatpush1.bf16.msra.mxu1 %v5178_v10  ;;  %v5259_v9 = vld [vmem:[%s7670_s1 + $0x5a0] ss:$16 sps:$4 sm:$0xff]   ;;  %v5262_v10 = vld [vmem:[%s7670_s1 + $0x5a8] ss:$16 sps:$4 sm:$0xff]  }
  0x80   :  { %1781 = vmatprep.subr.bf16.mxu0 %v5183_v11  ;;  %1993 = vmatprep.subr.bf16.mxu1 %v5186_v12  ;;  %v5267_v11 = vld [vmem:[%s7670_s1 + $0x5c4] ss:$16 sps:$4 sm:$0xff]   ;;  %v5270_v12 = vld [vmem:[%s7670_s1 + $0x5cc] ss:$16 sps:$4 sm:$0xff]  }
  0x82   :  { %1761 = vmatmul.mubr.bf16.vlgmr.msra.gmra.mrb[0].mxu0 %v4387_v15  ;;  %1973 = vmatmul.mubr.bf16.vlgmr.msra.gmra.mrb[0].mxu1 %v4387_v15  ;;  %v5273_v15 = vld [vmem:[%s7670_s1 + $0x5e4] ss:$16 sps:$4 sm:$0xff]  }
  0x83   :  { %1782 = vmatpush1.bf16.msra.mxu0 %v5181_v13  ;;  %1994 = vmatpush1.bf16.msra.mxu1 %v5184_v14  ;;  %v5265_v13 = vld [vmem:[%s7670_s1 + $0x5c0] ss:$16 sps:$4 sm:$0xff]   ;;  %v5268_v14 = vld [vmem:[%s7670_s1 + $0x5c8] ss:$16 sps:$4 sm:$0xff]  }
  0x84   :  { %1783 = vmatprep.subr.bf16.mxu0 %v5189_v18  ;;  %1995 = vmatprep.subr.bf16.mxu1 %v5192_v19  ;;  %v5274_v18 = vld [vmem:[%s7670_s1 + $0x5e8] ss:$16 sps:$4 sm:$0xff]   ;;  %v5279_v19 = vld [vmem:[%s7670_s1 + $0x604] ss:$16 sps:$4 sm:$0xff]  }
  0x85   :  { %1770 = vmatprep.mubr.bf16.mxu0 %v4396_v20  ;;  %1982 = vmatprep.mubr.bf16.mxu1 %v4396_v20  ;;  %v5282_v20 = vld [vmem:[%s7670_s1 + $0x60c] ss:$16 sps:$4 sm:$0xff]  }
  0x87   :  { %1784 = vmatpush1.bf16.msra.mxu0 %v5187_v21  ;;  %1996 = vmatpush1.bf16.msra.mxu1 %v5190_v22  ;;  %v5277_v21 = vld [vmem:[%s7670_s1 + $0x600] ss:$16 sps:$4 sm:$0xff]   ;;  %v4389_v22 = vcombine.low %v6247_v25, %v6252_v27  ;;  %v5288_v25 = vld [vmem:[%s7670_s1 + $0x62c] ss:$16 sps:$4 sm:$0xff]  }
  0x88   :  { %1785 = vmatprep.subr.bf16.mxu0 %v5195_v23  ;;  %1997 = vmatprep.subr.bf16.mxu1 %v5198_v24  ;;  %v5280_v23 = vld [vmem:[%s7670_s1 + $0x608] ss:$16 sps:$4 sm:$0xff]   ;;  %v31_v24 = vld [vmem:[%s7671_s0 + $0x50] sm:$0xff] }
  0x8a   :  { %1771 = vmatmul.mubr.bf16.gmra.mrb[4].mxu0 %v4395_v26  ;;  %1983 = vmatmul.mubr.bf16.gmra.mrb[4].mxu1 %v4395_v26  ;;  %v35_v26 = vld [vmem:[%s7671_s0 + $0x70] sm:$0xff] }
  0x8b   :  { %1786 = vmatpush1.bf16.msra.mxu0 %v5193_v28  ;;  %1998 = vmatpush1.bf16.msra.mxu1 %v5196_v29  ;;  %v5285_v28 = vld [vmem:[%s7670_s1 + $0x624] ss:$16 sps:$4 sm:$0xff]   ;;  %v4398_v27 = vcombine.high %v31_v24, %v35_v26  ;;  %v5283_v29 = vld [vmem:[%s7670_s1 + $0x620] ss:$16 sps:$4 sm:$0xff]  }
  0x8c   :  { %1787 = vmatprep.subr.bf16.mxu0 %v5201_v30  ;;  %1999 = vmatprep.subr.bf16.mxu1 %v5204_v31  ;;  %v5286_v30 = vld [vmem:[%s7670_s1 + $0x628] ss:$16 sps:$4 sm:$0xff]   ;;  %v5291_v31 = vld [vmem:[%s7670_s1 + $0x644] ss:$16 sps:$4 sm:$0xff]  }
  0x8d   :  { %1813 = vmatprep.mubr.bf16.mxu0 %v4390_v32  ;;  %2025 = vmatprep.mubr.bf16.mxu1 %v4390_v32  ;;  %v5294_v32 = vld [vmem:[%s7670_s1 + $0x64c] ss:$16 sps:$4 sm:$0xff]  }
  0x8f   :  { %1788 = vmatpush1.bf16.msra.mxu0 %v5199_v33  ;;  %2000 = vmatpush1.bf16.msra.mxu1 %v5202_v34  ;;  %v4397_v33 = vcombine.low %v31_v24, %v35_v26  ;;  %v6459_v34 = vld [vmem:[%s7671_s0 + $0x18] sm:$0xff]  ;;  %v5367_v26 = vld [vmem:[%s7670_s1 + $0x7e0] ss:$16 sps:$4 sm:$0xff]  }
  0x90   :  { %1789 = vmatprep.subr.bf16.mxu0 %v5207_v35  ;;  %2001 = vmatprep.subr.bf16.mxu1 %v5210_v36  ;;  %v6464_v35 = vld [vmem:[%s7671_s0 + $0x38] sm:$0xff]  ;;  %v5289_v36 = vld [vmem:[%s7670_s1 + $0x640] ss:$16 sps:$4 sm:$0xff]  }
  0x91   :  { %v5372_v24 = vld [vmem:[%s7670_s1 + $0x7ec] ss:$16 sps:$4 sm:$0xff]  }
  0x93   :  { %1790 = vmatpush1.bf16.msra.mxu0 %v5205_v37  ;;  %2002 = vmatpush1.bf16.msra.mxu1 %v5208_v38  ;;  %v5292_v37 = vld [vmem:[%s7670_s1 + $0x648] ss:$16 sps:$4 sm:$0xff]   ;;  %v5297_v38 = vld [vmem:[%s7670_s1 + $0x664] ss:$16 sps:$4 sm:$0xff]  }
  0x94   :  { %1791 = vmatprep.subr.bf16.mxu0 %v5213_v39  ;;  %2003 = vmatprep.subr.bf16.mxu1 %v5216_v40  ;;  %v5300_v39 = vld [vmem:[%s7670_s1 + $0x66c] ss:$16 sps:$4 sm:$0xff]   ;;  %v4392_v40 = vcombine.high %v6459_v34, %v6464_v35 }
  0x97   :  { %1792 = vmatpush1.bf16.msra.mxu0 %v5211_v41  ;;  %2004 = vmatpush1.bf16.msra.mxu1 %v5214_v42  ;;  %v5295_v41 = vld [vmem:[%s7670_s1 + $0x660] ss:$16 sps:$4 sm:$0xff]   ;;  %v5298_v42 = vld [vmem:[%s7670_s1 + $0x668] ss:$16 sps:$4 sm:$0xff]  }
  0x98   :  { %1793 = vmatprep.subr.bf16.mxu0 %v5219_v43  ;;  %2005 = vmatprep.subr.bf16.mxu1 %v5222_v44  ;;  %v5303_v43 = vld [vmem:[%s7670_s1 + $0x684] ss:$16 sps:$4 sm:$0xff]   ;;  %v5306_v44 = vld [vmem:[%s7670_s1 + $0x68c] ss:$16 sps:$4 sm:$0xff]  }
  0x9b   :  { %1794 = vmatpush1.bf16.msra.mxu0 %v5217_v45  ;;  %2006 = vmatpush1.bf16.msra.mxu1 %v5220_v46  ;;  %v5301_v45 = vld [vmem:[%s7670_s1 + $0x680] ss:$16 sps:$4 sm:$0xff]   ;;  %v5304_v46 = vld [vmem:[%s7670_s1 + $0x688] ss:$16 sps:$4 sm:$0xff]  }
  0x9c   :  { %1795 = vmatprep.subr.bf16.mxu0 %v5225_v47  ;;  %2007 = vmatprep.subr.bf16.mxu1 %v5228_v48  ;;  %v5309_v47 = vld [vmem:[%s7670_s1 + $0x6a4] ss:$16 sps:$4 sm:$0xff]   ;;  %v5312_v48 = vld [vmem:[%s7670_s1 + $0x6ac] ss:$16 sps:$4 sm:$0xff]  }
  0x9f   :  { %1796 = vmatpush1.bf16.msra.mxu0 %v5223_v49  ;;  %2008 = vmatpush1.bf16.msra.mxu1 %v5226_v50  ;;  %v5307_v49 = vld [vmem:[%s7670_s1 + $0x6a0] ss:$16 sps:$4 sm:$0xff]   ;;  %v5310_v50 = vld [vmem:[%s7670_s1 + $0x6a8] ss:$16 sps:$4 sm:$0xff]  }
  0xa0   :  { %1797 = vmatprep.subr.bf16.mxu0 %v5231_v51  ;;  %2009 = vmatprep.subr.bf16.mxu1 %v5234_v52  ;;  %v5315_v51 = vld [vmem:[%s7670_s1 + $0x6c4] ss:$16 sps:$4 sm:$0xff]   ;;  %v5318_v52 = vld [vmem:[%s7670_s1 + $0x6cc] ss:$16 sps:$4 sm:$0xff]  }
  0xa3   :  { %1798 = vmatpush1.bf16.msra.mxu0 %v5229_v53  ;;  %2010 = vmatpush1.bf16.msra.mxu1 %v5232_v54  ;;  %v5313_v53 = vld [vmem:[%s7670_s1 + $0x6c0] ss:$16 sps:$4 sm:$0xff]   ;;  %v5316_v54 = vld [vmem:[%s7670_s1 + $0x6c8] ss:$16 sps:$4 sm:$0xff]  }
  0xa4   :  { %1799 = vmatprep.subr.bf16.mxu0 %v5237_v55  ;;  %2011 = vmatprep.subr.bf16.mxu1 %v5240_v56  ;;  %v5321_v55 = vld [vmem:[%s7670_s1 + $0x6e4] ss:$16 sps:$4 sm:$0xff]   ;;  %v5324_v56 = vld [vmem:[%s7670_s1 + $0x6ec] ss:$16 sps:$4 sm:$0xff]  }
  0xa7   :  { %1800 = vmatpush1.bf16.msra.mxu0 %v5235_v57  ;;  %2012 = vmatpush1.bf16.msra.mxu1 %v5238_v58  ;;  %v5319_v57 = vld [vmem:[%s7670_s1 + $0x6e0] ss:$16 sps:$4 sm:$0xff]   ;;  %v5322_v58 = vld [vmem:[%s7670_s1 + $0x6e8] ss:$16 sps:$4 sm:$0xff]  }
  0xa8   :  { %1801 = vmatprep.subr.bf16.mxu0 %v5243_v59  ;;  %2013 = vmatprep.subr.bf16.mxu1 %v5246_v60  ;;  %v5327_v59 = vld [vmem:[%s7670_s1 + $0x704] ss:$16 sps:$4 sm:$0xff]   ;;  %v5330_v60 = vld [vmem:[%s7670_s1 + $0x70c] ss:$16 sps:$4 sm:$0xff]  }
  0xab   :  { %1802 = vmatpush1.bf16.msra.mxu0 %v5241_v61  ;;  %2014 = vmatpush1.bf16.msra.mxu1 %v5244_v62  ;;  %v5325_v61 = vld [vmem:[%s7670_s1 + $0x700] ss:$16 sps:$4 sm:$0xff]   ;;  %v5328_v62 = vld [vmem:[%s7670_s1 + $0x708] ss:$16 sps:$4 sm:$0xff]  }
  0xac   :  { %1803 = vmatprep.subr.bf16.mxu0 %v5249_v63  ;;  %2015 = vmatprep.subr.bf16.mxu1 %v5252_v0  ;;  %v5333_v63 = vld [vmem:[%s7670_s1 + $0x724] ss:$16 sps:$4 sm:$0xff]   ;;  %v5336_v0 = vld [vmem:[%s7670_s1 + $0x72c] ss:$16 sps:$4 sm:$0xff]  }
  0xaf   :  { %1804 = vmatpush1.bf16.msra.mxu0 %v5247_v1  ;;  %2016 = vmatpush1.bf16.msra.mxu1 %v5250_v2  ;;  %v5331_v1 = vld [vmem:[%s7670_s1 + $0x720] ss:$16 sps:$4 sm:$0xff]   ;;  %v5334_v2 = vld [vmem:[%s7670_s1 + $0x728] ss:$16 sps:$4 sm:$0xff]  }
  0xb0   :  { %1805 = vmatprep.subr.bf16.mxu0 %v5255_v3  ;;  %2017 = vmatprep.subr.bf16.mxu1 %v5258_v4  ;;  %v5339_v3 = vld [vmem:[%s7670_s1 + $0x744] ss:$16 sps:$4 sm:$0xff]   ;;  %v5342_v4 = vld [vmem:[%s7670_s1 + $0x74c] ss:$16 sps:$4 sm:$0xff]  }
  0xb3   :  { %1806 = vmatpush1.bf16.msra.mxu0 %v5253_v5  ;;  %2018 = vmatpush1.bf16.msra.mxu1 %v5256_v6  ;;  %v5337_v5 = vld [vmem:[%s7670_s1 + $0x740] ss:$16 sps:$4 sm:$0xff]   ;;  %v5340_v6 = vld [vmem:[%s7670_s1 + $0x748] ss:$16 sps:$4 sm:$0xff]  }
  0xb4   :  { %1807 = vmatprep.subr.bf16.mxu0 %v5261_v7  ;;  %2019 = vmatprep.subr.bf16.mxu1 %v5264_v8  ;;  %v5345_v7 = vld [vmem:[%s7670_s1 + $0x764] ss:$16 sps:$4 sm:$0xff]   ;;  %v5348_v8 = vld [vmem:[%s7670_s1 + $0x76c] ss:$16 sps:$4 sm:$0xff]  }
  0xb7   :  { %1808 = vmatpush1.bf16.msra.mxu0 %v5259_v9  ;;  %2020 = vmatpush1.bf16.msra.mxu1 %v5262_v10  ;;  %v5343_v9 = vld [vmem:[%s7670_s1 + $0x760] ss:$16 sps:$4 sm:$0xff]   ;;  %v5346_v10 = vld [vmem:[%s7670_s1 + $0x768] ss:$16 sps:$4 sm:$0xff]  }
  0xb8   :  { %1809 = vmatprep.subr.bf16.mxu0 %v5267_v11  ;;  %2021 = vmatprep.subr.bf16.mxu1 %v5270_v12  ;;  %v5351_v11 = vld [vmem:[%s7670_s1 + $0x784] ss:$16 sps:$4 sm:$0xff]   ;;  %v5354_v12 = vld [vmem:[%s7670_s1 + $0x78c] ss:$16 sps:$4 sm:$0xff]  }
  0xbb   :  { %1810 = vmatpush1.bf16.msra.mxu0 %v5265_v13  ;;  %2022 = vmatpush1.bf16.msra.mxu1 %v5268_v14  ;;  %v5349_v13 = vld [vmem:[%s7670_s1 + $0x780] ss:$16 sps:$4 sm:$0xff]   ;;  %v5352_v14 = vld [vmem:[%s7670_s1 + $0x788] ss:$16 sps:$4 sm:$0xff]  }
  0xbc   :  { %1811 = vmatprep.subr.bf16.mxu0 %v5273_v15  ;;  %2023 = vmatprep.subr.bf16.mxu1 %v5276_v16  ;;  %v5357_v15 = vld [vmem:[%s7670_s1 + $0x7a4] ss:$16 sps:$4 sm:$0xff]   ;;  %v5360_v16 = vld [vmem:[%s7670_s1 + $0x7ac] ss:$16 sps:$4 sm:$0xff]  }
  0xbf   :  { %1812 = vmatpush1.bf16.msra.mxu0 %v5271_v17  ;;  %2024 = vmatpush1.bf16.msra.mxu1 %v5274_v18  ;;  %v5355_v17 = vld [vmem:[%s7670_s1 + $0x7a0] ss:$16 sps:$4 sm:$0xff]   ;;  %v5358_v18 = vld [vmem:[%s7670_s1 + $0x7a8] ss:$16 sps:$4 sm:$0xff]  }
  0xc0   :  { %1834 = vmatprep.subr.bf16.mxu0 %v5279_v19  ;;  %2046 = vmatprep.subr.bf16.mxu1 %v5282_v20  ;;  %v5363_v19 = vld [vmem:[%s7670_s1 + $0x7c4] ss:$16 sps:$4 sm:$0xff]   ;;  %v5366_v20 = vld [vmem:[%s7670_s1 + $0x7cc] ss:$16 sps:$4 sm:$0xff]  }
  0xc2   :  { %1814 = vmatmul.mubr.bf16.vlgmr.msra.gmra.mrb[0].mxu0 %v4389_v22  ;;  %2026 = vmatmul.mubr.bf16.vlgmr.msra.gmra.mrb[0].mxu1 %v4389_v22  ;;  %v5364_v22 = vld [vmem:[%s7670_s1 + $0x7c8] ss:$16 sps:$4 sm:$0xff]  }
  0xc3   :  { %1835 = vmatpush1.bf16.msra.mxu0 %v5277_v21  ;;  %2047 = vmatpush1.bf16.msra.mxu1 %v5280_v23  ;;  %v5361_v21 = vld [vmem:[%s7670_s1 + $0x7c0] ss:$16 sps:$4 sm:$0xff]   ;;  %v5369_v23 = vld [vmem:[%s7670_s1 + $0x7e4] ss:$16 sps:$4 sm:$0xff]  }
  0xc4   :  { %1836 = vmatprep.subr.bf16.mxu0 %v5285_v28  ;;  %2048 = vmatprep.subr.bf16.mxu1 %v5288_v25  ;;  %v5370_v28 = vld [vmem:[%s7670_s1 + $0x7e8] ss:$16 sps:$4 sm:$0xff]   ;;  %v6633_v25 = vld [vmem:[%s7672_s2 + $0x4] ss:$16 sps:$4 sm:$0xff]  }
  0xc5   :  { %1823 = vmatprep.mubr.bf16.mxu0 %v4398_v27  ;;  %2035 = vmatprep.mubr.bf16.mxu1 %v4398_v27  ;;  %v6638_v27 = vld [vmem:[%s7672_s2 + $0xc] ss:$16 sps:$4 sm:$0xff]  }
  0xc7   :  { %1837 = vmatpush1.bf16.msra.mxu0 %v5283_v29  ;;  %2049 = vmatpush1.bf16.msra.mxu1 %v5286_v30  ;;  %v4391_v29 = vcombine.low %v6459_v34, %v6464_v35  ;;  %v32_v30 = vld [vmem:[%s7671_s0 + $0x58] sm:$0xff]  ;;  %v6663_v34 = vld [vmem:[%s7672_s2 + $0x24] ss:$16 sps:$4 sm:$0xff]  }
  0xc8   :  { %1838 = vmatprep.subr.bf16.mxu0 %v5291_v31  ;;  %2050 = vmatprep.subr.bf16.mxu1 %v5294_v32  ;;  %v36_v31 = vld [vmem:[%s7671_s0 + $0x78] sm:$0xff]  ;;  %v6651_v32 = vld [vmem:[%s7672_s2] ss:$16 sps:$4 sm:$0xff]  }
  0xc9   :  { %v6668_v35 = vld [vmem:[%s7672_s2 + $0x2c] ss:$16 sps:$4 sm:$0xff]  }
  0xca   :  { %1824 = vmatmul.mubr.bf16.gmra.mrb[4].mxu0 %v4397_v33  ;;  %2036 = vmatmul.mubr.bf16.gmra.mrb[4].mxu1 %v4397_v33  ;;  %v6656_v33 = vld [vmem:[%s7672_s2 + $0x8] ss:$16 sps:$4 sm:$0xff]  }
  0xcb   :  { %1839 = vmatpush1.bf16.msra.mxu0 %v5289_v36  ;;  %2051 = vmatpush1.bf16.msra.mxu1 %v5292_v37  ;;  %v4400_v36 = vcombine.high %v32_v30, %v36_v31  ;;  %v6675_v37 = vld [vmem:[%s7672_s2 + $0x20] ss:$16 sps:$4 sm:$0xff]  }
  0xcc   :  { %1840 = vmatprep.subr.bf16.mxu0 %v5297_v38  ;;  %2052 = vmatprep.subr.bf16.mxu1 %v5300_v39  ;;  %v6680_v38 = vld [vmem:[%s7672_s2 + $0x28] ss:$16 sps:$4 sm:$0xff]   ;;  %v6687_v39 = vld [vmem:[%s7672_s2 + $0x44] ss:$16 sps:$4 sm:$0xff]  }
  0xcd   :  { %1866 = vmatprep.mubr.bf16.mxu0 %v4392_v40  ;;  %2078 = vmatprep.mubr.bf16.mxu1 %v4392_v40  ;;  %v6692_v40 = vld [vmem:[%s7672_s2 + $0x4c] ss:$16 sps:$4 sm:$0xff]  }
  0xcf   :  { %1841 = vmatpush1.bf16.msra.mxu0 %v5295_v41  ;;  %2053 = vmatpush1.bf16.msra.mxu1 %v5298_v42  ;;  %v4399_v41 = vcombine.low %v32_v30, %v36_v31  ;;  %v6699_v42 = vld [vmem:[%s7672_s2 + $0x40] ss:$16 sps:$4 sm:$0xff]  }
  0xd0   :  { %1842 = vmatprep.subr.bf16.mxu0 %v5303_v43  ;;  %2054 = vmatprep.subr.bf16.mxu1 %v5306_v44  ;;  %v6704_v43 = vld [vmem:[%s7672_s2 + $0x48] ss:$16 sps:$4 sm:$0xff]   ;;  %v6711_v44 = vld [vmem:[%s7672_s2 + $0x64] ss:$16 sps:$4 sm:$0xff]  }
  0xd3   :  { %1843 = vmatpush1.bf16.msra.mxu0 %v5301_v45  ;;  %2055 = vmatpush1.bf16.msra.mxu1 %v5304_v46  ;;  %v6716_v45 = vld [vmem:[%s7672_s2 + $0x6c] ss:$16 sps:$4 sm:$0xff]   ;;  %v6723_v46 = vld [vmem:[%s7672_s2 + $0x60] ss:$16 sps:$4 sm:$0xff]  }
  0xd4   :  { %1844 = vmatprep.subr.bf16.mxu0 %v5309_v47  ;;  %2056 = vmatprep.subr.bf16.mxu1 %v5312_v48  ;;  %v6728_v47 = vld [vmem:[%s7672_s2 + $0x68] ss:$16 sps:$4 sm:$0xff]   ;;  %v6735_v48 = vld [vmem:[%s7672_s2 + $0x84] ss:$16 sps:$4 sm:$0xff]  }
  0xd7   :  { %1845 = vmatpush1.bf16.msra.mxu0 %v5307_v49  ;;  %2057 = vmatpush1.bf16.msra.mxu1 %v5310_v50  ;;  %v6740_v49 = vld [vmem:[%s7672_s2 + $0x8c] ss:$16 sps:$4 sm:$0xff]   ;;  %v7676_v50 = vmov 0  }
  0xd8   :  { %1846 = vmatprep.subr.bf16.mxu0 %v5315_v51  ;;  %2058 = vmatprep.subr.bf16.mxu1 %v5318_v52  ;;  %v6749_v51 = vld [vmem:[%s7672_s2 + $0x80] ss:$16 sps:$4 sm:$0xff]   ;;  %v6754_v52 = vld [vmem:[%s7672_s2 + $0x88] ss:$16 sps:$4 sm:$0xff]  }
  0xdb   :  { %1847 = vmatpush1.bf16.msra.mxu0 %v5313_v53  ;;  %2059 = vmatpush1.bf16.msra.mxu1 %v5316_v54  ;;  %v6761_v53 = vld [vmem:[%s7672_s2 + $0xa4] ss:$16 sps:$4 sm:$0xff]   ;;  %v6766_v54 = vld [vmem:[%s7672_s2 + $0xac] ss:$16 sps:$4 sm:$0xff]  }
  0xdc   :  { %1848 = vmatprep.subr.bf16.mxu0 %v5321_v55  ;;  %2060 = vmatprep.subr.bf16.mxu1 %v5324_v56  ;;  %v6773_v55 = vld [vmem:[%s7672_s2 + $0xa0] ss:$16 sps:$4 sm:$0xff]   ;;  %v6778_v56 = vld [vmem:[%s7672_s2 + $0xa8] ss:$16 sps:$4 sm:$0xff]  }
  0xdf   :  { %1849 = vmatpush1.bf16.msra.mxu0 %v5319_v57  ;;  %2061 = vmatpush1.bf16.msra.mxu1 %v5322_v58  ;;  %v6785_v57 = vld [vmem:[%s7672_s2 + $0xc4] ss:$16 sps:$4 sm:$0xff]   ;;  %v6790_v58 = vld [vmem:[%s7672_s2 + $0xcc] ss:$16 sps:$4 sm:$0xff]  }
  0xe0   :  { %1850 = vmatprep.subr.bf16.mxu0 %v5327_v59  ;;  %2062 = vmatprep.subr.bf16.mxu1 %v5330_v60  ;;  %v6797_v59 = vld [vmem:[%s7672_s2 + $0xc0] ss:$16 sps:$4 sm:$0xff]   ;;  %v6802_v60 = vld [vmem:[%s7672_s2 + $0xc8] ss:$16 sps:$4 sm:$0xff]  }
  0xe3   :  { %1851 = vmatpush1.bf16.msra.mxu0 %v5325_v61  ;;  %2063 = vmatpush1.bf16.msra.mxu1 %v5328_v62  ;;  %v6809_v61 = vld [vmem:[%s7672_s2 + $0xe4] ss:$16 sps:$4 sm:$0xff]   ;;  %v6814_v62 = vld [vmem:[%s7672_s2 + $0xec] ss:$16 sps:$4 sm:$0xff]  }
  0xe4   :  { %1852 = vmatprep.subr.bf16.mxu0 %v5333_v63  ;;  %2064 = vmatprep.subr.bf16.mxu1 %v5336_v0  ;;  %v6821_v63 = vld [vmem:[%s7672_s2 + $0xe0] ss:$16 sps:$4 sm:$0xff]   ;;  %v6826_v0 = vld [vmem:[%s7672_s2 + $0xe8] ss:$16 sps:$4 sm:$0xff]  }
  0xe7   :  { %1853 = vmatpush1.bf16.msra.mxu0 %v5331_v1  ;;  %2065 = vmatpush1.bf16.msra.mxu1 %v5334_v2  ;;  %v295_v1 = vlaneseq }
  0xe8   :  { %1854 = vmatprep.subr.bf16.mxu0 %v5339_v3  ;;  %2066 = vmatprep.subr.bf16.mxu1 %v5342_v4 }
  0xe9   :  { %v296_v2 = vshrl.u32 %v295_v1, 7 }
  0xeb   :  { %1855 = vmatpush1.bf16.msra.mxu0 %v5337_v5  ;;  %2067 = vmatpush1.bf16.msra.mxu1 %v5340_v6  ;;  %v6870_v3 = vsub.s32 0, %v296_v2  ;;  %v305_v4 = vsub.s32 2, %v296_v2  ;;  %v293_v5 = vld [vmem:[%s7673_s4] ss:$8 sm:$0xf]  ;;  %v6875_v6 = vsub.s32 1, %v296_v2 }
  0xec   :  { %1856 = vmatprep.subr.bf16.mxu0 %v5345_v7  ;;  %2068 = vmatprep.subr.bf16.mxu1 %v5348_v8  ;;  %v309_v7 = vsub.s32 3, %v296_v2 }
  0xed   :  { %7686 = vst [vmem:[#allocation3_spill] sm:$0xff] %v6870_v3  ;;  %7687 = vst [vmem:[#allocation4_spill] sm:$0xff] %v6875_v6 }
  0xef   :  { %1857 = vmatpush1.bf16.msra.mxu0 %v5343_v9  ;;  %2069 = vmatpush1.bf16.msra.mxu1 %v5346_v10  ;;  %v298_v10 = vrot.slane %v293_v5, %v6870_v3 }
  0xf0   :  { %1858 = vmatprep.subr.bf16.mxu0 %v5351_v11  ;;  %2070 = vmatprep.subr.bf16.mxu1 %v5354_v12  ;;  %v306_v11 = vrot.slane %v293_v5, %v305_v4 }
  0xf3   :  { %1859 = vmatpush1.bf16.msra.mxu0 %v5349_v13  ;;  %2071 = vmatpush1.bf16.msra.mxu1 %v5352_v14  ;;  %v302_v14 = vrot.slane %v293_v5, %v6875_v6 }
  0xf4   :  { %1860 = vmatprep.subr.bf16.mxu0 %v5357_v15  ;;  %2072 = vmatprep.subr.bf16.mxu1 %v5360_v16  ;;  %v310_v15 = vrot.slane %v293_v5, %v309_v7 }
  0xf7   :  { %1861 = vmatpush1.bf16.msra.mxu0 %v5355_v17  ;;  %2073 = vmatpush1.bf16.msra.mxu1 %v5358_v18 }
  0xf8   :  { %1862 = vmatprep.subr.bf16.mxu0 %v5363_v19  ;;  %2074 = vmatprep.subr.bf16.mxu1 %v5366_v20 }
  0xfb   :  { %1863 = vmatpush1.bf16.msra.mxu0 %v5361_v21  ;;  %2075 = vmatpush1.bf16.msra.mxu1 %v5364_v22 }
  0xfc   :  { %1864 = vmatprep.subr.bf16.mxu0 %v5369_v23  ;;  %2076 = vmatprep.subr.bf16.mxu1 %v5372_v24 }
  0xff   :  { %1865 = vmatpush1.bf16.msra.mxu0 %v5367_v26  ;;  %2077 = vmatpush1.bf16.msra.mxu1 %v5370_v28 }
 0x100   :  { %2291 = vmatprep.subr.bf16.mxu0 %v6633_v25  ;;  %2332 = vmatprep.subr.bf16.mxu1 %v6638_v27 }
 0x102   :  { %1867 = vmatmul.mubr.bf16.vlgmr.msra.gmra.mrb[0].mxu0 %v4391_v29  ;;  %2079 = vmatmul.mubr.bf16.vlgmr.msra.gmra.mrb[0].mxu1 %v4391_v29 }
 0x103   :  { %2292 = vmatpush1.bf16.msra.mxu0 %v6651_v32  ;;  %2333 = vmatpush1.bf16.msra.mxu1 %v6656_v33 }
 0x104   :  { %2293 = vmatprep.subr.bf16.mxu0 %v6663_v34  ;;  %2334 = vmatprep.subr.bf16.mxu1 %v6668_v35 }
 0x105   :  { %1876 = vmatprep.mubr.bf16.mxu0 %v4400_v36  ;;  %2088 = vmatprep.mubr.bf16.mxu1 %v4400_v36 }
 0x107   :  { %2294 = vmatpush1.bf16.msra.mxu0 %v6675_v37  ;;  %2335 = vmatpush1.bf16.msra.mxu1 %v6680_v38 }
 0x108   :  { %2295 = vmatprep.subr.bf16.mxu0 %v6687_v39  ;;  %2336 = vmatprep.subr.bf16.mxu1 %v6692_v40 }
 0x10a   :  { %1877 = vmatmul.mubr.bf16.gmra.mrb[4].mxu0 %v4399_v41  ;;  %2089 = vmatmul.mubr.bf16.gmra.mrb[4].mxu1 %v4399_v41 }
 0x10b   :  { %2296 = vmatpush1.bf16.msra.mxu0 %v6699_v42  ;;  %2337 = vmatpush1.bf16.msra.mxu1 %v6704_v43 }
 0x10c   :  { %2297 = vmatprep.subr.bf16.mxu0 %v6711_v44  ;;  %2338 = vmatprep.subr.bf16.mxu1 %v6716_v45 }
 0x10d   :  { %2323 = vmatprep.mubr.bf16.mxu0 %v7676_v50  ;;  %2364 = vmatprep.mubr.bf16.mxu1 %v7676_v50 }
 0x10f   :  { %2298 = vmatpush1.bf16.msra.mxu0 %v6723_v46  ;;  %2339 = vmatpush1.bf16.msra.mxu1 %v6728_v47 }
 0x110   :  { %2299 = vmatprep.subr.bf16.mxu0 %v6735_v48  ;;  %2340 = vmatprep.subr.bf16.mxu1 %v6740_v49 }
 0x113   :  { %2300 = vmatpush1.bf16.msra.mxu0 %v6749_v51  ;;  %2341 = vmatpush1.bf16.msra.mxu1 %v6754_v52 }
 0x114   :  { %2301 = vmatprep.subr.bf16.mxu0 %v6761_v53  ;;  %2342 = vmatprep.subr.bf16.mxu1 %v6766_v54 }
 0x117   :  { %2302 = vmatpush1.bf16.msra.mxu0 %v6773_v55  ;;  %2343 = vmatpush1.bf16.msra.mxu1 %v6778_v56 }
 0x118   :  { %2303 = vmatprep.subr.bf16.mxu0 %v6785_v57  ;;  %2344 = vmatprep.subr.bf16.mxu1 %v6790_v58 }
 0x11b   :  { %2304 = vmatpush1.bf16.msra.mxu0 %v6797_v59  ;;  %2345 = vmatpush1.bf16.msra.mxu1 %v6802_v60 }
 0x11c   :  { %2305 = vmatprep.subr.bf16.mxu0 %v6809_v61  ;;  %2346 = vmatprep.subr.bf16.mxu1 %v6814_v62 }
 0x11f   :  { %2306 = vmatpush1.bf16.msra.mxu0 %v6821_v63  ;;  %2347 = vmatpush1.bf16.msra.mxu1 %v6826_v0 }
 0x120   :  { %2401 = vmatprep.subr.bf16.mxu0 %v6633_v25  ;;  %2442 = vmatprep.subr.bf16.mxu1 %v6638_v27 }
 0x122   :  { %2324 = vmatmul.mubr.bf16.vlgmr.msra.gmra.mrb[8].mxu0 %v7676_v50  ;;  %2365 = vmatmul.mubr.bf16.vlgmr.msra.gmra.mrb[8].mxu1 %v7676_v50 }
 0x123   :  { %2402 = vmatpush1.bf16.msra.mxu0 %v6651_v32  ;;  %2443 = vmatpush1.bf16.msra.mxu1 %v6656_v33 }
 0x124   :  { %2403 = vmatprep.subr.bf16.mxu0 %v6663_v34  ;;  %2444 = vmatprep.subr.bf16.mxu1 %v6668_v35 }
 0x125   :  { %2433 = vmatprep.mubr.bf16.mxu0 %v7676_v50  ;;  %2474 = vmatprep.mubr.bf16.mxu1 %v7676_v50 }
 0x127   :  { %2404 = vmatpush1.bf16.msra.mxu0 %v6675_v37  ;;  %2445 = vmatpush1.bf16.msra.mxu1 %v6680_v38 }
 0x128   :  { %2405 = vmatprep.subr.bf16.mxu0 %v6687_v39  ;;  %2446 = vmatprep.subr.bf16.mxu1 %v6692_v40 }
 0x12b   :  { %2406 = vmatpush1.bf16.msra.mxu0 %v6699_v42  ;;  %2447 = vmatpush1.bf16.msra.mxu1 %v6704_v43 }
 0x12c   :  { %2407 = vmatprep.subr.bf16.mxu0 %v6711_v44  ;;  %2448 = vmatprep.subr.bf16.mxu1 %v6716_v45 }
 0x12f   :  { %2408 = vmatpush1.bf16.msra.mxu0 %v6723_v46  ;;  %2449 = vmatpush1.bf16.msra.mxu1 %v6728_v47 }
 0x130   :  { %2409 = vmatprep.subr.bf16.mxu0 %v6735_v48  ;;  %2450 = vmatprep.subr.bf16.mxu1 %v6740_v49 }
 0x133   :  { %2410 = vmatpush1.bf16.msra.mxu0 %v6749_v51  ;;  %2451 = vmatpush1.bf16.msra.mxu1 %v6754_v52 }
 0x134   :  { %2411 = vmatprep.subr.bf16.mxu0 %v6761_v53  ;;  %2452 = vmatprep.subr.bf16.mxu1 %v6766_v54 }
 0x137   :  { %2412 = vmatpush1.bf16.msra.mxu0 %v6773_v55  ;;  %2453 = vmatpush1.bf16.msra.mxu1 %v6778_v56 }
 0x138   :  { %2413 = vmatprep.subr.bf16.mxu0 %v6785_v57  ;;  %2454 = vmatprep.subr.bf16.mxu1 %v6790_v58 }
 0x13b   :  { %2414 = vmatpush1.bf16.msra.mxu0 %v6797_v59  ;;  %2455 = vmatpush1.bf16.msra.mxu1 %v6802_v60 }
 0x13c   :  { %2415 = vmatprep.subr.bf16.mxu0 %v6809_v61  ;;  %2456 = vmatprep.subr.bf16.mxu1 %v6814_v62 }
 0x13f   :  { %2416 = vmatpush1.bf16.msra.mxu0 %v6821_v63  ;;  %2457 = vmatpush1.bf16.msra.mxu1 %v6826_v0 }
 0x140   :  { %2531 = vmatprep.subr.bf16.mxu0 %v6633_v25  ;;  %2572 = vmatprep.subr.bf16.mxu1 %v6638_v27 }
 0x1d5   :  { %v1868_v8 = vpop.f32.mrb[0].mxu0  ;;  %v2080_v9 = vpop.f32.mrb[0].mxu1 }
 0x1d6   :  { %v1870_v12 = vpop.f32.mrb[1].mxu0  ;;  %v2082_v13 = vpop.f32.mrb[1].mxu1 }
 0x1d7   :  { %v1872_v16 = vpop.f32.mrb[2].mxu0  ;;  %v2084_v17 = vpop.f32.mrb[2].mxu1 }
 0x1d8   :  { %v6879_v18 = vadd.f32 %v1872_v16, %v298_v10  ;;  %v6881_v19 = vadd.f32 %v2084_v17, %v306_v11  ;;  %v1874_v20 = vpop.f32.mrb[3].mxu0  ;;  %v2086_v21 = vpop.f32.mrb[3].mxu1 }
 0x1d9   :  { %v6883_v22 = vadd.f32 %v1874_v20, %v302_v14  ;;  %v6885_v23 = vadd.f32 %v2086_v21, %v310_v15  ;;  %v6903_v21 = vadd.f32 %v1868_v8, %v298_v10 }
 0x1dd   :  { %v1878_v24 = vpop.f32.mrb[4].mxu0  ;;  %v2090_v26 = vpop.f32.mrb[4].mxu1 }
 0x1de   :  { %v6887_v28 = vadd.f32 %v1878_v24, %v298_v10  ;;  %v6889_v29 = vadd.f32 %v2090_v26, %v306_v11  ;;  %v1880_v30 = vpop.f32.mrb[5].mxu0  ;;  %v2092_v31 = vpop.f32.mrb[5].mxu1  ;;  %v6905_v24 = vadd.f32 %v1870_v12, %v302_v14 }
 0x1df   :  { %v6891_v36 = vadd.f32 %v1880_v30, %v302_v14  ;;  %v6893_v41 = vadd.f32 %v2092_v31, %v310_v15  ;;  %v1882_v1 = vpop.f32.mrb[6].mxu0  ;;  %v2094_v2 = vpop.f32.mrb[6].mxu1 }
 0x1e0   :  { %v6895_v4 = vadd.f32 %v1882_v1, %v298_v10  ;;  %v6897_v5 = vadd.f32 %v2094_v2, %v306_v11  ;;  %v1884_v7 = vpop.f32.mrb[7].mxu0  ;;  %v2096_v16 = vpop.f32.mrb[7].mxu1  ;;  %v6912_v10 = vadd.f32 %v2080_v9, %v306_v11 }
 0x1e1   :  { %v6899_v17 = vadd.f32 %v1884_v7, %v302_v14  ;;  %v6901_v20 = vadd.f32 %v2096_v16, %v310_v15 }
 0x1e2   :  { %7688 = vst [vmem:[#allocation5_spill] sm:$0xff] %v6895_v4  ;;  %7689 = vst [vmem:[#allocation6_spill] sm:$0xff] %v6897_v5  ;;  %v6909_v5 = vadd.f32 %v2082_v13, %v310_v15 }
 0x1e3   :  { %7690 = vst [vmem:[#allocation7_spill] sm:$0xff] %v6899_v17  ;;  %7691 = vst [vmem:[#allocation8_spill] sm:$0xff] %v6901_v20 }
 0x1f5   :  { %v2325_v26 = vpop.f32.mrb[8].mxu0  ;;  %v2366_v30 = vpop.f32.mrb[8].mxu1 }
 0x1f6   :  { %v2373_v31 = vadd.f32 %v6903_v21, %v2325_v26  ;;  %v2327_v50 = vpop.f32.mrb[9].mxu0  ;;  %v2368_v6 = vpop.f32.mrb[9].mxu1  ;;  %v2375_v12 = vadd.f32 %v6912_v10, %v2366_v30 }
 0x1f7   :  { %v2374_v1 = vadd.f32 %v6905_v24, %v2327_v50  ;;  %v2329_v2 = vpop.f32.mrb[10].mxu0  ;;  %v2370_v3 = vpop.f32.mrb[10].mxu1  ;;  %v2376_v8 = vadd.f32 %v6909_v5, %v2368_v6 }
 0x1f8   :  { %v2377_v7 = vmul.f32 0.5, %v2373_v31  ;;  %v2330_v17 = vpop.f32.mrb[11].mxu0  ;;  %v2371_v16 = vpop.f32.mrb[11].mxu1  ;;  %v2379_v14 = vmul.f32 0.5, %v2375_v12  ;;  %v7692_v12 = vmov 0  }
 0x1f9   :  { %v2378_v20 = vmul.f32 0.5, %v2374_v1 }
 0x1fa   :  { %5613 = vtanh.f32 %v2377_v7 }
 0x1fb   :  { %5615 = vtanh.f32 %v2378_v20 }
 0x1fc   :  { %5617 = vtanh.f32 %v2376_v8 }
 0x1fd   :  { %5619 = vtanh.f32 %v2379_v14 }
 0x204   :  { %v5614_v26 = vpop.eup %5613 }
 0x205   :  { %v2383_v50 = vadd.f32 1.0, %v5614_v26  ;;  %v5616_v2 = vpop.eup %5615 }
 0x206   :  { %v2384_v13 = vadd.f32 1.0, %v5616_v2  ;;  %v5618_v15 = vpop.eup %5617 }
 0x207   :  { %v2386_v3 = vmul.f32 0.5, %v2383_v50  ;;  %v5620_v6 = vpop.eup %5619 }
 0x208   :  { %v2387_v17 = vmul.f32 0.5, %v2384_v13  ;;  %v2385_v9 = vadd.f32 1.0, %v5620_v6 }
 0x209   :  { %v2391_v31 = vmul.f32 %v5618_v15, %v2386_v3 }
 0x20a   :  { %v2390_v1 = vmul.f32 0.0, %v2387_v17  ;;  %v2388_v11 = vmul.f32 0.5, %v2385_v9 }
 0x20c   :  { %v6915_v7 = vadd.f32 %v2391_v31, %v2390_v1 }
 0x20e   :  { %5621 = vtanh.f32 %v6915_v7 }
 0x218   :  { %v5622_v20 = vpop.eup %5621 }
 0x219   :  { %v2394_v30 = vmul.f32 %v5622_v20, %v2388_v11 }
 0x21b   :  { %2395 = vst [vmem:[#allocation2] sm:$0x3] %v2394_v30  ;;  %v2397_v16 = vrot.slane %v2394_v30, 2  ;;  %v2400_v8 = vpack.c.bf16 %v2394_v30, %v2394_v30 }
 0x21d   :  { %2399 = vst [vmem:[#allocation2 + $0x8] sm:$0x3] %v2397_v16  ;;  %2434 = vmatmul.mubr.bf16.vlgmr.msra.gmra.mrb[12].mxu0 %v2400_v8  ;;  %2475 = vmatmul.mubr.bf16.vlgmr.msra.gmra.mrb[12].mxu1 %v2400_v8 }
 0x21e   :  { %2532 = vmatpush1.bf16.msra.mxu0 %v6651_v32  ;;  %2573 = vmatpush1.bf16.msra.mxu1 %v6656_v33 }
 0x21f   :  { %2533 = vmatprep.subr.bf16.mxu0 %v6663_v34  ;;  %2574 = vmatprep.subr.bf16.mxu1 %v6668_v35 }
 0x220   :  { %2563 = vmatprep.mubr.bf16.mxu0 %v7692_v12  ;;  %2604 = vmatprep.mubr.bf16.mxu1 %v7692_v12 }
 0x222   :  { %2534 = vmatpush1.bf16.msra.mxu0 %v6675_v37  ;;  %2575 = vmatpush1.bf16.msra.mxu1 %v6680_v38 }
 0x223   :  { %2535 = vmatprep.subr.bf16.mxu0 %v6687_v39  ;;  %2576 = vmatprep.subr.bf16.mxu1 %v6692_v40 }
 0x226   :  { %2536 = vmatpush1.bf16.msra.mxu0 %v6699_v42  ;;  %2577 = vmatpush1.bf16.msra.mxu1 %v6704_v43 }
 0x227   :  { %2537 = vmatprep.subr.bf16.mxu0 %v6711_v44  ;;  %2578 = vmatprep.subr.bf16.mxu1 %v6716_v45 }
 0x22a   :  { %2538 = vmatpush1.bf16.msra.mxu0 %v6723_v46  ;;  %2579 = vmatpush1.bf16.msra.mxu1 %v6728_v47 }
 0x22b   :  { %2539 = vmatprep.subr.bf16.mxu0 %v6735_v48  ;;  %2580 = vmatprep.subr.bf16.mxu1 %v6740_v49 }
 0x22e   :  { %2540 = vmatpush1.bf16.msra.mxu0 %v6749_v51  ;;  %2581 = vmatpush1.bf16.msra.mxu1 %v6754_v52 }
 0x22f   :  { %2541 = vmatprep.subr.bf16.mxu0 %v6761_v53  ;;  %2582 = vmatprep.subr.bf16.mxu1 %v6766_v54 }
 0x232   :  { %2542 = vmatpush1.bf16.msra.mxu0 %v6773_v55  ;;  %2583 = vmatpush1.bf16.msra.mxu1 %v6778_v56 }
 0x233   :  { %2543 = vmatprep.subr.bf16.mxu0 %v6785_v57  ;;  %2584 = vmatprep.subr.bf16.mxu1 %v6790_v58 }
 0x236   :  { %2544 = vmatpush1.bf16.msra.mxu0 %v6797_v59  ;;  %2585 = vmatpush1.bf16.msra.mxu1 %v6802_v60 }
 0x237   :  { %2545 = vmatprep.subr.bf16.mxu0 %v6809_v61  ;;  %2586 = vmatprep.subr.bf16.mxu1 %v6814_v62 }
 0x23a   :  { %2546 = vmatpush1.bf16.msra.mxu0 %v6821_v63  ;;  %2587 = vmatpush1.bf16.msra.mxu1 %v6826_v0 }
 0x23b   :  { %2646 = vmatprep.subr.bf16.mxu0 %v6633_v25  ;;  %2687 = vmatprep.subr.bf16.mxu1 %v6638_v27 }
 0x2f0   :  { %v2435_v14 = vpop.f32.mrb[12].mxu0  ;;  %v2476_v26 = vpop.f32.mrb[12].mxu1 }
 0x2f1   :  { %v2487_v50 = vrot.slane %v2435_v14, 4  ;;  %v2437_v2 = vpop.f32.mrb[13].mxu0  ;;  %v2478_v3 = vpop.f32.mrb[13].mxu1  ;;  %v2489_v8 = vrot.slane %v2476_v26, 4 }
 0x2f2   :  { %v2488_v13 = vrot.slane %v2437_v2, 4  ;;  %v2439_v15 = vpop.f32.mrb[14].mxu0  ;;  %v2480_v17 = vpop.f32.mrb[14].mxu1  ;;  %v2490_v1 = vrot.slane %v2478_v3, 4 }
 0x2f3   :  { %v2495_v31 = vadd.f32 %v6903_v21, %v2487_v50  ;;  %v2440_v6 = vpop.f32.mrb[15].mxu0  ;;  %v2481_v9 = vpop.f32.mrb[15].mxu1  ;;  %v2497_v14 = vadd.f32 %v6912_v10, %v2489_v8 }
 0x2f4   :  { %v2496_v11 = vadd.f32 %v6905_v24, %v2488_v13  ;;  %v2498_v16 = vadd.f32 %v6909_v5, %v2490_v1  ;;  %v2513_v24 = vrot.slane %v6915_v7, 4 }
 0x2f5   :  { %v2499_v20 = vmul.f32 0.5, %v2495_v31  ;;  %v2501_v2 = vmul.f32 0.5, %v2497_v14 }
 0x2f6   :  { %v2500_v30 = vmul.f32 0.5, %v2496_v11 }
 0x2f7   :  { %5623 = vtanh.f32 %v2499_v20 }
 0x2f8   :  { %5625 = vtanh.f32 %v2500_v30 }
 0x2f9   :  { %5627 = vtanh.f32 %v2498_v16 }
 0x2fa   :  { %5629 = vtanh.f32 %v2501_v2 }
 0x301   :  { %v5624_v15 = vpop.eup %5623 }
 0x302   :  { %v2505_v17 = vadd.f32 1.0, %v5624_v15  ;;  %v5626_v4 = vpop.eup %5625 }
 0x303   :  { %v2506_v50 = vadd.f32 1.0, %v5626_v4  ;;  %v5628_v3 = vpop.eup %5627 }
 0x304   :  { %v2508_v21 = vmul.f32 0.5, %v2505_v17  ;;  %v5630_v5 = vpop.eup %5629 }
 0x305   :  { %v2509_v6 = vmul.f32 0.5, %v2506_v50  ;;  %v2507_v26 = vadd.f32 1.0, %v5630_v5 }
 0x306   :  { %v2516_v13 = vmul.f32 %v5628_v3, %v2508_v21 }
 0x307   :  { %v2515_v31 = vmul.f32 %v2513_v24, %v2509_v6  ;;  %v2510_v10 = vmul.f32 0.5, %v2507_v26 }
 0x309   :  { %v6957_v9 = vadd.f32 %v2516_v13, %v2515_v31 }
 0x30b   :  { %5631 = vtanh.f32 %v6957_v9 }
 0x315   :  { %v5632_v1 = vpop.eup %5631 }
 0x316   :  { %v2519_v11 = vmul.f32 %v5632_v1, %v2510_v10 }
 0x318   :  { %v2521_v20 = vrot.slane %v2519_v11, 2  ;;  %v2524_v30 = vrot.slane %v2519_v11, 4  ;;  %v2527_v16 = vpack.c.bf16 %v2519_v11, %v2519_v11 }
 0x31a   :  { %2523 = vst [vmem:[#allocation2] sm:$0xc] %v2521_v20  ;;  %2526 = vst [vmem:[#allocation2 + $0x8] sm:$0xc] %v2524_v30  ;;  %v2529_v4 = vrot.slane %v2527_v16, 2 }
 0x31c   :  { %2564 = vmatmul.mubr.bf16.vlgmr.msra.gmra.mrb[16].mxu0 %v2529_v4  ;;  %2605 = vmatmul.mubr.bf16.vlgmr.msra.gmra.mrb[16].mxu1 %v2529_v4 }
 0x31d   :  { %2647 = vmatpush1.bf16.msra.mxu0 %v6651_v32  ;;  %2688 = vmatpush1.bf16.msra.mxu1 %v6656_v33 }
 0x31e   :  { %2648 = vmatprep.subr.bf16.mxu0 %v6663_v34  ;;  %2689 = vmatprep.subr.bf16.mxu1 %v6668_v35 }
 0x31f   :  { %2678 = vmatprep.mubr.bf16.mxu0 %v7692_v12  ;;  %2719 = vmatprep.mubr.bf16.mxu1 %v7692_v12 }
 0x321   :  { %2649 = vmatpush1.bf16.msra.mxu0 %v6675_v37  ;;  %2690 = vmatpush1.bf16.msra.mxu1 %v6680_v38 }
 0x322   :  { %2650 = vmatprep.subr.bf16.mxu0 %v6687_v39  ;;  %2691 = vmatprep.subr.bf16.mxu1 %v6692_v40 }
 0x325   :  { %2651 = vmatpush1.bf16.msra.mxu0 %v6699_v42  ;;  %2692 = vmatpush1.bf16.msra.mxu1 %v6704_v43 }
 0x326   :  { %2652 = vmatprep.subr.bf16.mxu0 %v6711_v44  ;;  %2693 = vmatprep.subr.bf16.mxu1 %v6716_v45 }
 0x329   :  { %2653 = vmatpush1.bf16.msra.mxu0 %v6723_v46  ;;  %2694 = vmatpush1.bf16.msra.mxu1 %v6728_v47 }
 0x32a   :  { %2654 = vmatprep.subr.bf16.mxu0 %v6735_v48  ;;  %2695 = vmatprep.subr.bf16.mxu1 %v6740_v49 }
 0x32d   :  { %2655 = vmatpush1.bf16.msra.mxu0 %v6749_v51  ;;  %2696 = vmatpush1.bf16.msra.mxu1 %v6754_v52 }
 0x32e   :  { %2656 = vmatprep.subr.bf16.mxu0 %v6761_v53  ;;  %2697 = vmatprep.subr.bf16.mxu1 %v6766_v54 }
 0x331   :  { %2657 = vmatpush1.bf16.msra.mxu0 %v6773_v55  ;;  %2698 = vmatpush1.bf16.msra.mxu1 %v6778_v56 }
 0x332   :  { %2658 = vmatprep.subr.bf16.mxu0 %v6785_v57  ;;  %2699 = vmatprep.subr.bf16.mxu1 %v6790_v58 }
 0x335   :  { %2659 = vmatpush1.bf16.msra.mxu0 %v6797_v59  ;;  %2700 = vmatpush1.bf16.msra.mxu1 %v6802_v60 }
 0x336   :  { %2660 = vmatprep.subr.bf16.mxu0 %v6809_v61  ;;  %2701 = vmatprep.subr.bf16.mxu1 %v6814_v62 }
 0x339   :  { %2661 = vmatpush1.bf16.msra.mxu0 %v6821_v63  ;;  %2702 = vmatpush1.bf16.msra.mxu1 %v6826_v0 }
 0x33a   :  { %2774 = vmatprep.subr.bf16.mxu0 %v6633_v25  ;;  %2815 = vmatprep.subr.bf16.mxu1 %v6638_v27 }
 0x3ef   :  { %v2565_v7 = vpop.f32.mrb[16].mxu0  ;;  %v2606_v8 = vpop.f32.mrb[16].mxu1 }
 0x3f0   :  { %v2613_v14 = vadd.f32 %v6879_v18, %v2565_v7  ;;  %v2567_v2 = vpop.f32.mrb[17].mxu0  ;;  %v2608_v15 = vpop.f32.mrb[17].mxu1  ;;  %v2615_v5 = vadd.f32 %v6881_v19, %v2606_v8  ;;  %v2631_v7 = vrot.slane %v6957_v9, 4 }
 0x3f1   :  { %v2614_v17 = vadd.f32 %v6883_v22, %v2567_v2  ;;  %v2569_v21 = vpop.f32.mrb[18].mxu0  ;;  %v2610_v50 = vpop.f32.mrb[18].mxu1  ;;  %v2616_v31 = vadd.f32 %v6885_v23, %v2608_v15 }
 0x3f2   :  { %v2617_v3 = vmul.f32 0.5, %v2613_v14  ;;  %v2570_v6 = vpop.f32.mrb[19].mxu0  ;;  %v2611_v24 = vpop.f32.mrb[19].mxu1  ;;  %v2619_v26 = vmul.f32 0.5, %v2615_v5 }
 0x3f3   :  { %v2618_v13 = vmul.f32 0.5, %v2614_v17 }
 0x3f4   :  { %5633 = vtanh.f32 %v2617_v3 }
 0x3f5   :  { %5635 = vtanh.f32 %v2618_v13 }
 0x3f6   :  { %5637 = vtanh.f32 %v2616_v31 }
 0x3f7   :  { %5639 = vtanh.f32 %v2619_v26 }
 0x3fe   :  { %v5634_v10 = vpop.eup %5633 }
 0x3ff   :  { %v2623_v1 = vadd.f32 1.0, %v5634_v10  ;;  %v5636_v11 = vpop.eup %5635 }
 0x400   :  { %v2624_v30 = vadd.f32 1.0, %v5636_v11  ;;  %v5638_v16 = vpop.eup %5637 }
 0x401   :  { %v2626_v20 = vmul.f32 0.5, %v2623_v1  ;;  %v5640_v15 = vpop.eup %5639 }
 0x402   :  { %v2627_v4 = vmul.f32 0.5, %v2624_v30  ;;  %v2625_v21 = vadd.f32 1.0, %v5640_v15 }
 0x403   :  { %v2634_v14 = vmul.f32 %v5638_v16, %v2626_v20 }
 0x404   :  { %v2633_v2 = vmul.f32 %v2631_v7, %v2627_v4  ;;  %v2628_v8 = vmul.f32 0.5, %v2625_v21 }
 0x406   :  { %v6999_v17 = vadd.f32 %v2634_v14, %v2633_v2 }
 0x408   :  { %5641 = vtanh.f32 %v6999_v17 }
 0x412   :  { %v5642_v50 = vpop.eup %5641 }
 0x413   :  { %v2637_v3 = vmul.f32 %v5642_v50, %v2628_v8 }
 0x415   :  { %v2639_v6 = vrot.slane %v2637_v3, 4  ;;  %v2642_v24 = vrot.slane %v2637_v3, 6  ;;  %v2645_v13 = vpack.c.bf16 %v2637_v3, %v2637_v3 }
 0x417   :  { %2641 = vst [vmem:[#allocation2] sm:$0x30] %v2639_v6  ;;  %2644 = vst [vmem:[#allocation2 + $0x8] sm:$0x30] %v2642_v24  ;;  %2679 = vmatmul.mubr.bf16.vlgmr.msra.gmra.mrb[20].mxu0 %v2645_v13  ;;  %2720 = vmatmul.mubr.bf16.vlgmr.msra.gmra.mrb[20].mxu1 %v2645_v13 }
 0x418   :  { %2775 = vmatpush1.bf16.msra.mxu0 %v6651_v32  ;;  %2816 = vmatpush1.bf16.msra.mxu1 %v6656_v33 }
 0x419   :  { %2776 = vmatprep.subr.bf16.mxu0 %v6663_v34  ;;  %2817 = vmatprep.subr.bf16.mxu1 %v6668_v35 }
 0x41a   :  { %2806 = vmatprep.mubr.bf16.mxu0 %v7692_v12  ;;  %2847 = vmatprep.mubr.bf16.mxu1 %v7692_v12 }
 0x41c   :  { %2777 = vmatpush1.bf16.msra.mxu0 %v6675_v37  ;;  %2818 = vmatpush1.bf16.msra.mxu1 %v6680_v38 }
 0x41d   :  { %2778 = vmatprep.subr.bf16.mxu0 %v6687_v39  ;;  %2819 = vmatprep.subr.bf16.mxu1 %v6692_v40 }
 0x420   :  { %2779 = vmatpush1.bf16.msra.mxu0 %v6699_v42  ;;  %2820 = vmatpush1.bf16.msra.mxu1 %v6704_v43 }
 0x421   :  { %2780 = vmatprep.subr.bf16.mxu0 %v6711_v44  ;;  %2821 = vmatprep.subr.bf16.mxu1 %v6716_v45 }
 0x424   :  { %2781 = vmatpush1.bf16.msra.mxu0 %v6723_v46  ;;  %2822 = vmatpush1.bf16.msra.mxu1 %v6728_v47 }
 0x425   :  { %2782 = vmatprep.subr.bf16.mxu0 %v6735_v48  ;;  %2823 = vmatprep.subr.bf16.mxu1 %v6740_v49 }
 0x428   :  { %2783 = vmatpush1.bf16.msra.mxu0 %v6749_v51  ;;  %2824 = vmatpush1.bf16.msra.mxu1 %v6754_v52 }
 0x429   :  { %2784 = vmatprep.subr.bf16.mxu0 %v6761_v53  ;;  %2825 = vmatprep.subr.bf16.mxu1 %v6766_v54 }
 0x42c   :  { %2785 = vmatpush1.bf16.msra.mxu0 %v6773_v55  ;;  %2826 = vmatpush1.bf16.msra.mxu1 %v6778_v56 }
 0x42d   :  { %2786 = vmatprep.subr.bf16.mxu0 %v6785_v57  ;;  %2827 = vmatprep.subr.bf16.mxu1 %v6790_v58 }
 0x430   :  { %2787 = vmatpush1.bf16.msra.mxu0 %v6797_v59  ;;  %2828 = vmatpush1.bf16.msra.mxu1 %v6802_v60 }
 0x431   :  { %2788 = vmatprep.subr.bf16.mxu0 %v6809_v61  ;;  %2829 = vmatprep.subr.bf16.mxu1 %v6814_v62 }
 0x434   :  { %2789 = vmatpush1.bf16.msra.mxu0 %v6821_v63  ;;  %2830 = vmatpush1.bf16.msra.mxu1 %v6826_v0 }
 0x435   :  { %2887 = vmatprep.subr.bf16.mxu0 %v6633_v25  ;;  %2928 = vmatprep.subr.bf16.mxu1 %v6638_v27 }
 0x4ea   :  { %v2680_v9 = vpop.f32.mrb[20].mxu0  ;;  %v2721_v31 = vpop.f32.mrb[20].mxu1 }
 0x4eb   :  { %v2732_v5 = vrot.slane %v2680_v9, 4  ;;  %v2682_v26 = vpop.f32.mrb[21].mxu0  ;;  %v2723_v10 = vpop.f32.mrb[21].mxu1  ;;  %v2734_v8 = vrot.slane %v2721_v31, 4 }
 0x4ec   :  { %v2733_v1 = vrot.slane %v2682_v26, 4  ;;  %v2684_v11 = vpop.f32.mrb[22].mxu0  ;;  %v2725_v20 = vpop.f32.mrb[22].mxu1  ;;  %v2735_v16 = vrot.slane %v2723_v10, 4 }
 0x4ed   :  { %v2740_v30 = vadd.f32 %v6879_v18, %v2732_v5  ;;  %v2685_v4 = vpop.f32.mrb[23].mxu0  ;;  %v2726_v7 = vpop.f32.mrb[23].mxu1  ;;  %v2742_v50 = vadd.f32 %v6881_v19, %v2734_v8 }
 0x4ee   :  { %v2741_v14 = vadd.f32 %v6883_v22, %v2733_v1  ;;  %v2743_v21 = vadd.f32 %v6885_v23, %v2735_v16  ;;  %v2758_v22 = vrot.slane %v6999_v17, 4 }
 0x4ef   :  { %v2744_v2 = vmul.f32 0.5, %v2740_v30  ;;  %v2746_v3 = vmul.f32 0.5, %v2742_v50 }
 0x4f0   :  { %v2745_v15 = vmul.f32 0.5, %v2741_v14 }
 0x4f1   :  { %5643 = vtanh.f32 %v2744_v2 }
 0x4f2   :  { %5645 = vtanh.f32 %v2745_v15 }
 0x4f3   :  { %5647 = vtanh.f32 %v2743_v21 }
 0x4f4   :  { %5649 = vtanh.f32 %v2746_v3 }
 0x4fb   :  { %v5644_v6 = vpop.eup %5643 }
 0x4fc   :  { %v2750_v24 = vadd.f32 1.0, %v5644_v6  ;;  %v5646_v13 = vpop.eup %5645 }
 0x4fd   :  { %v2751_v9 = vadd.f32 1.0, %v5646_v13  ;;  %v5648_v5 = vpop.eup %5647 }
 0x4fe   :  { %v2753_v18 = vmul.f32 0.5, %v2750_v24  ;;  %v5650_v23 = vpop.eup %5649 }
 0x4ff   :  { %v2754_v26 = vmul.f32 0.5, %v2751_v9  ;;  %v2752_v31 = vadd.f32 1.0, %v5650_v23 }
 0x500   :  { %v2761_v10 = vmul.f32 %v5648_v5, %v2753_v18 }
 0x501   :  { %v2760_v1 = vmul.f32 %v2758_v22, %v2754_v26  ;;  %v2755_v19 = vmul.f32 0.5, %v2752_v31 }
 0x503   :  { %v7041_v11 = vadd.f32 %v2761_v10, %v2760_v1 }
 0x505   :  { %5651 = vtanh.f32 %v7041_v11  ;;  %v2874_v23 = vrot.slane %v7041_v11, 4  ;;  %v7089_v11 = vld [vmem:[%s7672_s2] ss:$16 sps:$4 sm:$0xff]  }
 0x50f   :  { %v5652_v20 = vpop.eup %5651 }
 0x510   :  { %v2764_v30 = vmul.f32 %v5652_v20, %v2755_v19 }
 0x512   :  { %v2766_v16 = vrot.slane %v2764_v30, 6  ;;  %2769 = vst [vmem:[#allocation2 + $0x8] sm:$0xc0] %v2764_v30  ;;  %v2770_v4 = vpack.c.bf16 %v2764_v30, %v2764_v30 }
 0x514   :  { %2768 = vst [vmem:[#allocation2] sm:$0xc0] %v2766_v16  ;;  %v2772_v7 = vrot.slane %v2770_v4, 2 }
 0x516   :  { %2807 = vmatmul.mubr.bf16.vlgmr.msra.gmra.mrb[24].mxu0 %v2772_v7  ;;  %2848 = vmatmul.mubr.bf16.vlgmr.msra.gmra.mrb[24].mxu1 %v2772_v7 }
 0x517   :  { %2888 = vmatpush1.bf16.msra.mxu0 %v6651_v32  ;;  %2929 = vmatpush1.bf16.msra.mxu1 %v6656_v33 }
 0x518   :  { %2889 = vmatprep.subr.bf16.mxu0 %v6663_v34  ;;  %2930 = vmatprep.subr.bf16.mxu1 %v6668_v35 }
 0x519   :  { %2919 = vmatprep.mubr.bf16.mxu0 %v7692_v12  ;;  %2960 = vmatprep.mubr.bf16.mxu1 %v7692_v12 }
 0x51b   :  { %2890 = vmatpush1.bf16.msra.mxu0 %v6675_v37  ;;  %2931 = vmatpush1.bf16.msra.mxu1 %v6680_v38 }
 0x51c   :  { %2891 = vmatprep.subr.bf16.mxu0 %v6687_v39  ;;  %2932 = vmatprep.subr.bf16.mxu1 %v6692_v40 }
 0x51f   :  { %2892 = vmatpush1.bf16.msra.mxu0 %v6699_v42  ;;  %2933 = vmatpush1.bf16.msra.mxu1 %v6704_v43 }
 0x520   :  { %2893 = vmatprep.subr.bf16.mxu0 %v6711_v44  ;;  %2934 = vmatprep.subr.bf16.mxu1 %v6716_v45 }
 0x523   :  { %2894 = vmatpush1.bf16.msra.mxu0 %v6723_v46  ;;  %2935 = vmatpush1.bf16.msra.mxu1 %v6728_v47 }
 0x524   :  { %2895 = vmatprep.subr.bf16.mxu0 %v6735_v48  ;;  %2936 = vmatprep.subr.bf16.mxu1 %v6740_v49 }
 0x527   :  { %2896 = vmatpush1.bf16.msra.mxu0 %v6749_v51  ;;  %2937 = vmatpush1.bf16.msra.mxu1 %v6754_v52 }
 0x528   :  { %2897 = vmatprep.subr.bf16.mxu0 %v6761_v53  ;;  %2938 = vmatprep.subr.bf16.mxu1 %v6766_v54 }
 0x52b   :  { %2898 = vmatpush1.bf16.msra.mxu0 %v6773_v55  ;;  %2939 = vmatpush1.bf16.msra.mxu1 %v6778_v56 }
 0x52c   :  { %2899 = vmatprep.subr.bf16.mxu0 %v6785_v57  ;;  %2940 = vmatprep.subr.bf16.mxu1 %v6790_v58 }
 0x52f   :  { %2900 = vmatpush1.bf16.msra.mxu0 %v6797_v59  ;;  %2941 = vmatpush1.bf16.msra.mxu1 %v6802_v60 }
 0x530   :  { %2901 = vmatprep.subr.bf16.mxu0 %v6809_v61  ;;  %2942 = vmatprep.subr.bf16.mxu1 %v6814_v62 }
 0x533   :  { %2902 = vmatpush1.bf16.msra.mxu0 %v6821_v63  ;;  %2943 = vmatpush1.bf16.msra.mxu1 %v6826_v0 }
 0x534   :  { %3017 = vmatprep.subr.bf16.mxu0 %v6633_v25  ;;  %3058 = vmatprep.subr.bf16.mxu1 %v6638_v27 }
 0x5e9   :  { %v2808_v32 = vpop.f32.mrb[24].mxu0  ;;  %v2849_v33 = vpop.f32.mrb[24].mxu1 }
 0x5ea   :  { %v2856_v17 = vadd.f32 %v6887_v28, %v2808_v32  ;;  %v2810_v14 = vpop.f32.mrb[25].mxu0  ;;  %v2851_v2 = vpop.f32.mrb[25].mxu1  ;;  %v2858_v25 = vadd.f32 %v6889_v29, %v2849_v33 }
 0x5eb   :  { %v2857_v15 = vadd.f32 %v6891_v36, %v2810_v14  ;;  %v2812_v21 = vpop.f32.mrb[26].mxu0  ;;  %v2853_v8 = vpop.f32.mrb[26].mxu1  ;;  %v2859_v13 = vadd.f32 %v6893_v41, %v2851_v2  ;;  %v7095_v14 = vld [vmem:[%s7672_s2 + $0x8] ss:$16 sps:$4 sm:$0xff]  }
 0x5ec   :  { %v2860_v50 = vmul.f32 0.5, %v2856_v17  ;;  %v2813_v3 = vpop.f32.mrb[27].mxu0  ;;  %v2854_v6 = vpop.f32.mrb[27].mxu1  ;;  %v2862_v27 = vmul.f32 0.5, %v2858_v25  ;;  %v5739_v25 = vld [vmem:[%s7672_s2 + $0x24] ss:$16 sps:$4 sm:$0xff]  }
 0x5ed   :  { %v2861_v24 = vmul.f32 0.5, %v2857_v15 }
 0x5ee   :  { %5653 = vtanh.f32 %v2860_v50 }
 0x5ef   :  { %5655 = vtanh.f32 %v2861_v24 }
 0x5f0   :  { %5657 = vtanh.f32 %v2859_v13 }
 0x5f1   :  { %5659 = vtanh.f32 %v2862_v27  ;;  %v5740_v27 = vld [vmem:[%s7672_s2 + $0x2c] ss:$16 sps:$4 sm:$0xff]  }
 0x5f8   :  { %v5654_v18 = vpop.eup %5653 }
 0x5f9   :  { %v2866_v9 = vadd.f32 1.0, %v5654_v18  ;;  %v5656_v5 = vpop.eup %5655  ;;  %v5741_v18 = vld [vmem:[%s7672_s2 + $0x20] ss:$16 sps:$4 sm:$0xff]  }
 0x5fa   :  { %v2867_v22 = vadd.f32 1.0, %v5656_v5  ;;  %v5658_v10 = vpop.eup %5657  ;;  %v5743_v5 = vld [vmem:[%s7672_s2 + $0x44] ss:$16 sps:$4 sm:$0xff]  }
 0x5fb   :  { %v2869_v26 = vmul.f32 0.5, %v2866_v9  ;;  %v5660_v30 = vpop.eup %5659  ;;  %v5742_v9 = vld [vmem:[%s7672_s2 + $0x28] ss:$16 sps:$4 sm:$0xff]  }
 0x5fc   :  { %v2870_v1 = vmul.f32 0.5, %v2867_v22  ;;  %v2868_v16 = vadd.f32 1.0, %v5660_v30  ;;  %v5746_v22 = vld [vmem:[%s7672_s2 + $0x48] ss:$16 sps:$4 sm:$0xff]   ;;  %v5753_v30 = vld [vmem:[%s7672_s2 + $0x80] ss:$16 sps:$4 sm:$0xff]  }
 0x5fd   :  { %v2877_v31 = vmul.f32 %v5658_v10, %v2869_v26  ;;  %v5744_v26 = vld [vmem:[%s7672_s2 + $0x4c] ss:$16 sps:$4 sm:$0xff]   ;;  %v5747_v10 = vld [vmem:[%s7672_s2 + $0x64] ss:$16 sps:$4 sm:$0xff]  }
 0x5fe   :  { %v2876_v19 = vmul.f32 %v2874_v23, %v2870_v1  ;;  %v2871_v4 = vmul.f32 0.5, %v2868_v16  ;;  %v5748_v1 = vld [vmem:[%s7672_s2 + $0x6c] ss:$16 sps:$4 sm:$0xff]   ;;  %v5749_v23 = vld [vmem:[%s7672_s2 + $0x60] ss:$16 sps:$4 sm:$0xff]  }
 0x5ff   :  { %v5754_v16 = vld [vmem:[%s7672_s2 + $0x88] ss:$16 sps:$4 sm:$0xff]  }
 0x600   :  { %v7083_v20 = vadd.f32 %v2877_v31, %v2876_v19  ;;  %v5750_v31 = vld [vmem:[%s7672_s2 + $0x68] ss:$16 sps:$4 sm:$0xff]   ;;  %v5751_v19 = vld [vmem:[%s7672_s2 + $0x84] ss:$16 sps:$4 sm:$0xff]  }
 0x602   :  { %5661 = vtanh.f32 %v7083_v20 }
 0x60c   :  { %v5662_v7 = vpop.eup %5661 }
 0x60d   :  { %v2880_v32 = vmul.f32 %v5662_v7, %v2871_v4  ;;  %v5755_v4 = vld [vmem:[%s7672_s2 + $0xa4] ss:$16 sps:$4 sm:$0xff]   ;;  %v5756_v7 = vld [vmem:[%s7672_s2 + $0xac] ss:$16 sps:$4 sm:$0xff]  }
 0x60f   :  { %2881 = vst [vmem:[#allocation2 + $0x10] sm:$0x3] %v2880_v32  ;;  %v2883_v33 = vrot.slane %v2880_v32, 2  ;;  %v2886_v17 = vpack.c.bf16 %v2880_v32, %v2880_v32  ;;  %v5757_v32 = vld [vmem:[%s7672_s2 + $0xa0] ss:$16 sps:$4 sm:$0xff]  }
 0x611   :  { %2885 = vst [vmem:[#allocation2 + $0x18] sm:$0x3] %v2883_v33  ;;  %2920 = vmatmul.mubr.bf16.vlgmr.msra.gmra.mrb[28].mxu0 %v2886_v17  ;;  %2961 = vmatmul.mubr.bf16.vlgmr.msra.gmra.mrb[28].mxu1 %v2886_v17  ;;  %v5758_v33 = vld [vmem:[%s7672_s2 + $0xa8] ss:$16 sps:$4 sm:$0xff]   ;;  %v5759_v17 = vld [vmem:[%s7672_s2 + $0xc4] ss:$16 sps:$4 sm:$0xff]  }
 0x612   :  { %3018 = vmatpush1.bf16.msra.mxu0 %v7089_v11  ;;  %3059 = vmatpush1.bf16.msra.mxu1 %v7095_v14 }
 0x613   :  { %3019 = vmatprep.subr.bf16.mxu0 %v6663_v34  ;;  %3060 = vmatprep.subr.bf16.mxu1 %v6668_v35  ;;  %v5737_v34 = vld [vmem:[%s7672_s2 + $0x4] ss:$16 sps:$4 sm:$0xff]   ;;  %v5738_v35 = vld [vmem:[%s7672_s2 + $0xc] ss:$16 sps:$4 sm:$0xff]  }
 0x614   :  { %3049 = vmatprep.mubr.bf16.mxu0 %v7692_v12  ;;  %3090 = vmatprep.mubr.bf16.mxu1 %v7692_v12 }
 0x616   :  { %3020 = vmatpush1.bf16.msra.mxu0 %v6675_v37  ;;  %3061 = vmatpush1.bf16.msra.mxu1 %v6680_v38 }
 0x617   :  { %3021 = vmatprep.subr.bf16.mxu0 %v6687_v39  ;;  %3062 = vmatprep.subr.bf16.mxu1 %v6692_v40 }
 0x61a   :  { %3022 = vmatpush1.bf16.msra.mxu0 %v6699_v42  ;;  %3063 = vmatpush1.bf16.msra.mxu1 %v6704_v43 }
 0x61b   :  { %3023 = vmatprep.subr.bf16.mxu0 %v6711_v44  ;;  %3064 = vmatprep.subr.bf16.mxu1 %v6716_v45 }
 0x61e   :  { %3024 = vmatpush1.bf16.msra.mxu0 %v6723_v46  ;;  %3065 = vmatpush1.bf16.msra.mxu1 %v6728_v47 }
 0x61f   :  { %3025 = vmatprep.subr.bf16.mxu0 %v6735_v48  ;;  %3066 = vmatprep.subr.bf16.mxu1 %v6740_v49 }
 0x622   :  { %3026 = vmatpush1.bf16.msra.mxu0 %v6749_v51  ;;  %3067 = vmatpush1.bf16.msra.mxu1 %v6754_v52 }
 0x623   :  { %3027 = vmatprep.subr.bf16.mxu0 %v6761_v53  ;;  %3068 = vmatprep.subr.bf16.mxu1 %v6766_v54 }
 0x626   :  { %3028 = vmatpush1.bf16.msra.mxu0 %v6773_v55  ;;  %3069 = vmatpush1.bf16.msra.mxu1 %v6778_v56 }
 0x627   :  { %3029 = vmatprep.subr.bf16.mxu0 %v6785_v57  ;;  %3070 = vmatprep.subr.bf16.mxu1 %v6790_v58 }
 0x62a   :  { %3030 = vmatpush1.bf16.msra.mxu0 %v6797_v59  ;;  %3071 = vmatpush1.bf16.msra.mxu1 %v6802_v60 }
 0x62b   :  { %3031 = vmatprep.subr.bf16.mxu0 %v6809_v61  ;;  %3072 = vmatprep.subr.bf16.mxu1 %v6814_v62 }
 0x62e   :  { %3032 = vmatpush1.bf16.msra.mxu0 %v6821_v63  ;;  %3073 = vmatpush1.bf16.msra.mxu1 %v6826_v0 }
 0x62f   :  { %3132 = vmatprep.subr.bf16.mxu0 %v5737_v34  ;;  %3173 = vmatprep.subr.bf16.mxu1 %v5738_v35  ;;  %v5762_v34 = vld [vmem:[%s7672_s2 + $0xc8] ss:$16 sps:$4 sm:$0xff]   ;;  %v5763_v35 = vld [vmem:[%s7672_s2 + $0xe4] ss:$16 sps:$4 sm:$0xff]  }
 0x6e4   :  { %v2921_v37 = vpop.f32.mrb[28].mxu0  ;;  %v2962_v38 = vpop.f32.mrb[28].mxu1 }
 0x6e5   :  { %v2973_v39 = vrot.slane %v2921_v37, 4  ;;  %v2923_v40 = vpop.f32.mrb[29].mxu0  ;;  %v2964_v42 = vpop.f32.mrb[29].mxu1  ;;  %v2975_v55 = vrot.slane %v2962_v38, 4  ;;  %v5764_v37 = vld [vmem:[%s7672_s2 + $0xec] ss:$16 sps:$4 sm:$0xff]  }
 0x6e6   :  { %v2974_v43 = vrot.slane %v2923_v40, 4  ;;  %v2925_v44 = vpop.f32.mrb[30].mxu0  ;;  %v2966_v45 = vpop.f32.mrb[30].mxu1  ;;  %v2976_v47 = vrot.slane %v2964_v42, 4  ;;  %v5765_v38 = vld [vmem:[%s7672_s2 + $0xe0] ss:$16 sps:$4 sm:$0xff]  }
 0x6e7   :  { %v2981_v46 = vadd.f32 %v6887_v28, %v2973_v39  ;;  %v2926_v48 = vpop.f32.mrb[31].mxu0  ;;  %v2967_v49 = vpop.f32.mrb[31].mxu1  ;;  %v2983_v56 = vadd.f32 %v6889_v29, %v2975_v55  ;;  %v2999_v28 = vrot.slane %v7083_v20, 4  ;;  %v5752_v20 = vld [vmem:[%s7672_s2 + $0x8c] ss:$16 sps:$4 sm:$0xff]   ;;  %v7693_v44 = vld [vmem:[#allocation5_spill] sm:$0xff] }
 0x6e8   :  { %v2982_v51 = vadd.f32 %v6891_v36, %v2974_v43  ;;  %v2984_v54 = vadd.f32 %v6893_v41, %v2976_v47  ;;  %v5766_v39 = vld [vmem:[%s7672_s2 + $0xe8] ss:$16 sps:$4 sm:$0xff]   ;;  %v5423_v40 = vld [vmem:[%s7674_s3 + $0x4] ss:$8 sps:$4 sm:$0xff]  }
 0x6e9   :  { %v2985_v52 = vmul.f32 0.5, %v2981_v46  ;;  %v2987_v57 = vmul.f32 0.5, %v2983_v56  ;;  %v7694_v48 = vld [vmem:[#allocation7_spill] sm:$0xff] }
 0x6ea   :  { %v2986_v53 = vmul.f32 0.5, %v2982_v51 }
 0x6eb   :  { %5663 = vtanh.f32 %v2985_v52 }
 0x6ec   :  { %5665 = vtanh.f32 %v2986_v53 }
 0x6ed   :  { %5667 = vtanh.f32 %v2984_v54 }
 0x6ee   :  { %5669 = vtanh.f32 %v2987_v57  ;;  %v7695_v57 = vld [vmem:[#allocation8_spill] sm:$0xff] }
 0x6f5   :  { %v5664_v58 = vpop.eup %5663 }
 0x6f6   :  { %v2991_v59 = vadd.f32 1.0, %v5664_v58  ;;  %v5666_v60 = vpop.eup %5665 }
 0x6f7   :  { %v2992_v62 = vadd.f32 1.0, %v5666_v60  ;;  %v5668_v63 = vpop.eup %5667 }
 0x6f8   :  { %v2994_v61 = vmul.f32 0.5, %v2991_v59  ;;  %v5670_v41 = vpop.eup %5669  ;;  %v7696_v59 = vld [vmem:[#allocation6_spill] sm:$0xff] }
 0x6f9   :  { %v2995_v0 = vmul.f32 0.5, %v2992_v62  ;;  %v2993_v21 = vadd.f32 1.0, %v5670_v41 }
 0x6fa   :  { %v3002_v36 = vmul.f32 %v5668_v63, %v2994_v61 }
 0x6fb   :  { %v3001_v2 = vmul.f32 %v2999_v28, %v2995_v0  ;;  %v2996_v29 = vmul.f32 0.5, %v2993_v21 }
 0x6fd   :  { %v7139_v15 = vadd.f32 %v3002_v36, %v3001_v2 }
 0x6ff   :  { %5671 = vtanh.f32 %v7139_v15  ;;  %v3117_v21 = vrot.slane %v7139_v15, 4  ;;  %v5426_v15 = vld [vmem:[%s7674_s3 + $0x14] ss:$8 sps:$4 sm:$0xff]  }
 0x709   :  { %v5672_v8 = vpop.eup %5671 }
 0x70a   :  { %v3005_v50 = vmul.f32 %v5672_v8, %v2996_v29 }
 0x70c   :  { %v3007_v3 = vrot.slane %v3005_v50, 2  ;;  %v3010_v6 = vrot.slane %v3005_v50, 4  ;;  %v3013_v24 = vpack.c.bf16 %v3005_v50, %v3005_v50 }
 0x70e   :  { %3009 = vst [vmem:[#allocation2 + $0x10] sm:$0xc] %v3007_v3  ;;  %3012 = vst [vmem:[#allocation2 + $0x18] sm:$0xc] %v3010_v6  ;;  %v3015_v13 = vrot.slane %v3013_v24, 2 }
 0x710   :  { %3050 = vmatmul.mubr.bf16.vlgmr.msra.gmra.mrb[32].mxu0 %v3015_v13  ;;  %3091 = vmatmul.mubr.bf16.vlgmr.msra.gmra.mrb[32].mxu1 %v3015_v13 }
 0x711   :  { %3133 = vmatpush1.bf16.msra.mxu0 %v7089_v11  ;;  %3174 = vmatpush1.bf16.msra.mxu1 %v7095_v14  ;;  %v5760_v11 = vld [vmem:[%s7672_s2 + $0xcc] ss:$16 sps:$4 sm:$0xff]   ;;  %v5761_v14 = vld [vmem:[%s7672_s2 + $0xc0] ss:$16 sps:$4 sm:$0xff]  }
 0x712   :  { %3134 = vmatprep.subr.bf16.mxu0 %v5739_v25  ;;  %3175 = vmatprep.subr.bf16.mxu1 %v5740_v27  ;;  %v5421_v27 = vld [vmem:[%s7674_s3] ss:$8 sps:$4 sm:$0xff]  }
 0x713   :  { %3164 = vmatprep.mubr.bf16.mxu0 %v7692_v12  ;;  %3205 = vmatprep.mubr.bf16.mxu1 %v7692_v12  ;;  %v5745_v12 = vld [vmem:[%s7672_s2 + $0x40] ss:$16 sps:$4 sm:$0xff]  }
 0x715   :  { %3135 = vmatpush1.bf16.msra.mxu0 %v5741_v18  ;;  %3176 = vmatpush1.bf16.msra.mxu1 %v5742_v9 }
 0x716   :  { %3136 = vmatprep.subr.bf16.mxu0 %v5743_v5  ;;  %3177 = vmatprep.subr.bf16.mxu1 %v5744_v26  ;;  %v5424_v26 = vld [vmem:[%s7674_s3 + $0x10] ss:$8 sps:$4 sm:$0xff]  }
 0x719   :  { %3137 = vmatpush1.bf16.msra.mxu0 %v5745_v12  ;;  %3178 = vmatpush1.bf16.msra.mxu1 %v5746_v22  ;;  %v5429_v12 = vld [vmem:[%s7674_s3 + $0x24] ss:$8 sps:$4 sm:$0xff]   ;;  %v5427_v22 = vld [vmem:[%s7674_s3 + $0x20] ss:$8 sps:$4 sm:$0xff]  }
 0x71a   :  { %3138 = vmatprep.subr.bf16.mxu0 %v5747_v10  ;;  %3179 = vmatprep.subr.bf16.mxu1 %v5748_v1  ;;  %v5432_v10 = vld [vmem:[%s7674_s3 + $0x34] ss:$8 sps:$4 sm:$0xff]   ;;  %v5430_v1 = vld [vmem:[%s7674_s3 + $0x30] ss:$8 sps:$4 sm:$0xff]  }
 0x71d   :  { %3139 = vmatpush1.bf16.msra.mxu0 %v5749_v23  ;;  %3180 = vmatpush1.bf16.msra.mxu1 %v5750_v31  ;;  %v5435_v23 = vld [vmem:[%s7674_s3 + $0x44] ss:$8 sps:$4 sm:$0xff]   ;;  %v5433_v31 = vld [vmem:[%s7674_s3 + $0x40] ss:$8 sps:$4 sm:$0xff]  }
 0x71e   :  { %3140 = vmatprep.subr.bf16.mxu0 %v5751_v19  ;;  %3181 = vmatprep.subr.bf16.mxu1 %v5752_v20  ;;  %v5438_v19 = vld [vmem:[%s7674_s3 + $0x54] ss:$8 sps:$4 sm:$0xff]   ;;  %v5436_v20 = vld [vmem:[%s7674_s3 + $0x50] ss:$8 sps:$4 sm:$0xff]  }
 0x721   :  { %3141 = vmatpush1.bf16.msra.mxu0 %v5753_v30  ;;  %3182 = vmatpush1.bf16.msra.mxu1 %v5754_v16  ;;  %v5441_v30 = vld [vmem:[%s7674_s3 + $0x64] ss:$8 sps:$4 sm:$0xff]   ;;  %v5439_v16 = vld [vmem:[%s7674_s3 + $0x60] ss:$8 sps:$4 sm:$0xff]  }
 0x722   :  { %3142 = vmatprep.subr.bf16.mxu0 %v5755_v4  ;;  %3183 = vmatprep.subr.bf16.mxu1 %v5756_v7  ;;  %v5444_v4 = vld [vmem:[%s7674_s3 + $0x74] ss:$8 sps:$4 sm:$0xff]   ;;  %v5442_v7 = vld [vmem:[%s7674_s3 + $0x70] ss:$8 sps:$4 sm:$0xff]  }
 0x725   :  { %3143 = vmatpush1.bf16.msra.mxu0 %v5757_v32  ;;  %3184 = vmatpush1.bf16.msra.mxu1 %v5758_v33  ;;  %v5447_v32 = vld [vmem:[%s7674_s3 + $0x84] ss:$8 sps:$4 sm:$0xff]   ;;  %v5445_v33 = vld [vmem:[%s7674_s3 + $0x80] ss:$8 sps:$4 sm:$0xff]  }
 0x726   :  { %3144 = vmatprep.subr.bf16.mxu0 %v5759_v17  ;;  %3185 = vmatprep.subr.bf16.mxu1 %v5760_v11  ;;  %v5450_v17 = vld [vmem:[%s7674_s3 + $0x94] ss:$8 sps:$4 sm:$0xff]   ;;  %v5448_v11 = vld [vmem:[%s7674_s3 + $0x90] ss:$8 sps:$4 sm:$0xff]  }
 0x729   :  { %3145 = vmatpush1.bf16.msra.mxu0 %v5761_v14  ;;  %3186 = vmatpush1.bf16.msra.mxu1 %v5762_v34  ;;  %v5453_v14 = vld [vmem:[%s7674_s3 + $0xa4] ss:$8 sps:$4 sm:$0xff]   ;;  %v5451_v34 = vld [vmem:[%s7674_s3 + $0xa0] ss:$8 sps:$4 sm:$0xff]  }
 0x72a   :  { %3146 = vmatprep.subr.bf16.mxu0 %v5763_v35  ;;  %3187 = vmatprep.subr.bf16.mxu1 %v5764_v37  ;;  %v5456_v35 = vld [vmem:[%s7674_s3 + $0xb4] ss:$8 sps:$4 sm:$0xff]   ;;  %v5454_v37 = vld [vmem:[%s7674_s3 + $0xb0] ss:$8 sps:$4 sm:$0xff]  }
 0x72d   :  { %3147 = vmatpush1.bf16.msra.mxu0 %v5765_v38  ;;  %3188 = vmatpush1.bf16.msra.mxu1 %v5766_v39  ;;  %v5459_v38 = vld [vmem:[%s7674_s3 + $0xc4] ss:$8 sps:$4 sm:$0xff]   ;;  %v5457_v39 = vld [vmem:[%s7674_s3 + $0xc0] ss:$8 sps:$4 sm:$0xff]  }
 0x72e   :  { %3467 = vmatprep.subr.bf16.mxu0 %v5423_v40  ;;  %v5462_v40 = vld [vmem:[%s7674_s3 + $0xd4] ss:$8 sps:$4 sm:$0xff]  }
 0x7e3   :  { %v3051_v42 = vpop.f32.mrb[32].mxu0  ;;  %v3092_v43 = vpop.f32.mrb[32].mxu1 }
 0x7e4   :  { %v3099_v45 = vadd.f32 %v7693_v44, %v3051_v42  ;;  %v3053_v46 = vpop.f32.mrb[33].mxu0  ;;  %v3094_v47 = vpop.f32.mrb[33].mxu1  ;;  %v3101_v60 = vadd.f32 %v7696_v59, %v3092_v43  ;;  %v5460_v42 = vld [vmem:[%s7674_s3 + $0xd0] ss:$8 sps:$4 sm:$0xff]   ;;  %v5463_v43 = vld [vmem:[%s7674_s3 + $0xe0] ss:$8 sps:$4 sm:$0xff]  }
 0x7e5   :  { %v3100_v49 = vadd.f32 %v7694_v48, %v3053_v46  ;;  %v3055_v51 = vpop.f32.mrb[34].mxu0  ;;  %v3096_v52 = vpop.f32.mrb[34].mxu1  ;;  %v3102_v58 = vadd.f32 %v7695_v57, %v3094_v47  ;;  %v5468_v46 = vld [vmem:[%s7674_s3 + $0xf4] ss:$8 sps:$4 sm:$0xff]   ;;  %v5466_v47 = vld [vmem:[%s7674_s3 + $0xf0] ss:$8 sps:$4 sm:$0xff]  }
 0x7e6   :  { %v3103_v53 = vmul.f32 0.5, %v3099_v45  ;;  %v3056_v54 = vpop.f32.mrb[35].mxu0  ;;  %v3097_v55 = vpop.f32.mrb[35].mxu1  ;;  %v3105_v61 = vmul.f32 0.5, %v3101_v60  ;;  %v5465_v45 = vld [vmem:[%s7674_s3 + $0xe4] ss:$8 sps:$4 sm:$0xff]  }
 0x7e7   :  { %v3104_v56 = vmul.f32 0.5, %v3100_v49  ;;  %v5469_v49 = vld [vmem:[%s7674_s3 + $0x100] ss:$8 sps:$4 sm:$0xff]   ;;  %v5471_v51 = vld [vmem:[%s7674_s3 + $0x104] ss:$8 sps:$4 sm:$0xff]  }
 0x7e8   :  { %5673 = vtanh.f32 %v3103_v53  ;;  %v5474_v52 = vld [vmem:[%s7674_s3 + $0x114] ss:$8 sps:$4 sm:$0xff]   ;;  %3722 = vmatprep.subr.bf16.mxu1 %v5471_v51  ;;  %v5472_v53 = vld [vmem:[%s7674_s3 + $0x110] ss:$8 sps:$4 sm:$0xff]   ;;  %v5477_v54 = vld [vmem:[%s7674_s3 + $0x124] ss:$8 sps:$4 sm:$0xff]  }
 0x7e9   :  { %5675 = vtanh.f32 %v3104_v56  ;;  %v5475_v55 = vld [vmem:[%s7674_s3 + $0x120] ss:$8 sps:$4 sm:$0xff]   ;;  %v5480_v56 = vld [vmem:[%s7674_s3 + $0x134] ss:$8 sps:$4 sm:$0xff]   ;;  %v5483_v60 = vld [vmem:[%s7674_s3 + $0x144] ss:$8 sps:$4 sm:$0xff]  }
 0x7ea   :  { %5677 = vtanh.f32 %v3102_v58  ;;  %v5478_v58 = vld [vmem:[%s7674_s3 + $0x130] ss:$8 sps:$4 sm:$0xff]  }
 0x7eb   :  { %5679 = vtanh.f32 %v3105_v61  ;;  %v5481_v61 = vld [vmem:[%s7674_s3 + $0x140] ss:$8 sps:$4 sm:$0xff]   ;;  %v5502_v51 = vld [vmem:[%s7674_s3 + $0x1b0] ss:$8 sps:$4 sm:$0xff]  }
 0x7f2   :  { %v5674_v62 = vpop.eup %5673 }
 0x7f3   :  { %v3109_v63 = vadd.f32 1.0, %v5674_v62  ;;  %v5676_v0 = vpop.eup %5675  ;;  %v5486_v62 = vld [vmem:[%s7674_s3 + $0x154] ss:$8 sps:$4 sm:$0xff]  }
 0x7f4   :  { %v3110_v36 = vadd.f32 1.0, %v5676_v0  ;;  %v5678_v2 = vpop.eup %5677  ;;  %v5489_v0 = vld [vmem:[%s7674_s3 + $0x164] ss:$8 sps:$4 sm:$0xff]  }
 0x7f5   :  { %v3112_v28 = vmul.f32 0.5, %v3109_v63  ;;  %v5680_v3 = vpop.eup %5679  ;;  %v5484_v63 = vld [vmem:[%s7674_s3 + $0x150] ss:$8 sps:$4 sm:$0xff]  }
 0x7f6   :  { %v3113_v41 = vmul.f32 0.5, %v3110_v36  ;;  %v3111_v6 = vadd.f32 1.0, %v5680_v3  ;;  %v5492_v36 = vld [vmem:[%s7674_s3 + $0x174] ss:$8 sps:$4 sm:$0xff]   ;;  %v5501_v3 = vld [vmem:[%s7674_s3 + $0x1a4] ss:$8 sps:$4 sm:$0xff]  }
 0x7f7   :  { %v3120_v29 = vmul.f32 %v5678_v2, %v3112_v28  ;;  %v5487_v28 = vld [vmem:[%s7674_s3 + $0x160] ss:$8 sps:$4 sm:$0xff]   ;;  %v5490_v2 = vld [vmem:[%s7674_s3 + $0x170] ss:$8 sps:$4 sm:$0xff]  }
 0x7f8   :  { %v3119_v8 = vmul.f32 %v3117_v21, %v3113_v41  ;;  %v3114_v24 = vmul.f32 0.5, %v3111_v6  ;;  %v5495_v41 = vld [vmem:[%s7674_s3 + $0x184] ss:$8 sps:$4 sm:$0xff]   ;;  %v5493_v21 = vld [vmem:[%s7674_s3 + $0x180] ss:$8 sps:$4 sm:$0xff]  }
 0x7f9   :  { %v5499_v6 = vld [vmem:[%s7674_s3 + $0x1a0] ss:$8 sps:$4 sm:$0xff]  }
 0x7fa   :  { %v7238_v50 = vadd.f32 %v3120_v29, %v3119_v8  ;;  %v5498_v29 = vld [vmem:[%s7674_s3 + $0x194] ss:$8 sps:$4 sm:$0xff]   ;;  %v5496_v8 = vld [vmem:[%s7674_s3 + $0x190] ss:$8 sps:$4 sm:$0xff]  }
 0x7fc   :  { %5681 = vtanh.f32 %v7238_v50 }
 0x806   :  { %v5682_v13 = vpop.eup %5681 }
 0x807   :  { %v3123_v25 = vmul.f32 %v5682_v13, %v3114_v24 }
 0x809   :  { %v3125_v18 = vrot.slane %v3123_v25, 4  ;;  %v3128_v9 = vrot.slane %v3123_v25, 6  ;;  %v3131_v5 = vpack.c.bf16 %v3123_v25, %v3123_v25 }
 0x80b   :  { %3127 = vst [vmem:[#allocation2 + $0x10] sm:$0x30] %v3125_v18  ;;  %3130 = vst [vmem:[#allocation2 + $0x18] sm:$0x30] %v3128_v9  ;;  %3165 = vmatmul.mubr.bf16.vlgmr.msra.gmra.mrb[36].mxu0 %v3131_v5  ;;  %3206 = vmatmul.mubr.bf16.vlgmr.msra.gmra.mrb[36].mxu1 %v3131_v5 }
 0x80c   :  { %3468 = vmatpush1.bf16.msra.mxu0 %v5421_v27  ;;  %3723 = vmatpush1.bf16.msra.mxu1 %v5469_v49 }
 0x80d   :  { %3469 = vmatprep.subr.bf16.mxu0 %v5426_v15  ;;  %3724 = vmatprep.subr.bf16.mxu1 %v5474_v52  ;;  %v5507_v52 = vld [vmem:[%s7674_s3 + $0x1c4] ss:$8 sps:$4 sm:$0xff]  }
 0x810   :  { %3470 = vmatpush1.bf16.msra.mxu0 %v5424_v26  ;;  %3725 = vmatpush1.bf16.msra.mxu1 %v5472_v53  ;;  %v5505_v53 = vld [vmem:[%s7674_s3 + $0x1c0] ss:$8 sps:$4 sm:$0xff]  }
 0x811   :  { %3471 = vmatprep.subr.bf16.mxu0 %v5429_v12  ;;  %3726 = vmatprep.subr.bf16.mxu1 %v5477_v54  ;;  %v5508_v54 = vld [vmem:[%s7674_s3 + $0x1d0] ss:$8 sps:$4 sm:$0xff]  }
 0x814   :  { %3472 = vmatpush1.bf16.msra.mxu0 %v5427_v22  ;;  %3727 = vmatpush1.bf16.msra.mxu1 %v5475_v55  ;;  %v5510_v55 = vld [vmem:[%s7674_s3 + $0x1d4] ss:$8 sps:$4 sm:$0xff]  }
 0x815   :  { %3473 = vmatprep.subr.bf16.mxu0 %v5432_v10  ;;  %3728 = vmatprep.subr.bf16.mxu1 %v5480_v56  ;;  %v5513_v56 = vld [vmem:[%s7674_s3 + $0x1e4] ss:$8 sps:$4 sm:$0xff]  }
 0x818   :  { %3474 = vmatpush1.bf16.msra.mxu0 %v5430_v1  ;;  %3729 = vmatpush1.bf16.msra.mxu1 %v5478_v58  ;;  %v5511_v58 = vld [vmem:[%s7674_s3 + $0x1e0] ss:$8 sps:$4 sm:$0xff]  }
 0x819   :  { %3475 = vmatprep.subr.bf16.mxu0 %v5435_v23  ;;  %3730 = vmatprep.subr.bf16.mxu1 %v5483_v60  ;;  %v5516_v60 = vld [vmem:[%s7674_s3 + $0x1f4] ss:$8 sps:$4 sm:$0xff]  }
 0x81c   :  { %3476 = vmatpush1.bf16.msra.mxu0 %v5433_v31  ;;  %3731 = vmatpush1.bf16.msra.mxu1 %v5481_v61  ;;  %v5514_v61 = vld [vmem:[%s7674_s3 + $0x1f0] ss:$8 sps:$4 sm:$0xff]  }
 0x81d   :  { %3477 = vmatprep.subr.bf16.mxu0 %v5438_v19  ;;  %3732 = vmatprep.subr.bf16.mxu1 %v5486_v62  ;;  %v5517_v62 = vld [vmem:[%s7674_s3 + $0x200] ss:$8 sps:$4 sm:$0xff]  }
 0x820   :  { %3478 = vmatpush1.bf16.msra.mxu0 %v5436_v20  ;;  %3733 = vmatpush1.bf16.msra.mxu1 %v5484_v63  ;;  %v5519_v63 = vld [vmem:[%s7674_s3 + $0x204] ss:$8 sps:$4 sm:$0xff]  }
 0x821   :  { %3479 = vmatprep.subr.bf16.mxu0 %v5441_v30  ;;  %3734 = vmatprep.subr.bf16.mxu1 %v5489_v0  ;;  %v5522_v0 = vld [vmem:[%s7674_s3 + $0x214] ss:$8 sps:$4 sm:$0xff]  }
 0x824   :  { %3480 = vmatpush1.bf16.msra.mxu0 %v5439_v16  ;;  %3735 = vmatpush1.bf16.msra.mxu1 %v5487_v28  ;;  %v5520_v28 = vld [vmem:[%s7674_s3 + $0x210] ss:$8 sps:$4 sm:$0xff]  }
 0x825   :  { %3481 = vmatprep.subr.bf16.mxu0 %v5444_v4  ;;  %3736 = vmatprep.subr.bf16.mxu1 %v5492_v36  ;;  %v5525_v36 = vld [vmem:[%s7674_s3 + $0x224] ss:$8 sps:$4 sm:$0xff]  }
 0x828   :  { %3482 = vmatpush1.bf16.msra.mxu0 %v5442_v7  ;;  %3737 = vmatpush1.bf16.msra.mxu1 %v5490_v2  ;;  %v5523_v2 = vld [vmem:[%s7674_s3 + $0x220] ss:$8 sps:$4 sm:$0xff]  }
 0x829   :  { %3483 = vmatprep.subr.bf16.mxu0 %v5447_v32  ;;  %3738 = vmatprep.subr.bf16.mxu1 %v5495_v41  ;;  %v5528_v41 = vld [vmem:[%s7674_s3 + $0x234] ss:$8 sps:$4 sm:$0xff]  }
 0x82c   :  { %3484 = vmatpush1.bf16.msra.mxu0 %v5445_v33  ;;  %3739 = vmatpush1.bf16.msra.mxu1 %v5493_v21  ;;  %v5526_v21 = vld [vmem:[%s7674_s3 + $0x230] ss:$8 sps:$4 sm:$0xff]  }
 0x82d   :  { %3485 = vmatprep.subr.bf16.mxu0 %v5450_v17  ;;  %3740 = vmatprep.subr.bf16.mxu1 %v5498_v29  ;;  %v5531_v29 = vld [vmem:[%s7674_s3 + $0x244] ss:$8 sps:$4 sm:$0xff]  }
 0x830   :  { %3486 = vmatpush1.bf16.msra.mxu0 %v5448_v11  ;;  %3741 = vmatpush1.bf16.msra.mxu1 %v5496_v8  ;;  %v5529_v8 = vld [vmem:[%s7674_s3 + $0x240] ss:$8 sps:$4 sm:$0xff]  }
 0x831   :  { %3487 = vmatprep.subr.bf16.mxu0 %v5453_v14  ;;  %3742 = vmatprep.subr.bf16.mxu1 %v5501_v3  ;;  %v5534_v3 = vld [vmem:[%s7674_s3 + $0x254] ss:$8 sps:$4 sm:$0xff]  }
 0x834   :  { %3488 = vmatpush1.bf16.msra.mxu0 %v5451_v34  ;;  %3743 = vmatpush1.bf16.msra.mxu1 %v5499_v6  ;;  %v5532_v6 = vld [vmem:[%s7674_s3 + $0x250] ss:$8 sps:$4 sm:$0xff]  }
 0x835   :  { %3489 = vmatprep.subr.bf16.mxu0 %v5456_v35 }
 0x838   :  { %3490 = vmatpush1.bf16.msra.mxu0 %v5454_v37 }
 0x839   :  { %3491 = vmatprep.subr.bf16.mxu0 %v5459_v38 }
 0x83c   :  { %3492 = vmatpush1.bf16.msra.mxu0 %v5457_v39 }
 0x83d   :  { %3493 = vmatprep.subr.bf16.mxu0 %v5462_v40 }
 0x840   :  { %3494 = vmatpush1.bf16.msra.mxu0 %v5460_v42  ;;  %v3257_v42 = vld [vmem:[#allocation2 + $0x8] sm:$0xff] }
 0x841   :  { %3495 = vmatprep.subr.bf16.mxu0 %v5465_v45 }
 0x844   :  { %3496 = vmatpush1.bf16.msra.mxu0 %v5463_v43 }
 0x845   :  { %3497 = vmatprep.subr.bf16.mxu0 %v5468_v46  ;;  %v3256_v46 = vld [vmem:[#allocation2] sm:$0xff] }
 0x848   :  { %3498 = vmatpush1.bf16.msra.mxu0 %v5466_v47 }
 0x849   :  { %3977 = vmatprep.subr.bf16.mxu0 %v5519_v63  ;;  %v5588_v63 = vld [vmem:[%s7674_s3 + $0x374] ss:$8 sps:$4 sm:$0xff]  }
 0x8de   :  { %v3166_v24 = vpop.f32.mrb[36].mxu0  ;;  %v3207_v13 = vpop.f32.mrb[36].mxu1 }
 0x8df   :  { %v3218_v25 = vrot.slane %v3166_v24, 4  ;;  %v3168_v27 = vpop.f32.mrb[37].mxu0  ;;  %v3209_v18 = vpop.f32.mrb[37].mxu1  ;;  %v3220_v20 = vrot.slane %v3207_v13, 4  ;;  %v5537_v24 = vld [vmem:[%s7674_s3 + $0x264] ss:$8 sps:$4 sm:$0xff]  }
 0x8e0   :  { %v3219_v9 = vrot.slane %v3168_v27, 4  ;;  %v3170_v5 = vpop.f32.mrb[38].mxu0  ;;  %v3211_v15 = vpop.f32.mrb[38].mxu1  ;;  %v3221_v12 = vrot.slane %v3209_v18, 4  ;;  %v5535_v13 = vld [vmem:[%s7674_s3 + $0x260] ss:$8 sps:$4 sm:$0xff]  }
 0x8e1   :  { %v3226_v26 = vadd.f32 %v7693_v44, %v3218_v25  ;;  %v3171_v22 = vpop.f32.mrb[39].mxu0  ;;  %v3212_v10 = vpop.f32.mrb[39].mxu1  ;;  %v3228_v30 = vadd.f32 %v7696_v59, %v3220_v20  ;;  %v5540_v25 = vld [vmem:[%s7674_s3 + $0x274] ss:$8 sps:$4 sm:$0xff]   ;;  %v5538_v27 = vld [vmem:[%s7674_s3 + $0x270] ss:$8 sps:$4 sm:$0xff]  }
 0x8e2   :  { %v3227_v1 = vadd.f32 %v7694_v48, %v3219_v9  ;;  %v3229_v19 = vadd.f32 %v7695_v57, %v3221_v12  ;;  %v3244_v48 = vrot.slane %v7238_v50, 4  ;;  %v5504_v50 = vld [vmem:[%s7674_s3 + $0x1b4] ss:$8 sps:$4 sm:$0xff]   ;;  %v5543_v18 = vld [vmem:[%s7674_s3 + $0x284] ss:$8 sps:$4 sm:$0xff]  }
 0x8e3   :  { %v3230_v23 = vmul.f32 0.5, %v3226_v26  ;;  %v3232_v16 = vmul.f32 0.5, %v3228_v30  ;;  %3744 = vmatprep.subr.bf16.mxu1 %v5504_v50  ;;  %v5541_v9 = vld [vmem:[%s7674_s3 + $0x280] ss:$8 sps:$4 sm:$0xff]   ;;  %v5546_v5 = vld [vmem:[%s7674_s3 + $0x294] ss:$8 sps:$4 sm:$0xff]  }
 0x8e4   :  { %v3231_v31 = vmul.f32 0.5, %v3227_v1  ;;  %3745 = vmatpush1.bf16.msra.mxu1 %v5502_v51  ;;  %v5544_v15 = vld [vmem:[%s7674_s3 + $0x290] ss:$8 sps:$4 sm:$0xff]   ;;  %v5549_v26 = vld [vmem:[%s7674_s3 + $0x2a4] ss:$8 sps:$4 sm:$0xff]  }
 0x8e5   :  { %5683 = vtanh.f32 %v3230_v23  ;;  %3746 = vmatprep.subr.bf16.mxu1 %v5507_v52  ;;  %v5547_v12 = vld [vmem:[%s7674_s3 + $0x2a0] ss:$8 sps:$4 sm:$0xff]   ;;  %v5568_v50 = vld [vmem:[%s7674_s3 + $0x310] ss:$8 sps:$4 sm:$0xff]   ;;  %v5573_v51 = vld [vmem:[%s7674_s3 + $0x324] ss:$8 sps:$4 sm:$0xff]  }
 0x8e6   :  { %5685 = vtanh.f32 %v3231_v31  ;;  %v4689_v22 = vld [vmem:[%s7673_s4 + $0x1] ss:$8 sm:$0x3] }
 0x8e7   :  { %5687 = vtanh.f32 %v3229_v19  ;;  %v7697_v10 = vld [vmem:[#allocation3_spill] sm:$0xff]  ;;  %v7698_v23 = vld [vmem:[#allocation4_spill] sm:$0xff] }
 0x8e8   :  { %5689 = vtanh.f32 %v3232_v16  ;;  %3747 = vmatpush1.bf16.msra.mxu1 %v5505_v53  ;;  %v3300_v1 = vrot.slane %v4689_v22, %v7697_v10  ;;  %v3304_v31 = vrot.slane %v4689_v22, %v7698_v23  ;;  %v5571_v52 = vld [vmem:[%s7674_s3 + $0x320] ss:$8 sps:$4 sm:$0xff]   ;;  %v5576_v53 = vld [vmem:[%s7674_s3 + $0x334] ss:$8 sps:$4 sm:$0xff]  }
 0x8e9   :  { %3748 = vmatprep.subr.bf16.mxu1 %v5510_v55  ;;  %v5579_v55 = vld [vmem:[%s7674_s3 + $0x344] ss:$8 sps:$4 sm:$0xff]  }
 0x8ec   :  { %3749 = vmatpush1.bf16.msra.mxu1 %v5508_v54  ;;  %v5574_v54 = vld [vmem:[%s7674_s3 + $0x330] ss:$8 sps:$4 sm:$0xff]  }
 0x8ed   :  { %3750 = vmatprep.subr.bf16.mxu1 %v5513_v56  ;;  %v5577_v56 = vld [vmem:[%s7674_s3 + $0x340] ss:$8 sps:$4 sm:$0xff]  }
 0x8ef   :  { %v5684_v4 = vpop.eup %5683 }
 0x8f0   :  { %v3236_v7 = vadd.f32 1.0, %v5684_v4  ;;  %v5686_v32 = vpop.eup %5685  ;;  %3751 = vmatpush1.bf16.msra.mxu1 %v5511_v58  ;;  %v5582_v58 = vld [vmem:[%s7674_s3 + $0x354] ss:$8 sps:$4 sm:$0xff]  }
 0x8f1   :  { %v3237_v33 = vadd.f32 1.0, %v5686_v32  ;;  %v5688_v17 = vpop.eup %5687  ;;  %3752 = vmatprep.subr.bf16.mxu1 %v5516_v60  ;;  %v5580_v60 = vld [vmem:[%s7674_s3 + $0x350] ss:$8 sps:$4 sm:$0xff]  }
 0x8f2   :  { %v3239_v44 = vmul.f32 0.5, %v3236_v7  ;;  %v5690_v57 = vpop.eup %5689 }
 0x8f3   :  { %v3240_v11 = vmul.f32 0.5, %v3237_v33  ;;  %v3238_v37 = vadd.f32 1.0, %v5690_v57  ;;  %v5550_v57 = vld [vmem:[%s7674_s3 + $0x2b0] ss:$8 sps:$4 sm:$0xff]  }
 0x8f4   :  { %v3247_v14 = vmul.f32 %v5688_v17, %v3239_v44  ;;  %3753 = vmatpush1.bf16.msra.mxu1 %v5514_v61  ;;  %v5585_v61 = vld [vmem:[%s7674_s3 + $0x364] ss:$8 sps:$4 sm:$0xff]  }
 0x8f5   :  { %v3246_v34 = vmul.f32 %v3244_v48, %v3240_v11  ;;  %v3241_v38 = vmul.f32 0.5, %v3238_v37  ;;  %v5555_v37 = vld [vmem:[%s7674_s3 + $0x2c4] ss:$8 sps:$4 sm:$0xff]  }
 0x8f7   :  { %v3248_v35 = vadd.f32 %v3247_v14, %v3246_v34 }
 0x8f9   :  { %5691 = vtanh.f32 %v3248_v35  ;;  %v5552_v35 = vld [vmem:[%s7674_s3 + $0x2b4] ss:$8 sps:$4 sm:$0xff]  }
 0x903   :  { %v5692_v39 = vpop.eup %5691 }
 0x904   :  { %v3250_v59 = vmul.f32 %v5692_v39, %v3241_v38  ;;  %v5553_v38 = vld [vmem:[%s7674_s3 + $0x2c0] ss:$8 sps:$4 sm:$0xff]   ;;  %v5556_v39 = vld [vmem:[%s7674_s3 + $0x2d0] ss:$8 sps:$4 sm:$0xff]  }
 0x906   :  { %v3252_v40 = vrot.slane %v3250_v59, 6  ;;  %3255 = vst [vmem:[#allocation2 + $0x18] sm:$0xc0] %v3250_v59  ;;  %v5558_v59 = vld [vmem:[%s7674_s3 + $0x2d4] ss:$8 sps:$4 sm:$0xff]  }
 0x908   :  { %3254 = vst [vmem:[#allocation2 + $0x10] sm:$0xc0] %v3252_v40  ;;  %v5561_v40 = vld [vmem:[%s7674_s3 + $0x2e4] ss:$8 sps:$4 sm:$0xff]  }
 0x90d   :  { %v3259_v43 = vld [vmem:[#allocation2 + $0x18] sm:$0xff] }
 0x90e   :  { %v3261_v45 = vpack.c.bf16 %v3259_v43, %v3257_v42  ;;  %v5559_v42 = vld [vmem:[%s7674_s3 + $0x2e0] ss:$8 sps:$4 sm:$0xff]   ;;  %v5564_v43 = vld [vmem:[%s7674_s3 + $0x2f4] ss:$8 sps:$4 sm:$0xff]  }
 0x90f   :  { %v3258_v47 = vld [vmem:[#allocation2 + $0x10] sm:$0xff] }
 0x910   :  { %3499 = vmatprep.mubr.bf16.mxu0 %v3261_v45  ;;  %v3260_v49 = vpack.c.bf16 %v3258_v47, %v3256_v46  ;;  %v5562_v45 = vld [vmem:[%s7674_s3 + $0x2f0] ss:$8 sps:$4 sm:$0xff]   ;;  %v5565_v46 = vld [vmem:[%s7674_s3 + $0x300] ss:$8 sps:$4 sm:$0xff]   ;;  %v5567_v47 = vld [vmem:[%s7674_s3 + $0x304] ss:$8 sps:$4 sm:$0xff]  }
 0x911   :  { %4227 = vmatprep.subr.bf16.mxu1 %v5567_v47 }
 0x912   :  { %3500 = vmatmul.mubr.bf16.vlgmr.msra.gmra.mrb[40].mxu0 %v3260_v49  ;;  %v5570_v49 = vld [vmem:[%s7674_s3 + $0x314] ss:$8 sps:$4 sm:$0xff]  }
 0x913   :  { %3978 = vmatpush1.bf16.msra.mxu0 %v5517_v62  ;;  %v5583_v62 = vld [vmem:[%s7674_s3 + $0x360] ss:$8 sps:$4 sm:$0xff]  }
 0x914   :  { %3979 = vmatprep.subr.bf16.mxu0 %v5522_v0  ;;  %v5586_v0 = vld [vmem:[%s7674_s3 + $0x370] ss:$8 sps:$4 sm:$0xff]  }
 0x917   :  { %3980 = vmatpush1.bf16.msra.mxu0 %v5520_v28  ;;  %v5591_v28 = vld [vmem:[%s7674_s3 + $0x384] ss:$8 sps:$4 sm:$0xff]  }
 0x918   :  { %3981 = vmatprep.subr.bf16.mxu0 %v5525_v36  ;;  %v5589_v36 = vld [vmem:[%s7674_s3 + $0x380] ss:$8 sps:$4 sm:$0xff]  }
 0x91b   :  { %3982 = vmatpush1.bf16.msra.mxu0 %v5523_v2  ;;  %v5594_v2 = vld [vmem:[%s7674_s3 + $0x394] ss:$8 sps:$4 sm:$0xff]  }
 0x91c   :  { %3983 = vmatprep.subr.bf16.mxu0 %v5528_v41  ;;  %v5592_v41 = vld [vmem:[%s7674_s3 + $0x390] ss:$8 sps:$4 sm:$0xff]  }
 0x91f   :  { %3984 = vmatpush1.bf16.msra.mxu0 %v5526_v21  ;;  %v5597_v21 = vld [vmem:[%s7674_s3 + $0x3a4] ss:$8 sps:$4 sm:$0xff]  }
 0x920   :  { %3985 = vmatprep.subr.bf16.mxu0 %v5531_v29  ;;  %v5595_v29 = vld [vmem:[%s7674_s3 + $0x3a0] ss:$8 sps:$4 sm:$0xff]  }
 0x923   :  { %3986 = vmatpush1.bf16.msra.mxu0 %v5529_v8  ;;  %v4754_v8 = vld [vmem:[%s7673_s4 + $0x2] ss:$8 sm:$0x3] }
 0x924   :  { %3987 = vmatprep.subr.bf16.mxu0 %v5534_v3  ;;  %v3555_v3 = vrot.slane %v4754_v8, %v7697_v10 }
 0x927   :  { %3988 = vmatpush1.bf16.msra.mxu0 %v5532_v6  ;;  %v3559_v6 = vrot.slane %v4754_v8, %v7698_v23 }
 0x928   :  { %3989 = vmatprep.subr.bf16.mxu0 %v5537_v24 }
 0x92b   :  { %3990 = vmatpush1.bf16.msra.mxu0 %v5535_v13 }
 0x92c   :  { %3991 = vmatprep.subr.bf16.mxu0 %v5540_v25 }
 0x92f   :  { %3992 = vmatpush1.bf16.msra.mxu0 %v5538_v27 }
 0x930   :  { %3993 = vmatprep.subr.bf16.mxu0 %v5543_v18 }
 0x933   :  { %3994 = vmatpush1.bf16.msra.mxu0 %v5541_v9 }
 0x934   :  { %3995 = vmatprep.subr.bf16.mxu0 %v5546_v5 }
 0x937   :  { %3996 = vmatpush1.bf16.msra.mxu0 %v5544_v15 }
 0x938   :  { %3997 = vmatprep.subr.bf16.mxu0 %v5549_v26 }
 0x93b   :  { %3998 = vmatpush1.bf16.msra.mxu0 %v5547_v12 }
 0x93c   :  { %3999 = vmatprep.subr.bf16.mxu0 %v5552_v35 }
 0x93f   :  { %4000 = vmatpush1.bf16.msra.mxu0 %v5550_v57 }
 0x940   :  { %4001 = vmatprep.subr.bf16.mxu0 %v5555_v37 }
 0x943   :  { %4002 = vmatpush1.bf16.msra.mxu0 %v5553_v38 }
 0x944   :  { %4003 = vmatprep.subr.bf16.mxu0 %v5558_v59 }
 0x947   :  { %4004 = vmatpush1.bf16.msra.mxu0 %v5556_v39 }
 0x948   :  { %4005 = vmatprep.subr.bf16.mxu0 %v5561_v40 }
 0x94b   :  { %4006 = vmatpush1.bf16.msra.mxu0 %v5559_v42 }
 0x94c   :  { %4007 = vmatprep.subr.bf16.mxu0 %v5564_v43 }
 0x94f   :  { %4008 = vmatpush1.bf16.msra.mxu0 %v5562_v45 }
 0x9e5   :  { %v3501_v19 = vpop.f32.mrb[40].mxu0 }
 0x9e6   :  { %v3502_v20 = vadd.f32 %v3501_v19, %v3300_v1  ;;  %v3503_v30 = vpop.f32.mrb[41].mxu0 }
 0x9e7   :  { %v3504_v16 = vadd.f32 %v3503_v30, %v3304_v31  ;;  %v3505_v4 = vpop.f32.mrb[42].mxu0  ;;  %v5598_v30 = vld [vmem:[%s7674_s3 + $0x3b0] ss:$8 sps:$4 sm:$0xff]  }
 0x9e8   :  { %5693 = vtanh.f32 %v3502_v20  ;;  %v3506_v7 = vadd.f32 %v3505_v4, %v3300_v1  ;;  %v3507_v32 = vpop.f32.mrb[43].mxu0  ;;  %v5600_v20 = vld [vmem:[%s7674_s3 + $0x3b4] ss:$8 sps:$4 sm:$0xff]   ;;  %v5601_v4 = vld [vmem:[%s7674_s3 + $0x3c0] ss:$8 sps:$4 sm:$0xff]  }
 0x9e9   :  { %5695 = vtanh.f32 %v3504_v16  ;;  %v3508_v44 = vadd.f32 %v3507_v32, %v3304_v31  ;;  %v5603_v16 = vld [vmem:[%s7674_s3 + $0x3c4] ss:$8 sps:$4 sm:$0xff]   ;;  %v5606_v32 = vld [vmem:[%s7674_s3 + $0x3d4] ss:$8 sps:$4 sm:$0xff]  }
 0x9ea   :  { %5697 = vtanh.f32 %v3506_v7  ;;  %v5604_v7 = vld [vmem:[%s7674_s3 + $0x3d0] ss:$8 sps:$4 sm:$0xff]  }
 0x9eb   :  { %5699 = vtanh.f32 %v3508_v44  ;;  %v5609_v44 = vld [vmem:[%s7674_s3 + $0x3e4] ss:$8 sps:$4 sm:$0xff]  }
 0x9f2   :  { %v5694_v33 = vpop.eup %5693 }
 0x9f3   :  { %v5696_v17 = vpop.eup %5695 }
 0x9f4   :  { %v5698_v11 = vpop.eup %5697 }
 0x9f5   :  { %v5700_v48 = vpop.eup %5699  ;;  %v3514_v14 = vpack.c.bf16 %v5698_v11, %v5694_v33  ;;  %v5607_v33 = vld [vmem:[%s7674_s3 + $0x3e0] ss:$8 sps:$4 sm:$0xff]   ;;  %v5610_v11 = vld [vmem:[%s7674_s3 + $0x3f0] ss:$8 sps:$4 sm:$0xff]  }
 0x9f6   :  { %v3515_v34 = vpack.c.bf16 %v5700_v48, %v5696_v17  ;;  %v5612_v17 = vld [vmem:[%s7674_s3 + $0x3f4] ss:$8 sps:$4 sm:$0xff]   ;;  %v4819_v48 = vld [vmem:[%s7673_s4 + $0x3] ss:$8 sm:$0x3] }
 0x9f8   :  { %3754 = vmatprep.mubr.bf16.mxu1 %v3515_v34  ;;  %v3814_v34 = vrot.slane %v4819_v48, %v7698_v23  ;;  %v4884_v23 = vld [vmem:[%s7673_s4 + $0x4] ss:$8 sm:$0x3] }
 0x9f9   :  { %3755 = vmatmul.mubr.bf16.vlgmr.msra.gmra.mrb[40].mxu1 %v3514_v14  ;;  %v3810_v14 = vrot.slane %v4819_v48, %v7697_v10 }
 0x9fa   :  { %4228 = vmatpush1.bf16.msra.mxu1 %v5565_v46 }
 0x9fb   :  { %4229 = vmatprep.subr.bf16.mxu1 %v5570_v49 }
 0x9fe   :  { %4230 = vmatpush1.bf16.msra.mxu1 %v5568_v50 }
 0x9ff   :  { %4231 = vmatprep.subr.bf16.mxu1 %v5573_v51  ;;  %v4065_v51 = vrot.slane %v4884_v23, %v7697_v10 }
 0xa02   :  { %4232 = vmatpush1.bf16.msra.mxu1 %v5571_v52 }
 0xa03   :  { %4233 = vmatprep.subr.bf16.mxu1 %v5576_v53 }
 0xa06   :  { %4234 = vmatpush1.bf16.msra.mxu1 %v5574_v54 }
 0xa07   :  { %4235 = vmatprep.subr.bf16.mxu1 %v5579_v55 }
 0xa0a   :  { %4236 = vmatpush1.bf16.msra.mxu1 %v5577_v56 }
 0xa0b   :  { %4237 = vmatprep.subr.bf16.mxu1 %v5582_v58 }
 0xa0e   :  { %4238 = vmatpush1.bf16.msra.mxu1 %v5580_v60 }
 0xa0f   :  { %4239 = vmatprep.subr.bf16.mxu1 %v5585_v61 }
 0xa12   :  { %4240 = vmatpush1.bf16.msra.mxu1 %v5583_v62 }
 0xa13   :  { %4241 = vmatprep.subr.bf16.mxu1 %v5588_v63 }
 0xa16   :  { %4242 = vmatpush1.bf16.msra.mxu1 %v5586_v0 }
 0xa17   :  { %4243 = vmatprep.subr.bf16.mxu1 %v5591_v28 }
 0xa1a   :  { %4244 = vmatpush1.bf16.msra.mxu1 %v5589_v36 }
 0xa1b   :  { %4245 = vmatprep.subr.bf16.mxu1 %v5594_v2 }
 0xa1e   :  { %4246 = vmatpush1.bf16.msra.mxu1 %v5592_v41 }
 0xa1f   :  { %4247 = vmatprep.subr.bf16.mxu1 %v5597_v21 }
 0xa22   :  { %4248 = vmatpush1.bf16.msra.mxu1 %v5595_v29 }
 0xa23   :  { %4249 = vmatprep.subr.bf16.mxu1 %v5600_v20 }
 0xa26   :  { %4250 = vmatpush1.bf16.msra.mxu1 %v5598_v30 }
 0xa27   :  { %4251 = vmatprep.subr.bf16.mxu1 %v5603_v16 }
 0xa2a   :  { %4252 = vmatpush1.bf16.msra.mxu1 %v5601_v4 }
 0xa2b   :  { %4253 = vmatprep.subr.bf16.mxu1 %v5606_v32 }
 0xa2e   :  { %4254 = vmatpush1.bf16.msra.mxu1 %v5604_v7 }
 0xa2f   :  { %4255 = vmatprep.subr.bf16.mxu1 %v5609_v44 }
 0xa32   :  { %4256 = vmatpush1.bf16.msra.mxu1 %v5607_v33 }
 0xa33   :  { %4257 = vmatprep.subr.bf16.mxu1 %v5612_v17 }
 0xa36   :  { %4258 = vmatpush1.bf16.msra.mxu1 %v5610_v11 }
 0xacc   :  { %v3756_v24 = vpop.f32.mrb[40].mxu1 }
 0xacd   :  { %v3757_v13 = vadd.f32 %v3756_v24, %v3555_v3  ;;  %v3758_v25 = vpop.f32.mrb[41].mxu1 }
 0xace   :  { %v3759_v27 = vadd.f32 %v3758_v25, %v3559_v6  ;;  %v3760_v18 = vpop.f32.mrb[42].mxu1 }
 0xacf   :  { %5701 = vtanh.f32 %v3757_v13  ;;  %v3761_v9 = vadd.f32 %v3760_v18, %v3555_v3  ;;  %v3762_v5 = vpop.f32.mrb[43].mxu1 }
 0xad0   :  { %5703 = vtanh.f32 %v3759_v27  ;;  %v3763_v15 = vadd.f32 %v3762_v5, %v3559_v6 }
 0xad1   :  { %5705 = vtanh.f32 %v3761_v9 }
 0xad2   :  { %5707 = vtanh.f32 %v3763_v15 }
 0xad9   :  { %v5702_v26 = vpop.eup %5701 }
 0xada   :  { %v5704_v12 = vpop.eup %5703 }
 0xadb   :  { %v5706_v22 = vpop.eup %5705 }
 0xadc   :  { %v5708_v1 = vpop.eup %5707  ;;  %v3769_v31 = vpack.c.bf16 %v5706_v22, %v5702_v26 }
 0xadd   :  { %v3770_v19 = vpack.c.bf16 %v5708_v1, %v5704_v12 }
 0xadf   :  { %4009 = vmatprep.mubr.bf16.mxu0 %v3770_v19 }
 0xae0   :  { %4010 = vmatmul.mubr.bf16.vlgmr.msra.gmra.mrb[44].mxu0 %v3769_v31 }
 0xbb3   :  { %v4011_v35 = vpop.f32.mrb[44].mxu0 }
 0xbb4   :  { %v4012_v57 = vadd.f32 %v4011_v35, %v3810_v14  ;;  %v4013_v37 = vpop.f32.mrb[45].mxu0 }
 0xbb5   :  { %v4014_v38 = vadd.f32 %v4013_v37, %v3814_v34  ;;  %v4015_v39 = vpop.f32.mrb[46].mxu0 }
 0xbb6   :  { %5709 = vtanh.f32 %v4012_v57  ;;  %v4016_v59 = vadd.f32 %v4015_v39, %v3810_v14  ;;  %v4017_v40 = vpop.f32.mrb[47].mxu0 }
 0xbb7   :  { %5711 = vtanh.f32 %v4014_v38  ;;  %v4018_v42 = vadd.f32 %v4017_v40, %v3814_v34 }
 0xbb8   :  { %5713 = vtanh.f32 %v4016_v59 }
 0xbb9   :  { %5715 = vtanh.f32 %v4018_v42 }
 0xbc0   :  { %v5710_v43 = vpop.eup %5709 }
 0xbc1   :  { %v5712_v45 = vpop.eup %5711 }
 0xbc2   :  { %v5714_v46 = vpop.eup %5713 }
 0xbc3   :  { %v5716_v47 = vpop.eup %5715  ;;  %v4024_v49 = vpack.c.bf16 %v5714_v46, %v5710_v43 }
 0xbc4   :  { %v4025_v50 = vpack.c.bf16 %v5716_v47, %v5712_v45 }
 0xbc6   :  { %4259 = vmatprep.mubr.bf16.mxu1 %v4025_v50 }
 0xbc7   :  { %4260 = vmatmul.mubr.bf16.vlgmr.msra.gmra.mrb[44].mxu1 %v4024_v49 }
 0xc9a   :  { %v4261_v52 = vpop.f32.mrb[44].mxu1 }
 0xc9b   :  { %v4262_v53 = vadd.f32 %v4261_v52, %v4065_v51  ;;  %v4263_v54 = vpop.f32.mrb[45].mxu1 }
 0xc9c   :  { %v4264_v55 = vpop.f32.mrb[46].mxu1 }
 0xc9d   :  { %v4269_v56 = vrot.slane %v4262_v53, 2  ;;  %v4266_v58 = vpop.f32.mrb[47].mxu1  ;;  %v4272_v61 = vrot.slane %v4262_v53, 4  ;;  %v4275_v63 = vrot.slane %v4262_v53, 6  ;;  %v4265_v0 = vadd.f32 %v4264_v55, %v4065_v51 }
 0xc9f   :  { %v4271_v60 = vmax.f32 %v4262_v53, %v4269_v56  ;;  %v4280_v2 = vrot.slane %v4265_v0, 2  ;;  %v4283_v21 = vrot.slane %v4265_v0, 4  ;;  %v4286_v8 = vrot.slane %v4265_v0, 6 }
 0xca1   :  { %v4274_v62 = vmax.f32 %v4271_v60, %v4272_v61 }
 0xca3   :  { %v4277_v28 = vmax.f32 %v4274_v62, %v4275_v63 }
 0xca5   :  { %v4278_v36 = vmax.f32 %v4277_v28, %v4265_v0 }
 0xca7   :  { %v4282_v41 = vmax.f32 %v4278_v36, %v4280_v2 }
 0xca9   :  { %v4285_v29 = vmax.f32 %v4282_v41, %v4283_v21 }
 0xcab   :  { %v4288_v3 = vmax.f32 %v4285_v29, %v4286_v8 }
 0xcad   :  { %v4289_v10 = vsub.f32 %v4262_v53, %v4288_v3  ;;  %v4293_v6 = vrot.slane %v4288_v3, 6  ;;  %v4298_v24 = vrot.slane %v4288_v3, 4  ;;  %v4303_v13 = vrot.slane %v4288_v3, 2 }
 0xcae   :  { %v4308_v25 = vsub.f32 %v4265_v0, %v4288_v3 }
 0xcaf   :  { %v4290_v27 = vmul.f32 1.442695, %v4289_v10  ;;  %v4295_v18 = vsub.f32 %v4262_v53, %v4293_v6  ;;  %v4300_v9 = vsub.f32 %v4262_v53, %v4298_v24  ;;  %v4305_v5 = vsub.f32 %v4262_v53, %v4303_v13 }
 0xcb0   :  { %v4311_v15 = vsub.f32 %v4265_v0, %v4293_v6  ;;  %v4314_v26 = vsub.f32 %v4265_v0, %v4298_v24  ;;  %v4317_v12 = vsub.f32 %v4265_v0, %v4303_v13  ;;  %v4309_v20 = vmul.f32 1.442695, %v4308_v25 }
 0xcb1   :  { %v4296_v22 = vmul.f32 1.442695, %v4295_v18  ;;  %v4301_v1 = vmul.f32 1.442695, %v4300_v9  ;;  %v4306_v31 = vmul.f32 1.442695, %v4305_v5  ;;  %5717 = vpow2.f32 %v4290_v27 }
 0xcb2   :  { %v4312_v19 = vmul.f32 1.442695, %v4311_v15  ;;  %v4315_v30 = vmul.f32 1.442695, %v4314_v26  ;;  %v4318_v16 = vmul.f32 1.442695, %v4317_v12 }
 0xcb3   :  { %5719 = vpow2.f32 %v4296_v22 }
 0xcb4   :  { %5721 = vpow2.f32 %v4301_v1 }
 0xcb5   :  { %5723 = vpow2.f32 %v4306_v31 }
 0xcb6   :  { %5725 = vpow2.f32 %v4312_v19 }
 0xcb7   :  { %5727 = vpow2.f32 %v4309_v20 }
 0xcb8   :  { %5729 = vpow2.f32 %v4315_v30 }
 0xcb9   :  { %5731 = vpow2.f32 %v4318_v16 }
 0xcbb   :  { %v5718_v4 = vpop.eup %5717 }
 0xcbd   :  { %v5720_v7 = vpop.eup %5719 }
 0xcbe   :  { %v5722_v32 = vpop.eup %5721  ;;  %v4321_v44 = vrot.slane %v5720_v7, 2 }
 0xcbf   :  { %v5724_v33 = vpop.eup %5723  ;;  %v4325_v11 = vrot.slane %v5722_v32, 4 }
 0xcc0   :  { %v4323_v17 = vadd.f32 %v5718_v4, %v4321_v44  ;;  %v4329_v14 = vrot.slane %v5724_v33, 6  ;;  %v5726_v34 = vpop.eup %5725 }
 0xcc1   :  { %v5728_v35 = vpop.eup %5727  ;;  %v4334_v39 = vrot.slane %v5726_v34, 2 }
 0xcc2   :  { %v4327_v48 = vadd.f32 %v4325_v11, %v4323_v17  ;;  %v5730_v37 = vpop.eup %5729 }
 0xcc3   :  { %v5732_v59 = vpop.eup %5731  ;;  %v4338_v42 = vrot.slane %v5730_v37, 4 }
 0xcc4   :  { %v4331_v57 = vadd.f32 %v4329_v14, %v4327_v48  ;;  %v4342_v45 = vrot.slane %v5732_v59, 6 }
 0xcc6   :  { %v4332_v38 = vadd.f32 %v5728_v35, %v4331_v57 }
 0xcc8   :  { %v4336_v40 = vadd.f32 %v4334_v39, %v4332_v38 }
 0xcca   :  { %v4340_v43 = vadd.f32 %v4338_v42, %v4336_v40 }
 0xccc   :  { %v4344_v46 = vadd.f32 %v4342_v45, %v4340_v43 }
 0xcce   :  { %5733 = vrcp.f32 %v4344_v46 }
 0xcd8   :  { %v5734_v47 = vpop.eup %5733 }
 0xcd9   :  { %v4347_v49 = vmul.f32 %v5734_v47, %v5718_v4  ;;  %v4351_v50 = vrot.slane %v5734_v47, 6  ;;  %v4357_v23 = vrot.slane %v5734_v47, 4  ;;  %v4363_v51 = vrot.slane %v5734_v47, 2 }
 0xcda   :  { %v4369_v52 = vmul.f32 %v5734_v47, %v5728_v35 }
 0xcdb   :  { %4349 = vst.msk [vmem:[%s7675_s5] sm:$0x3] %vm4348_vm0, %v4347_v49  ;;  %v4353_v53 = vmul.f32 %v5720_v7, %v4351_v50  ;;  %v4359_v54 = vmul.f32 %v5722_v32, %v4357_v23  ;;  %v4365_v55 = vmul.f32 %v5724_v33, %v4363_v51  ;;  %v4372_v56 = vmul.f32 %v5726_v34, %v4351_v50 }
 0xcdc   :  { %4920 = vst.msk [vmem:[%s7675_s5 + $0x8] sm:$0x3] %vm4348_vm0, %v4369_v52  ;;  %v4375_v58 = vmul.f32 %v5730_v37, %v4357_v23  ;;  %v4378_v60 = vmul.f32 %v5732_v59, %v4363_v51 }
 0xcdd   :  { %4917 = vst.msk [vmem:[%s7675_s5] sm:$0xc] %vm4355_vm1, %v4353_v53  ;;  %4921 = vst.msk [vmem:[%s7675_s5 + $0x8] sm:$0xc] %vm4355_vm1, %v4372_v56 }
 0xcde   :  { %4918 = vst.msk [vmem:[%s7675_s5] sm:$0x30] %vm4361_vm2, %v4359_v54  ;;  %4922 = vst.msk [vmem:[%s7675_s5 + $0x8] sm:$0x30] %vm4361_vm2, %v4375_v58 }
 0xcdf   :  { %4919 = vst.msk [vmem:[%s7675_s5] sm:$0xc0] %vm4367_vm3, %v4365_v55  ;;  %4923 = vst.msk [vmem:[%s7675_s5 + $0x8] sm:$0xc0] %vm4367_vm3, %v4378_v60 }

</bundles_post_ra>
